<compile_context>
chip_gen: v7x
topology: tpu7x:2x2x1
jax: 0.10.0
libtpu: 0.0.40
codegen_flags: <defaults>
</compile_context>

<pallas_src>
import functools

import jax
import jax.numpy as jnp
from jax import lax
from jax.experimental import pallas as pl
from jax.experimental.pallas import tpu as pltpu

_OUT_PAD = 128  # lane-dense output width (multiple of 128)


def _mann_lstm_kernel(x_ref, wih1_ref, whh1_ref, b1_ref,
                      wih2_ref, whh2_ref, b2_ref, out_ref, xp_ref):
    # x_ref:   (TB_pad, D_pad)   time-major rows (t*B + b), feature dim zero-padded
    # out_ref: (T, B, _OUT_PAD)  lane-dense, first N lanes valid
    # xp_ref:  (TB_pad, 4*H1)    scratch for the hoisted layer-1 input projection
    T, B, out_pad = out_ref.shape
    H1 = whh1_ref.shape[0]
    N = whh2_ref.shape[0]

    # --- hoisted, batched layer-1 input projection: one MXU matmul with M = T*B ---
    xp_ref[...] = (
        jnp.dot(x_ref[...], wih1_ref[...], preferred_element_type=jnp.float32)
        + b1_ref[...])

    # Hoist weight loads / bias broadcast / pad constant out of the unrolled loop
    # (JAX does not CSE broadcasts, so do them once here).
    whh1 = whh1_ref[...]
    wih2 = wih2_ref[...]
    whh2 = whh2_ref[...]
    b2 = jnp.broadcast_to(b2_ref[...], (B, 4 * N))
    lane_pad = jnp.zeros((B, out_pad - N), jnp.float32)

    # LSTM state carried in registers (tiny: (B, H1) and (B, N)).
    h1 = jnp.zeros((B, H1), jnp.float32)
    c1 = jnp.zeros((B, H1), jnp.float32)
    h2 = jnp.zeros((B, N), jnp.float32)
    c2 = jnp.zeros((B, N), jnp.float32)

    def gates_to_hc(gates, c, H):
        # Full-width transcendentals (EUP slot), then static lane slices for i/f/g/o.
        sig = jax.nn.sigmoid(gates)
        th = jnp.tanh(gates)
        i = sig[:, 0:H]
        f = sig[:, H:2 * H]
        g = th[:, 2 * H:3 * H]
        o = sig[:, 3 * H:4 * H]
        c_new = f * c + i * g
        h_new = o * jnp.tanh(c_new)
        return h_new, c_new

    # Fully-unrolled recurrence (T static & small) — only the small recurrent matmuls
    # remain on the serial path.
    for t in range(T):
        g1 = xp_ref[pl.ds(t * B, B), :] + jnp.dot(
            h1, whh1, preferred_element_type=jnp.float32)
        h1, c1 = gates_to_hc(g1, c1, H1)

        g2 = (jnp.dot(h1, wih2, preferred_element_type=jnp.float32)
              + jnp.dot(h2, whh2, preferred_element_type=jnp.float32)
              + b2)
        h2, c2 = gates_to_hc(g2, c2, N)

        # Lane-dense store: zero-pad to 128 lanes (VPU concat), unmasked lane-wise vst.
        out_ref[t] = jnp.concatenate([h2, lane_pad], axis=-1)


def init_mann_params(key, num_classes, hidden_dim, scale=0.1):
    N = num_classes
    D = 784 + N
    H1 = hidden_dim
    ks = jax.random.split(key, 6)
    u = lambda k, s: jax.random.uniform(k, s, jnp.float32, -scale, scale)
    return {
        "wih1": u(ks[0], (D, 4 * H1)),    # layer1 W_ih^T
        "whh1": u(ks[1], (H1, 4 * H1)),   # layer1 W_hh^T
        "b1":   u(ks[2], (1, 4 * H1)),    # layer1 b_ih + b_hh
        "wih2": u(ks[3], (H1, 4 * N)),    # layer2 W_ih^T
        "whh2": u(ks[4], (N, 4 * N)),     # layer2 W_hh^T
        "b2":   u(ks[5], (1, 4 * N)),     # layer2 b_ih + b_hh
    }


@functools.partial(jax.jit, static_argnums=(3, 4))
def mann_forward(params, input_images, input_labels, num_classes, samples_per_class):
    B = input_images.shape[0]
    K1 = samples_per_class                # K + 1
    N = num_classes
    D = 784 + N
    T = K1 * N
    H1 = params["whh1"].shape[0]

    D_PAD = ((D + 127) // 128) * 128      # 789 -> 896: aligned MXU K steps
    TB = T * B
    TB_PAD = ((TB + 7) // 8) * 8          # clean sublane tiling for the batched projection

    # Glue: concat, reshape, zero out labels for the final N (query) time steps.
    concatenated = jnp.concatenate([input_images, input_labels], axis=-1)
    concatenated = concatenated.reshape(B, T, D)
    mask = jnp.ones_like(concatenated).at[:, -N:, 784:].set(0.0)
    x = (concatenated * mask).astype(jnp.float32)

    # Time-major flattened rows (t*B + b), zero-padded rows/features.
    x_tbd = jnp.transpose(x, (1, 0, 2)).reshape(TB, D)
    x2d = jnp.pad(x_tbd, ((0, TB_PAD - TB), (0, D_PAD - D)))
    wih1_p = jnp.pad(params["wih1"], ((0, D_PAD - D), (0, 0)))  # padded rows are zero

    out_tbp = pl.pallas_call(
        _mann_lstm_kernel,
        out_shape=jax.ShapeDtypeStruct((T, B, _OUT_PAD), jnp.float32),
        in_specs=[pl.BlockSpec(memory_space=pltpu.MemorySpace.VMEM)] * 7,
        out_specs=pl.BlockSpec(memory_space=pltpu.MemorySpace.VMEM),
        scratch_shapes=[
            pltpu.VMEM((TB_PAD, 4 * H1), jnp.float32),  # hoisted layer-1 projection
        ],
    )(x2d, wih1_p, params["whh1"], params["b1"],
      params["wih2"], params["whh2"], params["b2"])

    out_tbn = out_tbp[:, :, :N]
    return jnp.transpose(out_tbn, (1, 0, 2)).reshape(B, K1, N, N)


# ----- pure-JAX reference (for correctness check) -----
def _lstm_ref(x_btd, wih, whh, b, H):
    B = x_btd.shape[0]

    def step(carry, x_t):
        h, c = carry
        gates = x_t @ wih + h @ whh + b[0]
        i = jax.nn.sigmoid(gates[:, 0:H])
        f = jax.nn.sigmoid(gates[:, H:2 * H])
        g = jnp.tanh(gates[:, 2 * H:3 * H])
        o = jax.nn.sigmoid(gates[:, 3 * H:4 * H])
        c = f * c + i * g
        h = o * jnp.tanh(c)
        return (h, c), h

    init = (jnp.zeros((B, H), jnp.float32), jnp.zeros((B, H), jnp.float32))
    _, ys = lax.scan(step, init, jnp.transpose(x_btd, (1, 0, 2)))
    return jnp.transpose(ys, (1, 0, 2))


def mann_forward_ref(params, input_images, input_labels, num_classes, samples_per_class):
    B = input_images.shape[0]
    K1 = samples_per_class
    N = num_classes
    D = 784 + N
    T = K1 * N
    H1 = params["whh1"].shape[0]
    concatenated = jnp.concatenate([input_images, input_labels], axis=-1).reshape(B, T, D)
    mask = jnp.ones_like(concatenated).at[:, -N:, 784:].set(0.0)
    x = (concatenated * mask).astype(jnp.float32)
    h1 = _lstm_ref(x, params["wih1"], params["whh1"], params["b1"], H1)
    h2 = _lstm_ref(h1, params["wih2"], params["whh2"], params["b2"], N)
    return h2.reshape(B, K1, N, N)


if __name__ == "__main__":
    num_classes = 5          # N
    samples_per_class = 3    # K + 1
    hidden_dim = 32
    B = 2

    key = jax.random.PRNGKey(0)
    k_img, k_lab, k_par = jax.random.split(key, 3)

    input_images = jax.random.uniform(
        k_img, (B, samples_per_class, num_classes, 784), jnp.float32)
    # one-hot style labels
    label_idx = jax.random.randint(
        k_lab, (B, samples_per_class, num_classes), 0, num_classes)
    input_labels = jax.nn.one_hot(label_idx, num_classes, dtype=jnp.float32)

    params = init_mann_params(k_par, num_classes, hidden_dim)

    out = mann_forward(params, input_images, input_labels,
                       num_classes, samples_per_class)
    out = jax.block_until_ready(out)
    assert out.shape == (B, samples_per_class, num_classes, num_classes)

    ref = jax.block_until_ready(
        mann_forward_ref(params, input_images, input_labels,
                         num_classes, samples_per_class))
    if not jnp.allclose(out, ref, atol=5e-2, rtol=5e-2):
        raise AssertionError("Pallas MANN output mismatch vs JAX reference")

    print("KERNEL_OK")
</pallas_src>

<mosaic_0001>
module attributes {stable_mosaic.version = 11 : i64} {
  func.func @_mann_lstm_kernel(%arg0: memref<32x896xf32, #tpu.memory_space<vmem>>, %arg1: memref<896x128xf32, #tpu.memory_space<vmem>>, %arg2: memref<32x128xf32, #tpu.memory_space<vmem>>, %arg3: memref<1x128xf32, #tpu.memory_space<vmem>>, %arg4: memref<32x20xf32, #tpu.memory_space<vmem>>, %arg5: memref<5x20xf32, #tpu.memory_space<vmem>>, %arg6: memref<1x20xf32, #tpu.memory_space<vmem>>, %arg7: memref<15x2x128xf32, #tpu.memory_space<vmem>>, %arg8: memref<32x128xf32, #tpu.memory_space<vmem>>) attributes {dimension_semantics = [], scalar_prefetch = 0 : i64, scratch_operands = 1 : i64, tpu.core_type = #tpu.core_type<tc>} {
    %c0 = arith.constant 0 : index
    %c0_0 = arith.constant 0 : index
    %0 = vector.load %arg0[%c0, %c0_0] : memref<32x896xf32, #tpu.memory_space<vmem>>, vector<32x896xf32>
    %c0_1 = arith.constant 0 : index
    %c0_2 = arith.constant 0 : index
    %1 = vector.load %arg1[%c0_1, %c0_2] : memref<896x128xf32, #tpu.memory_space<vmem>>, vector<896x128xf32>
    %cst = arith.constant dense<0.000000e+00> : vector<32x128xf32>
    %2 = tpu.matmul %0, %1, %cst {dimension_numbers = #tpu.dot_dimension_numbers<[1], [0], [0], [1], [0, 0, 1, 1], [], []>} : vector<32x896xf32>, vector<896x128xf32>, vector<32x128xf32> -> vector<32x128xf32>
    %c0_3 = arith.constant 0 : index
    %c0_4 = arith.constant 0 : index
    %3 = vector.load %arg3[%c0_3, %c0_4] : memref<1x128xf32, #tpu.memory_space<vmem>>, vector<1x128xf32>
    %4 = vector.broadcast %3 : vector<1x128xf32> to vector<32x128xf32>
    %5 = arith.addf %2, %4 : vector<32x128xf32>
    %c0_5 = arith.constant 0 : index
    %c0_6 = arith.constant 0 : index
    %6 = vector.load %arg8[%c0_5, %c0_6] : memref<32x128xf32, #tpu.memory_space<vmem>>, vector<32x128xf32>
    tpu.vector_store %arg8[%c0_5, %c0_6], %5 {strides = array<i32>} : memref<32x128xf32, #tpu.memory_space<vmem>>, vector<32x128xf32>,
    %c0_7 = arith.constant 0 : index
    %c0_8 = arith.constant 0 : index
    %7 = vector.load %arg2[%c0_7, %c0_8] : memref<32x128xf32, #tpu.memory_space<vmem>>, vector<32x128xf32>
    %c0_9 = arith.constant 0 : index
    %c0_10 = arith.constant 0 : index
    %8 = vector.load %arg4[%c0_9, %c0_10] : memref<32x20xf32, #tpu.memory_space<vmem>>, vector<32x20xf32>
    %c0_11 = arith.constant 0 : index
    %c0_12 = arith.constant 0 : index
    %9 = vector.load %arg5[%c0_11, %c0_12] : memref<5x20xf32, #tpu.memory_space<vmem>>, vector<5x20xf32>
    %c0_13 = arith.constant 0 : index
    %c0_14 = arith.constant 0 : index
    %10 = vector.load %arg6[%c0_13, %c0_14] : memref<1x20xf32, #tpu.memory_space<vmem>>, vector<1x20xf32>
    %11 = vector.shape_cast %10 : vector<1x20xf32> to vector<1x20xf32>
    %12 = vector.broadcast %11 : vector<1x20xf32> to vector<2x20xf32>
    %cst_15 = arith.constant 0.000000e+00 : f32
    %13 = vector.broadcast %cst_15 : f32 to vector<2x123xf32>
    %cst_16 = arith.constant 0.000000e+00 : f32
    %14 = vector.broadcast %cst_16 : f32 to vector<2x32xf32>
    %cst_17 = arith.constant 0.000000e+00 : f32
    %15 = vector.broadcast %cst_17 : f32 to vector<2x32xf32>
    %cst_18 = arith.constant 0.000000e+00 : f32
    %16 = vector.broadcast %cst_18 : f32 to vector<2x5xf32>
    %cst_19 = arith.constant 0.000000e+00 : f32
    %17 = vector.broadcast %cst_19 : f32 to vector<2x5xf32>
    %c0_20 = arith.constant 0 : index
    %c0_21 = arith.constant 0 : index
    %18 = vector.load %arg8[%c0_20, %c0_21] : memref<32x128xf32, #tpu.memory_space<vmem>>, vector<2x128xf32>
    %cst_22 = arith.constant dense<0.000000e+00> : vector<2x128xf32>
    %19 = tpu.matmul %14, %7, %cst_22 {dimension_numbers = #tpu.dot_dimension_numbers<[1], [0], [0], [1], [0, 0, 1, 1], [], []>} : vector<2x32xf32>, vector<32x128xf32>, vector<2x128xf32> -> vector<2x128xf32>
    %20 = arith.addf %18, %19 : vector<2x128xf32>
    %21 = arith.negf %20 : vector<2x128xf32>
    %22 = math.exp %21 : vector<2x128xf32>
    %cst_23 = arith.constant 1.000000e+00 : f32
    %23 = vector.broadcast %cst_23 : f32 to vector<2x128xf32>
    %24 = arith.addf %23, %22 : vector<2x128xf32>
    %25 = arith.divf %23, %24 : vector<2x128xf32>
    %26 = math.tanh %20 : vector<2x128xf32>
    %27 = vector.extract_strided_slice %25 {offsets = [0, 0], sizes = [2, 32], strides = [1, 1]} : vector<2x128xf32> to vector<2x32xf32>
    %28 = vector.extract_strided_slice %25 {offsets = [0, 32], sizes = [2, 32], strides = [1, 1]} : vector<2x128xf32> to vector<2x32xf32>
    %29 = vector.extract_strided_slice %26 {offsets = [0, 64], sizes = [2, 32], strides = [1, 1]} : vector<2x128xf32> to vector<2x32xf32>
    %30 = vector.extract_strided_slice %25 {offsets = [0, 96], sizes = [2, 32], strides = [1, 1]} : vector<2x128xf32> to vector<2x32xf32>
    %31 = arith.mulf %28, %15 : vector<2x32xf32>
    %32 = arith.mulf %27, %29 : vector<2x32xf32>
    %33 = arith.addf %31, %32 : vector<2x32xf32>
    %34 = math.tanh %33 : vector<2x32xf32>
    %35 = arith.mulf %30, %34 : vector<2x32xf32>
    %cst_24 = arith.constant dense<0.000000e+00> : vector<2x20xf32>
    %36 = tpu.matmul %35, %8, %cst_24 {dimension_numbers = #tpu.dot_dimension_numbers<[1], [0], [0], [1], [0, 0, 1, 1], [], []>} : vector<2x32xf32>, vector<32x20xf32>, vector<2x20xf32> -> vector<2x20xf32>
    %cst_25 = arith.constant dense<0.000000e+00> : vector<2x20xf32>
    %37 = tpu.matmul %16, %9, %cst_25 {dimension_numbers = #tpu.dot_dimension_numbers<[1], [0], [0], [1], [0, 0, 1, 1], [], []>} : vector<2x5xf32>, vector<5x20xf32>, vector<2x20xf32> -> vector<2x20xf32>
    %38 = arith.addf %36, %37 : vector<2x20xf32>
    %39 = arith.addf %38, %12 : vector<2x20xf32>
    %40 = arith.negf %39 : vector<2x20xf32>
    %41 = math.exp %40 : vector<2x20xf32>
    %cst_26 = arith.constant 1.000000e+00 : f32
    %42 = vector.broadcast %cst_26 : f32 to vector<2x20xf32>
    %43 = arith.addf %42, %41 : vector<2x20xf32>
    %44 = arith.divf %42, %43 : vector<2x20xf32>
    %45 = math.tanh %39 : vector<2x20xf32>
    %46 = vector.extract_strided_slice %44 {offsets = [0, 0], sizes = [2, 5], strides = [1, 1]} : vector<2x20xf32> to vector<2x5xf32>
    %47 = vector.extract_strided_slice %44 {offsets = [0, 5], sizes = [2, 5], strides = [1, 1]} : vector<2x20xf32> to vector<2x5xf32>
    %48 = vector.extract_strided_slice %45 {offsets = [0, 10], sizes = [2, 5], strides = [1, 1]} : vector<2x20xf32> to vector<2x5xf32>
    %49 = vector.extract_strided_slice %44 {offsets = [0, 15], sizes = [2, 5], strides = [1, 1]} : vector<2x20xf32> to vector<2x5xf32>
    %50 = arith.mulf %47, %17 : vector<2x5xf32>
    %51 = arith.mulf %46, %48 : vector<2x5xf32>
    %52 = arith.addf %50, %51 : vector<2x5xf32>
    %53 = math.tanh %52 : vector<2x5xf32>
    %54 = arith.mulf %49, %53 : vector<2x5xf32>
    %55 = tpu.concatenate %54, %13 in 1 : vector<2x5xf32>, vector<2x123xf32> -> vector<2x128xf32>
    %c0_27 = arith.constant 0 : index
    %c0_28 = arith.constant 0 : index
    %c0_29 = arith.constant 0 : index
    %56 = vector.load %arg7[%c0_27, %c0_28, %c0_29] : memref<15x2x128xf32, #tpu.memory_space<vmem>>, vector<1x2x128xf32>
    %57 = vector.shape_cast %56 : vector<1x2x128xf32> to vector<2x128xf32>
    %58 = vector.shape_cast %55 : vector<2x128xf32> to vector<1x2x128xf32>
    tpu.vector_store %arg7[%c0_27, %c0_28, %c0_29], %58 {strides = array<i32>} : memref<15x2x128xf32, #tpu.memory_space<vmem>>, vector<1x2x128xf32>,
    %c2 = arith.constant 2 : index
    %c0_30 = arith.constant 0 : index
    %59 = vector.load %arg8[%c2, %c0_30] : memref<32x128xf32, #tpu.memory_space<vmem>>, vector<2x128xf32>
    %cst_31 = arith.constant dense<0.000000e+00> : vector<2x128xf32>
    %60 = tpu.matmul %35, %7, %cst_31 {dimension_numbers = #tpu.dot_dimension_numbers<[1], [0], [0], [1], [0, 0, 1, 1], [], []>} : vector<2x32xf32>, vector<32x128xf32>, vector<2x128xf32> -> vector<2x128xf32>
    %61 = arith.addf %59, %60 : vector<2x128xf32>
    %62 = arith.negf %61 : vector<2x128xf32>
    %63 = math.exp %62 : vector<2x128xf32>
    %cst_32 = arith.constant 1.000000e+00 : f32
    %64 = vector.broadcast %cst_32 : f32 to vector<2x128xf32>
    %65 = arith.addf %64, %63 : vector<2x128xf32>
    %66 = arith.divf %64, %65 : vector<2x128xf32>
    %67 = math.tanh %61 : vector<2x128xf32>
    %68 = vector.extract_strided_slice %66 {offsets = [0, 0], sizes = [2, 32], strides = [1, 1]} : vector<2x128xf32> to vector<2x32xf32>
    %69 = vector.extract_strided_slice %66 {offsets = [0, 32], sizes = [2, 32], strides = [1, 1]} : vector<2x128xf32> to vector<2x32xf32>
    %70 = vector.extract_strided_slice %67 {offsets = [0, 64], sizes = [2, 32], strides = [1, 1]} : vector<2x128xf32> to vector<2x32xf32>
    %71 = vector.extract_strided_slice %66 {offsets = [0, 96], sizes = [2, 32], strides = [1, 1]} : vector<2x128xf32> to vector<2x32xf32>
    %72 = arith.mulf %69, %33 : vector<2x32xf32>
    %73 = arith.mulf %68, %70 : vector<2x32xf32>
    %74 = arith.addf %72, %73 : vector<2x32xf32>
    %75 = math.tanh %74 : vector<2x32xf32>
    %76 = arith.mulf %71, %75 : vector<2x32xf32>
    %cst_33 = arith.constant dense<0.000000e+00> : vector<2x20xf32>
    %77 = tpu.matmul %76, %8, %cst_33 {dimension_numbers = #tpu.dot_dimension_numbers<[1], [0], [0], [1], [0, 0, 1, 1], [], []>} : vector<2x32xf32>, vector<32x20xf32>, vector<2x20xf32> -> vector<2x20xf32>
    %cst_34 = arith.constant dense<0.000000e+00> : vector<2x20xf32>
    %78 = tpu.matmul %54, %9, %cst_34 {dimension_numbers = #tpu.dot_dimension_numbers<[1], [0], [0], [1], [0, 0, 1, 1], [], []>} : vector<2x5xf32>, vector<5x20xf32>, vector<2x20xf32> -> vector<2x20xf32>
    %79 = arith.addf %77, %78 : vector<2x20xf32>
    %80 = arith.addf %79, %12 : vector<2x20xf32>
    %81 = arith.negf %80 : vector<2x20xf32>
    %82 = math.exp %81 : vector<2x20xf32>
    %cst_35 = arith.constant 1.000000e+00 : f32
    %83 = vector.broadcast %cst_35 : f32 to vector<2x20xf32>
    %84 = arith.addf %83, %82 : vector<2x20xf32>
    %85 = arith.divf %83, %84 : vector<2x20xf32>
    %86 = math.tanh %80 : vector<2x20xf32>
    %87 = vector.extract_strided_slice %85 {offsets = [0, 0], sizes = [2, 5], strides = [1, 1]} : vector<2x20xf32> to vector<2x5xf32>
    %88 = vector.extract_strided_slice %85 {offsets = [0, 5], sizes = [2, 5], strides = [1, 1]} : vector<2x20xf32> to vector<2x5xf32>
    %89 = vector.extract_strided_slice %86 {offsets = [0, 10], sizes = [2, 5], strides = [1, 1]} : vector<2x20xf32> to vector<2x5xf32>
    %90 = vector.extract_strided_slice %85 {offsets = [0, 15], sizes = [2, 5], strides = [1, 1]} : vector<2x20xf32> to vector<2x5xf32>
    %91 = arith.mulf %88, %52 : vector<2x5xf32>
    %92 = arith.mulf %87, %89 : vector<2x5xf32>
    %93 = arith.addf %91, %92 : vector<2x5xf32>
    %94 = math.tanh %93 : vector<2x5xf32>
    %95 = arith.mulf %90, %94 : vector<2x5xf32>
    %96 = tpu.concatenate %95, %13 in 1 : vector<2x5xf32>, vector<2x123xf32> -> vector<2x128xf32>
    %c1 = arith.constant 1 : index
    %c0_36 = arith.constant 0 : index
    %c0_37 = arith.constant 0 : index
    %97 = vector.load %arg7[%c1, %c0_36, %c0_37] : memref<15x2x128xf32, #tpu.memory_space<vmem>>, vector<1x2x128xf32>
    %98 = vector.shape_cast %97 : vector<1x2x128xf32> to vector<2x128xf32>
    %99 = vector.shape_cast %96 : vector<2x128xf32> to vector<1x2x128xf32>
    tpu.vector_store %arg7[%c1, %c0_36, %c0_37], %99 {strides = array<i32>} : memref<15x2x128xf32, #tpu.memory_space<vmem>>, vector<1x2x128xf32>,
    %c4 = arith.constant 4 : index
    %c0_38 = arith.constant 0 : index
    %100 = vector.load %arg8[%c4, %c0_38] : memref<32x128xf32, #tpu.memory_space<vmem>>, vector<2x128xf32>
    %cst_39 = arith.constant dense<0.000000e+00> : vector<2x128xf32>
    %101 = tpu.matmul %76, %7, %cst_39 {dimension_numbers = #tpu.dot_dimension_numbers<[1], [0], [0], [1], [0, 0, 1, 1], [], []>} : vector<2x32xf32>, vector<32x128xf32>, vector<2x128xf32> -> vector<2x128xf32>
    %102 = arith.addf %100, %101 : vector<2x128xf32>
    %103 = arith.negf %102 : vector<2x128xf32>
    %104 = math.exp %103 : vector<2x128xf32>
    %cst_40 = arith.constant 1.000000e+00 : f32
    %105 = vector.broadcast %cst_40 : f32 to vector<2x128xf32>
    %106 = arith.addf %105, %104 : vector<2x128xf32>
    %107 = arith.divf %105, %106 : vector<2x128xf32>
    %108 = math.tanh %102 : vector<2x128xf32>
    %109 = vector.extract_strided_slice %107 {offsets = [0, 0], sizes = [2, 32], strides = [1, 1]} : vector<2x128xf32> to vector<2x32xf32>
    %110 = vector.extract_strided_slice %107 {offsets = [0, 32], sizes = [2, 32], strides = [1, 1]} : vector<2x128xf32> to vector<2x32xf32>
    %111 = vector.extract_strided_slice %108 {offsets = [0, 64], sizes = [2, 32], strides = [1, 1]} : vector<2x128xf32> to vector<2x32xf32>
    %112 = vector.extract_strided_slice %107 {offsets = [0, 96], sizes = [2, 32], strides = [1, 1]} : vector<2x128xf32> to vector<2x32xf32>
    %113 = arith.mulf %110, %74 : vector<2x32xf32>
    %114 = arith.mulf %109, %111 : vector<2x32xf32>
    %115 = arith.addf %113, %114 : vector<2x32xf32>
    %116 = math.tanh %115 : vector<2x32xf32>
    %117 = arith.mulf %112, %116 : vector<2x32xf32>
    %cst_41 = arith.constant dense<0.000000e+00> : vector<2x20xf32>
    %118 = tpu.matmul %117, %8, %cst_41 {dimension_numbers = #tpu.dot_dimension_numbers<[1], [0], [0], [1], [0, 0, 1, 1], [], []>} : vector<2x32xf32>, vector<32x20xf32>, vector<2x20xf32> -> vector<2x20xf32>
    %cst_42 = arith.constant dense<0.000000e+00> : vector<2x20xf32>
    %119 = tpu.matmul %95, %9, %cst_42 {dimension_numbers = #tpu.dot_dimension_numbers<[1], [0], [0], [1], [0, 0, 1, 1], [], []>} : vector<2x5xf32>, vector<5x20xf32>, vector<2x20xf32> -> vector<2x20xf32>
    %120 = arith.addf %118, %119 : vector<2x20xf32>
    %121 = arith.addf %120, %12 : vector<2x20xf32>
    %122 = arith.negf %121 : vector<2x20xf32>
    %123 = math.exp %122 : vector<2x20xf32>
    %cst_43 = arith.constant 1.000000e+00 : f32
    %124 = vector.broadcast %cst_43 : f32 to vector<2x20xf32>
    %125 = arith.addf %124, %123 : vector<2x20xf32>
    %126 = arith.divf %124, %125 : vector<2x20xf32>
    %127 = math.tanh %121 : vector<2x20xf32>
    %128 = vector.extract_strided_slice %126 {offsets = [0, 0], sizes = [2, 5], strides = [1, 1]} : vector<2x20xf32> to vector<2x5xf32>
    %129 = vector.extract_strided_slice %126 {offsets = [0, 5], sizes = [2, 5], strides = [1, 1]} : vector<2x20xf32> to vector<2x5xf32>
    %130 = vector.extract_strided_slice %127 {offsets = [0, 10], sizes = [2, 5], strides = [1, 1]} : vector<2x20xf32> to vector<2x5xf32>
    %131 = vector.extract_strided_slice %126 {offsets = [0, 15], sizes = [2, 5], strides = [1, 1]} : vector<2x20xf32> to vector<2x5xf32>
    %132 = arith.mulf %129, %93 : vector<2x5xf32>
    %133 = arith.mulf %128, %130 : vector<2x5xf32>
    %134 = arith.addf %132, %133 : vector<2x5xf32>
    %135 = math.tanh %134 : vector<2x5xf32>
    %136 = arith.mulf %131, %135 : vector<2x5xf32>
    %137 = tpu.concatenate %136, %13 in 1 : vector<2x5xf32>, vector<2x123xf32> -> vector<2x128xf32>
    %c2_44 = arith.constant 2 : index
    %c0_45 = arith.constant 0 : index
    %c0_46 = arith.constant 0 : index
    %138 = vector.load %arg7[%c2_44, %c0_45, %c0_46] : memref<15x2x128xf32, #tpu.memory_space<vmem>>, vector<1x2x128xf32>
    %139 = vector.shape_cast %138 : vector<1x2x128xf32> to vector<2x128xf32>
    %140 = vector.shape_cast %137 : vector<2x128xf32> to vector<1x2x128xf32>
    tpu.vector_store %arg7[%c2_44, %c0_45, %c0_46], %140 {strides = array<i32>} : memref<15x2x128xf32, #tpu.memory_space<vmem>>, vector<1x2x128xf32>,
    %c6 = arith.constant 6 : index
    %c0_47 = arith.constant 0 : index
    %141 = vector.load %arg8[%c6, %c0_47] : memref<32x128xf32, #tpu.memory_space<vmem>>, vector<2x128xf32>
    %cst_48 = arith.constant dense<0.000000e+00> : vector<2x128xf32>
    %142 = tpu.matmul %117, %7, %cst_48 {dimension_numbers = #tpu.dot_dimension_numbers<[1], [0], [0], [1], [0, 0, 1, 1], [], []>} : vector<2x32xf32>, vector<32x128xf32>, vector<2x128xf32> -> vector<2x128xf32>
    %143 = arith.addf %141, %142 : vector<2x128xf32>
    %144 = arith.negf %143 : vector<2x128xf32>
    %145 = math.exp %144 : vector<2x128xf32>
    %cst_49 = arith.constant 1.000000e+00 : f32
    %146 = vector.broadcast %cst_49 : f32 to vector<2x128xf32>
    %147 = arith.addf %146, %145 : vector<2x128xf32>
    %148 = arith.divf %146, %147 : vector<2x128xf32>
    %149 = math.tanh %143 : vector<2x128xf32>
    %150 = vector.extract_strided_slice %148 {offsets = [0, 0], sizes = [2, 32], strides = [1, 1]} : vector<2x128xf32> to vector<2x32xf32>
    %151 = vector.extract_strided_slice %148 {offsets = [0, 32], sizes = [2, 32], strides = [1, 1]} : vector<2x128xf32> to vector<2x32xf32>
    %152 = vector.extract_strided_slice %149 {offsets = [0, 64], sizes = [2, 32], strides = [1, 1]} : vector<2x128xf32> to vector<2x32xf32>
    %153 = vector.extract_strided_slice %148 {offsets = [0, 96], sizes = [2, 32], strides = [1, 1]} : vector<2x128xf32> to vector<2x32xf32>
    %154 = arith.mulf %151, %115 : vector<2x32xf32>
    %155 = arith.mulf %150, %152 : vector<2x32xf32>
    %156 = arith.addf %154, %155 : vector<2x32xf32>
    %157 = math.tanh %156 : vector<2x32xf32>
    %158 = arith.mulf %153, %157 : vector<2x32xf32>
    %cst_50 = arith.constant dense<0.000000e+00> : vector<2x20xf32>
    %159 = tpu.matmul %158, %8, %cst_50 {dimension_numbers = #tpu.dot_dimension_numbers<[1], [0], [0], [1], [0, 0, 1, 1], [], []>} : vector<2x32xf32>, vector<32x20xf32>, vector<2x20xf32> -> vector<2x20xf32>
    %cst_51 = arith.constant dense<0.000000e+00> : vector<2x20xf32>
    %160 = tpu.matmul %136, %9, %cst_51 {dimension_numbers = #tpu.dot_dimension_numbers<[1], [0], [0], [1], [0, 0, 1, 1], [], []>} : vector<2x5xf32>, vector<5x20xf32>, vector<2x20xf32> -> vector<2x20xf32>
    %161 = arith.addf %159, %160 : vector<2x20xf32>
    %162 = arith.addf %161, %12 : vector<2x20xf32>
    %163 = arith.negf %162 : vector<2x20xf32>
    %164 = math.exp %163 : vector<2x20xf32>
    %cst_52 = arith.constant 1.000000e+00 : f32
    %165 = vector.broadcast %cst_52 : f32 to vector<2x20xf32>
    %166 = arith.addf %165, %164 : vector<2x20xf32>
    %167 = arith.divf %165, %166 : vector<2x20xf32>
    %168 = math.tanh %162 : vector<2x20xf32>
    %169 = vector.extract_strided_slice %167 {offsets = [0, 0], sizes = [2, 5], strides = [1, 1]} : vector<2x20xf32> to vector<2x5xf32>
    %170 = vector.extract_strided_slice %167 {offsets = [0, 5], sizes = [2, 5], strides = [1, 1]} : vector<2x20xf32> to vector<2x5xf32>
    %171 = vector.extract_strided_slice %168 {offsets = [0, 10], sizes = [2, 5], strides = [1, 1]} : vector<2x20xf32> to vector<2x5xf32>
    %172 = vector.extract_strided_slice %167 {offsets = [0, 15], sizes = [2, 5], strides = [1, 1]} : vector<2x20xf32> to vector<2x5xf32>
    %173 = arith.mulf %170, %134 : vector<2x5xf32>
    %174 = arith.mulf %169, %171 : vector<2x5xf32>
    %175 = arith.addf %173, %174 : vector<2x5xf32>
    %176 = math.tanh %175 : vector<2x5xf32>
    %177 = arith.mulf %172, %176 : vector<2x5xf32>
    %178 = tpu.concatenate %177, %13 in 1 : vector<2x5xf32>, vector<2x123xf32> -> vector<2x128xf32>
    %c3 = arith.constant 3 : index
    %c0_53 = arith.constant 0 : index
    %c0_54 = arith.constant 0 : index
    %179 = vector.load %arg7[%c3, %c0_53, %c0_54] : memref<15x2x128xf32, #tpu.memory_space<vmem>>, vector<1x2x128xf32>
    %180 = vector.shape_cast %179 : vector<1x2x128xf32> to vector<2x128xf32>
    %181 = vector.shape_cast %178 : vector<2x128xf32> to vector<1x2x128xf32>
    tpu.vector_store %arg7[%c3, %c0_53, %c0_54], %181 {strides = array<i32>} : memref<15x2x128xf32, #tpu.memory_space<vmem>>, vector<1x2x128xf32>,
    %c8 = arith.constant 8 : index
    %c0_55 = arith.constant 0 : index
    %182 = vector.load %arg8[%c8, %c0_55] : memref<32x128xf32, #tpu.memory_space<vmem>>, vector<2x128xf32>
    %cst_56 = arith.constant dense<0.000000e+00> : vector<2x128xf32>
    %183 = tpu.matmul %158, %7, %cst_56 {dimension_numbers = #tpu.dot_dimension_numbers<[1], [0], [0], [1], [0, 0, 1, 1], [], []>} : vector<2x32xf32>, vector<32x128xf32>, vector<2x128xf32> -> vector<2x128xf32>
    %184 = arith.addf %182, %183 : vector<2x128xf32>
    %185 = arith.negf %184 : vector<2x128xf32>
    %186 = math.exp %185 : vector<2x128xf32>
    %cst_57 = arith.constant 1.000000e+00 : f32
    %187 = vector.broadcast %cst_57 : f32 to vector<2x128xf32>
    %188 = arith.addf %187, %186 : vector<2x128xf32>
    %189 = arith.divf %187, %188 : vector<2x128xf32>
    %190 = math.tanh %184 : vector<2x128xf32>
    %191 = vector.extract_strided_slice %189 {offsets = [0, 0], sizes = [2, 32], strides = [1, 1]} : vector<2x128xf32> to vector<2x32xf32>
    %192 = vector.extract_strided_slice %189 {offsets = [0, 32], sizes = [2, 32], strides = [1, 1]} : vector<2x128xf32> to vector<2x32xf32>
    %193 = vector.extract_strided_slice %190 {offsets = [0, 64], sizes = [2, 32], strides = [1, 1]} : vector<2x128xf32> to vector<2x32xf32>
    %194 = vector.extract_strided_slice %189 {offsets = [0, 96], sizes = [2, 32], strides = [1, 1]} : vector<2x128xf32> to vector<2x32xf32>
    %195 = arith.mulf %192, %156 : vector<2x32xf32>
    %196 = arith.mulf %191, %193 : vector<2x32xf32>
    %197 = arith.addf %195, %196 : vector<2x32xf32>
    %198 = math.tanh %197 : vector<2x32xf32>
    %199 = arith.mulf %194, %198 : vector<2x32xf32>
    %cst_58 = arith.constant dense<0.000000e+00> : vector<2x20xf32>
    %200 = tpu.matmul %199, %8, %cst_58 {dimension_numbers = #tpu.dot_dimension_numbers<[1], [0], [0], [1], [0, 0, 1, 1], [], []>} : vector<2x32xf32>, vector<32x20xf32>, vector<2x20xf32> -> vector<2x20xf32>
    %cst_59 = arith.constant dense<0.000000e+00> : vector<2x20xf32>
    %201 = tpu.matmul %177, %9, %cst_59 {dimension_numbers = #tpu.dot_dimension_numbers<[1], [0], [0], [1], [0, 0, 1, 1], [], []>} : vector<2x5xf32>, vector<5x20xf32>, vector<2x20xf32> -> vector<2x20xf32>
    %202 = arith.addf %200, %201 : vector<2x20xf32>
    %203 = arith.addf %202, %12 : vector<2x20xf32>
    %204 = arith.negf %203 : vector<2x20xf32>
    %205 = math.exp %204 : vector<2x20xf32>
    %cst_60 = arith.constant 1.000000e+00 : f32
    %206 = vector.broadcast %cst_60 : f32 to vector<2x20xf32>
    %207 = arith.addf %206, %205 : vector<2x20xf32>
    %208 = arith.divf %206, %207 : vector<2x20xf32>
    %209 = math.tanh %203 : vector<2x20xf32>
    %210 = vector.extract_strided_slice %208 {offsets = [0, 0], sizes = [2, 5], strides = [1, 1]} : vector<2x20xf32> to vector<2x5xf32>
    %211 = vector.extract_strided_slice %208 {offsets = [0, 5], sizes = [2, 5], strides = [1, 1]} : vector<2x20xf32> to vector<2x5xf32>
    %212 = vector.extract_strided_slice %209 {offsets = [0, 10], sizes = [2, 5], strides = [1, 1]} : vector<2x20xf32> to vector<2x5xf32>
    %213 = vector.extract_strided_slice %208 {offsets = [0, 15], sizes = [2, 5], strides = [1, 1]} : vector<2x20xf32> to vector<2x5xf32>
    %214 = arith.mulf %211, %175 : vector<2x5xf32>
    %215 = arith.mulf %210, %212 : vector<2x5xf32>
    %216 = arith.addf %214, %215 : vector<2x5xf32>
    %217 = math.tanh %216 : vector<2x5xf32>
    %218 = arith.mulf %213, %217 : vector<2x5xf32>
    %219 = tpu.concatenate %218, %13 in 1 : vector<2x5xf32>, vector<2x123xf32> -> vector<2x128xf32>
    %c4_61 = arith.constant 4 : index
    %c0_62 = arith.constant 0 : index
    %c0_63 = arith.constant 0 : index
    %220 = vector.load %arg7[%c4_61, %c0_62, %c0_63] : memref<15x2x128xf32, #tpu.memory_space<vmem>>, vector<1x2x128xf32>
    %221 = vector.shape_cast %220 : vector<1x2x128xf32> to vector<2x128xf32>
    %222 = vector.shape_cast %219 : vector<2x128xf32> to vector<1x2x128xf32>
    tpu.vector_store %arg7[%c4_61, %c0_62, %c0_63], %222 {strides = array<i32>} : memref<15x2x128xf32, #tpu.memory_space<vmem>>, vector<1x2x128xf32>,
    %c10 = arith.constant 10 : index
    %c0_64 = arith.constant 0 : index
    %223 = vector.load %arg8[%c10, %c0_64] : memref<32x128xf32, #tpu.memory_space<vmem>>, vector<2x128xf32>
    %cst_65 = arith.constant dense<0.000000e+00> : vector<2x128xf32>
    %224 = tpu.matmul %199, %7, %cst_65 {dimension_numbers = #tpu.dot_dimension_numbers<[1], [0], [0], [1], [0, 0, 1, 1], [], []>} : vector<2x32xf32>, vector<32x128xf32>, vector<2x128xf32> -> vector<2x128xf32>
    %225 = arith.addf %223, %224 : vector<2x128xf32>
    %226 = arith.negf %225 : vector<2x128xf32>
    %227 = math.exp %226 : vector<2x128xf32>
    %cst_66 = arith.constant 1.000000e+00 : f32
    %228 = vector.broadcast %cst_66 : f32 to vector<2x128xf32>
    %229 = arith.addf %228, %227 : vector<2x128xf32>
    %230 = arith.divf %228, %229 : vector<2x128xf32>
    %231 = math.tanh %225 : vector<2x128xf32>
    %232 = vector.extract_strided_slice %230 {offsets = [0, 0], sizes = [2, 32], strides = [1, 1]} : vector<2x128xf32> to vector<2x32xf32>
    %233 = vector.extract_strided_slice %230 {offsets = [0, 32], sizes = [2, 32], strides = [1, 1]} : vector<2x128xf32> to vector<2x32xf32>
    %234 = vector.extract_strided_slice %231 {offsets = [0, 64], sizes = [2, 32], strides = [1, 1]} : vector<2x128xf32> to vector<2x32xf32>
    %235 = vector.extract_strided_slice %230 {offsets = [0, 96], sizes = [2, 32], strides = [1, 1]} : vector<2x128xf32> to vector<2x32xf32>
    %236 = arith.mulf %233, %197 : vector<2x32xf32>
    %237 = arith.mulf %232, %234 : vector<2x32xf32>
    %238 = arith.addf %236, %237 : vector<2x32xf32>
    %239 = math.tanh %238 : vector<2x32xf32>
    %240 = arith.mulf %235, %239 : vector<2x32xf32>
    %cst_67 = arith.constant dense<0.000000e+00> : vector<2x20xf32>
    %241 = tpu.matmul %240, %8, %cst_67 {dimension_numbers = #tpu.dot_dimension_numbers<[1], [0], [0], [1], [0, 0, 1, 1], [], []>} : vector<2x32xf32>, vector<32x20xf32>, vector<2x20xf32> -> vector<2x20xf32>
    %cst_68 = arith.constant dense<0.000000e+00> : vector<2x20xf32>
    %242 = tpu.matmul %218, %9, %cst_68 {dimension_numbers = #tpu.dot_dimension_numbers<[1], [0], [0], [1], [0, 0, 1, 1], [], []>} : vector<2x5xf32>, vector<5x20xf32>, vector<2x20xf32> -> vector<2x20xf32>
    %243 = arith.addf %241, %242 : vector<2x20xf32>
    %244 = arith.addf %243, %12 : vector<2x20xf32>
    %245 = arith.negf %244 : vector<2x20xf32>
    %246 = math.exp %245 : vector<2x20xf32>
    %cst_69 = arith.constant 1.000000e+00 : f32
    %247 = vector.broadcast %cst_69 : f32 to vector<2x20xf32>
    %248 = arith.addf %247, %246 : vector<2x20xf32>
    %249 = arith.divf %247, %248 : vector<2x20xf32>
    %250 = math.tanh %244 : vector<2x20xf32>
    %251 = vector.extract_strided_slice %249 {offsets = [0, 0], sizes = [2, 5], strides = [1, 1]} : vector<2x20xf32> to vector<2x5xf32>
    %252 = vector.extract_strided_slice %249 {offsets = [0, 5], sizes = [2, 5], strides = [1, 1]} : vector<2x20xf32> to vector<2x5xf32>
    %253 = vector.extract_strided_slice %250 {offsets = [0, 10], sizes = [2, 5], strides = [1, 1]} : vector<2x20xf32> to vector<2x5xf32>
    %254 = vector.extract_strided_slice %249 {offsets = [0, 15], sizes = [2, 5], strides = [1, 1]} : vector<2x20xf32> to vector<2x5xf32>
    %255 = arith.mulf %252, %216 : vector<2x5xf32>
    %256 = arith.mulf %251, %253 : vector<2x5xf32>
    %257 = arith.addf %255, %256 : vector<2x5xf32>
    %258 = math.tanh %257 : vector<2x5xf32>
    %259 = arith.mulf %254, %258 : vector<2x5xf32>
    %260 = tpu.concatenate %259, %13 in 1 : vector<2x5xf32>, vector<2x123xf32> -> vector<2x128xf32>
    %c5 = arith.constant 5 : index
    %c0_70 = arith.constant 0 : index
    %c0_71 = arith.constant 0 : index
    %261 = vector.load %arg7[%c5, %c0_70, %c0_71] : memref<15x2x128xf32, #tpu.memory_space<vmem>>, vector<1x2x128xf32>
    %262 = vector.shape_cast %261 : vector<1x2x128xf32> to vector<2x128xf32>
    %263 = vector.shape_cast %260 : vector<2x128xf32> to vector<1x2x128xf32>
    tpu.vector_store %arg7[%c5, %c0_70, %c0_71], %263 {strides = array<i32>} : memref<15x2x128xf32, #tpu.memory_space<vmem>>, vector<1x2x128xf32>,
    %c12 = arith.constant 12 : index
    %c0_72 = arith.constant 0 : index
    %264 = vector.load %arg8[%c12, %c0_72] : memref<32x128xf32, #tpu.memory_space<vmem>>, vector<2x128xf32>
    %cst_73 = arith.constant dense<0.000000e+00> : vector<2x128xf32>
    %265 = tpu.matmul %240, %7, %cst_73 {dimension_numbers = #tpu.dot_dimension_numbers<[1], [0], [0], [1], [0, 0, 1, 1], [], []>} : vector<2x32xf32>, vector<32x128xf32>, vector<2x128xf32> -> vector<2x128xf32>
    %266 = arith.addf %264, %265 : vector<2x128xf32>
    %267 = arith.negf %266 : vector<2x128xf32>
    %268 = math.exp %267 : vector<2x128xf32>
    %cst_74 = arith.constant 1.000000e+00 : f32
    %269 = vector.broadcast %cst_74 : f32 to vector<2x128xf32>
    %270 = arith.addf %269, %268 : vector<2x128xf32>
    %271 = arith.divf %269, %270 : vector<2x128xf32>
    %272 = math.tanh %266 : vector<2x128xf32>
    %273 = vector.extract_strided_slice %271 {offsets = [0, 0], sizes = [2, 32], strides = [1, 1]} : vector<2x128xf32> to vector<2x32xf32>
    %274 = vector.extract_strided_slice %271 {offsets = [0, 32], sizes = [2, 32], strides = [1, 1]} : vector<2x128xf32> to vector<2x32xf32>
    %275 = vector.extract_strided_slice %272 {offsets = [0, 64], sizes = [2, 32], strides = [1, 1]} : vector<2x128xf32> to vector<2x32xf32>
    %276 = vector.extract_strided_slice %271 {offsets = [0, 96], sizes = [2, 32], strides = [1, 1]} : vector<2x128xf32> to vector<2x32xf32>
    %277 = arith.mulf %274, %238 : vector<2x32xf32>
    %278 = arith.mulf %273, %275 : vector<2x32xf32>
    %279 = arith.addf %277, %278 : vector<2x32xf32>
    %280 = math.tanh %279 : vector<2x32xf32>
    %281 = arith.mulf %276, %280 : vector<2x32xf32>
    %cst_75 = arith.constant dense<0.000000e+00> : vector<2x20xf32>
    %282 = tpu.matmul %281, %8, %cst_75 {dimension_numbers = #tpu.dot_dimension_numbers<[1], [0], [0], [1], [0, 0, 1, 1], [], []>} : vector<2x32xf32>, vector<32x20xf32>, vector<2x20xf32> -> vector<2x20xf32>
    %cst_76 = arith.constant dense<0.000000e+00> : vector<2x20xf32>
    %283 = tpu.matmul %259, %9, %cst_76 {dimension_numbers = #tpu.dot_dimension_numbers<[1], [0], [0], [1], [0, 0, 1, 1], [], []>} : vector<2x5xf32>, vector<5x20xf32>, vector<2x20xf32> -> vector<2x20xf32>
    %284 = arith.addf %282, %283 : vector<2x20xf32>
    %285 = arith.addf %284, %12 : vector<2x20xf32>
    %286 = arith.negf %285 : vector<2x20xf32>
    %287 = math.exp %286 : vector<2x20xf32>
    %cst_77 = arith.constant 1.000000e+00 : f32
    %288 = vector.broadcast %cst_77 : f32 to vector<2x20xf32>
    %289 = arith.addf %288, %287 : vector<2x20xf32>
    %290 = arith.divf %288, %289 : vector<2x20xf32>
    %291 = math.tanh %285 : vector<2x20xf32>
    %292 = vector.extract_strided_slice %290 {offsets = [0, 0], sizes = [2, 5], strides = [1, 1]} : vector<2x20xf32> to vector<2x5xf32>
    %293 = vector.extract_strided_slice %290 {offsets = [0, 5], sizes = [2, 5], strides = [1, 1]} : vector<2x20xf32> to vector<2x5xf32>
    %294 = vector.extract_strided_slice %291 {offsets = [0, 10], sizes = [2, 5], strides = [1, 1]} : vector<2x20xf32> to vector<2x5xf32>
    %295 = vector.extract_strided_slice %290 {offsets = [0, 15], sizes = [2, 5], strides = [1, 1]} : vector<2x20xf32> to vector<2x5xf32>
    %296 = arith.mulf %293, %257 : vector<2x5xf32>
    %297 = arith.mulf %292, %294 : vector<2x5xf32>
    %298 = arith.addf %296, %297 : vector<2x5xf32>
    %299 = math.tanh %298 : vector<2x5xf32>
    %300 = arith.mulf %295, %299 : vector<2x5xf32>
    %301 = tpu.concatenate %300, %13 in 1 : vector<2x5xf32>, vector<2x123xf32> -> vector<2x128xf32>
    %c6_78 = arith.constant 6 : index
    %c0_79 = arith.constant 0 : index
    %c0_80 = arith.constant 0 : index
    %302 = vector.load %arg7[%c6_78, %c0_79, %c0_80] : memref<15x2x128xf32, #tpu.memory_space<vmem>>, vector<1x2x128xf32>
    %303 = vector.shape_cast %302 : vector<1x2x128xf32> to vector<2x128xf32>
    %304 = vector.shape_cast %301 : vector<2x128xf32> to vector<1x2x128xf32>
    tpu.vector_store %arg7[%c6_78, %c0_79, %c0_80], %304 {strides = array<i32>} : memref<15x2x128xf32, #tpu.memory_space<vmem>>, vector<1x2x128xf32>,
    %c14 = arith.constant 14 : index
    %c0_81 = arith.constant 0 : index
    %305 = vector.load %arg8[%c14, %c0_81] : memref<32x128xf32, #tpu.memory_space<vmem>>, vector<2x128xf32>
    %cst_82 = arith.constant dense<0.000000e+00> : vector<2x128xf32>
    %306 = tpu.matmul %281, %7, %cst_82 {dimension_numbers = #tpu.dot_dimension_numbers<[1], [0], [0], [1], [0, 0, 1, 1], [], []>} : vector<2x32xf32>, vector<32x128xf32>, vector<2x128xf32> -> vector<2x128xf32>
    %307 = arith.addf %305, %306 : vector<2x128xf32>
    %308 = arith.negf %307 : vector<2x128xf32>
    %309 = math.exp %308 : vector<2x128xf32>
    %cst_83 = arith.constant 1.000000e+00 : f32
    %310 = vector.broadcast %cst_83 : f32 to vector<2x128xf32>
    %311 = arith.addf %310, %309 : vector<2x128xf32>
    %312 = arith.divf %310, %311 : vector<2x128xf32>
    %313 = math.tanh %307 : vector<2x128xf32>
    %314 = vector.extract_strided_slice %312 {offsets = [0, 0], sizes = [2, 32], strides = [1, 1]} : vector<2x128xf32> to vector<2x32xf32>
    %315 = vector.extract_strided_slice %312 {offsets = [0, 32], sizes = [2, 32], strides = [1, 1]} : vector<2x128xf32> to vector<2x32xf32>
    %316 = vector.extract_strided_slice %313 {offsets = [0, 64], sizes = [2, 32], strides = [1, 1]} : vector<2x128xf32> to vector<2x32xf32>
    %317 = vector.extract_strided_slice %312 {offsets = [0, 96], sizes = [2, 32], strides = [1, 1]} : vector<2x128xf32> to vector<2x32xf32>
    %318 = arith.mulf %315, %279 : vector<2x32xf32>
    %319 = arith.mulf %314, %316 : vector<2x32xf32>
    %320 = arith.addf %318, %319 : vector<2x32xf32>
    %321 = math.tanh %320 : vector<2x32xf32>
    %322 = arith.mulf %317, %321 : vector<2x32xf32>
    %cst_84 = arith.constant dense<0.000000e+00> : vector<2x20xf32>
    %323 = tpu.matmul %322, %8, %cst_84 {dimension_numbers = #tpu.dot_dimension_numbers<[1], [0], [0], [1], [0, 0, 1, 1], [], []>} : vector<2x32xf32>, vector<32x20xf32>, vector<2x20xf32> -> vector<2x20xf32>
    %cst_85 = arith.constant dense<0.000000e+00> : vector<2x20xf32>
    %324 = tpu.matmul %300, %9, %cst_85 {dimension_numbers = #tpu.dot_dimension_numbers<[1], [0], [0], [1], [0, 0, 1, 1], [], []>} : vector<2x5xf32>, vector<5x20xf32>, vector<2x20xf32> -> vector<2x20xf32>
    %325 = arith.addf %323, %324 : vector<2x20xf32>
    %326 = arith.addf %325, %12 : vector<2x20xf32>
    %327 = arith.negf %326 : vector<2x20xf32>
    %328 = math.exp %327 : vector<2x20xf32>
    %cst_86 = arith.constant 1.000000e+00 : f32
    %329 = vector.broadcast %cst_86 : f32 to vector<2x20xf32>
    %330 = arith.addf %329, %328 : vector<2x20xf32>
    %331 = arith.divf %329, %330 : vector<2x20xf32>
    %332 = math.tanh %326 : vector<2x20xf32>
    %333 = vector.extract_strided_slice %331 {offsets = [0, 0], sizes = [2, 5], strides = [1, 1]} : vector<2x20xf32> to vector<2x5xf32>
    %334 = vector.extract_strided_slice %331 {offsets = [0, 5], sizes = [2, 5], strides = [1, 1]} : vector<2x20xf32> to vector<2x5xf32>
    %335 = vector.extract_strided_slice %332 {offsets = [0, 10], sizes = [2, 5], strides = [1, 1]} : vector<2x20xf32> to vector<2x5xf32>
    %336 = vector.extract_strided_slice %331 {offsets = [0, 15], sizes = [2, 5], strides = [1, 1]} : vector<2x20xf32> to vector<2x5xf32>
    %337 = arith.mulf %334, %298 : vector<2x5xf32>
    %338 = arith.mulf %333, %335 : vector<2x5xf32>
    %339 = arith.addf %337, %338 : vector<2x5xf32>
    %340 = math.tanh %339 : vector<2x5xf32>
    %341 = arith.mulf %336, %340 : vector<2x5xf32>
    %342 = tpu.concatenate %341, %13 in 1 : vector<2x5xf32>, vector<2x123xf32> -> vector<2x128xf32>
    %c7 = arith.constant 7 : index
    %c0_87 = arith.constant 0 : index
    %c0_88 = arith.constant 0 : index
    %343 = vector.load %arg7[%c7, %c0_87, %c0_88] : memref<15x2x128xf32, #tpu.memory_space<vmem>>, vector<1x2x128xf32>
    %344 = vector.shape_cast %343 : vector<1x2x128xf32> to vector<2x128xf32>
    %345 = vector.shape_cast %342 : vector<2x128xf32> to vector<1x2x128xf32>
    tpu.vector_store %arg7[%c7, %c0_87, %c0_88], %345 {strides = array<i32>} : memref<15x2x128xf32, #tpu.memory_space<vmem>>, vector<1x2x128xf32>,
    %c16 = arith.constant 16 : index
    %c0_89 = arith.constant 0 : index
    %346 = vector.load %arg8[%c16, %c0_89] : memref<32x128xf32, #tpu.memory_space<vmem>>, vector<2x128xf32>
    %cst_90 = arith.constant dense<0.000000e+00> : vector<2x128xf32>
    %347 = tpu.matmul %322, %7, %cst_90 {dimension_numbers = #tpu.dot_dimension_numbers<[1], [0], [0], [1], [0, 0, 1, 1], [], []>} : vector<2x32xf32>, vector<32x128xf32>, vector<2x128xf32> -> vector<2x128xf32>
    %348 = arith.addf %346, %347 : vector<2x128xf32>
    %349 = arith.negf %348 : vector<2x128xf32>
    %350 = math.exp %349 : vector<2x128xf32>
    %cst_91 = arith.constant 1.000000e+00 : f32
    %351 = vector.broadcast %cst_91 : f32 to vector<2x128xf32>
    %352 = arith.addf %351, %350 : vector<2x128xf32>
    %353 = arith.divf %351, %352 : vector<2x128xf32>
    %354 = math.tanh %348 : vector<2x128xf32>
    %355 = vector.extract_strided_slice %353 {offsets = [0, 0], sizes = [2, 32], strides = [1, 1]} : vector<2x128xf32> to vector<2x32xf32>
    %356 = vector.extract_strided_slice %353 {offsets = [0, 32], sizes = [2, 32], strides = [1, 1]} : vector<2x128xf32> to vector<2x32xf32>
    %357 = vector.extract_strided_slice %354 {offsets = [0, 64], sizes = [2, 32], strides = [1, 1]} : vector<2x128xf32> to vector<2x32xf32>
    %358 = vector.extract_strided_slice %353 {offsets = [0, 96], sizes = [2, 32], strides = [1, 1]} : vector<2x128xf32> to vector<2x32xf32>
    %359 = arith.mulf %356, %320 : vector<2x32xf32>
    %360 = arith.mulf %355, %357 : vector<2x32xf32>
    %361 = arith.addf %359, %360 : vector<2x32xf32>
    %362 = math.tanh %361 : vector<2x32xf32>
    %363 = arith.mulf %358, %362 : vector<2x32xf32>
    %cst_92 = arith.constant dense<0.000000e+00> : vector<2x20xf32>
    %364 = tpu.matmul %363, %8, %cst_92 {dimension_numbers = #tpu.dot_dimension_numbers<[1], [0], [0], [1], [0, 0, 1, 1], [], []>} : vector<2x32xf32>, vector<32x20xf32>, vector<2x20xf32> -> vector<2x20xf32>
    %cst_93 = arith.constant dense<0.000000e+00> : vector<2x20xf32>
    %365 = tpu.matmul %341, %9, %cst_93 {dimension_numbers = #tpu.dot_dimension_numbers<[1], [0], [0], [1], [0, 0, 1, 1], [], []>} : vector<2x5xf32>, vector<5x20xf32>, vector<2x20xf32> -> vector<2x20xf32>
    %366 = arith.addf %364, %365 : vector<2x20xf32>
    %367 = arith.addf %366, %12 : vector<2x20xf32>
    %368 = arith.negf %367 : vector<2x20xf32>
    %369 = math.exp %368 : vector<2x20xf32>
    %cst_94 = arith.constant 1.000000e+00 : f32
    %370 = vector.broadcast %cst_94 : f32 to vector<2x20xf32>
    %371 = arith.addf %370, %369 : vector<2x20xf32>
    %372 = arith.divf %370, %371 : vector<2x20xf32>
    %373 = math.tanh %367 : vector<2x20xf32>
    %374 = vector.extract_strided_slice %372 {offsets = [0, 0], sizes = [2, 5], strides = [1, 1]} : vector<2x20xf32> to vector<2x5xf32>
    %375 = vector.extract_strided_slice %372 {offsets = [0, 5], sizes = [2, 5], strides = [1, 1]} : vector<2x20xf32> to vector<2x5xf32>
    %376 = vector.extract_strided_slice %373 {offsets = [0, 10], sizes = [2, 5], strides = [1, 1]} : vector<2x20xf32> to vector<2x5xf32>
    %377 = vector.extract_strided_slice %372 {offsets = [0, 15], sizes = [2, 5], strides = [1, 1]} : vector<2x20xf32> to vector<2x5xf32>
    %378 = arith.mulf %375, %339 : vector<2x5xf32>
    %379 = arith.mulf %374, %376 : vector<2x5xf32>
    %380 = arith.addf %378, %379 : vector<2x5xf32>
    %381 = math.tanh %380 : vector<2x5xf32>
    %382 = arith.mulf %377, %381 : vector<2x5xf32>
    %383 = tpu.concatenate %382, %13 in 1 : vector<2x5xf32>, vector<2x123xf32> -> vector<2x128xf32>
    %c8_95 = arith.constant 8 : index
    %c0_96 = arith.constant 0 : index
    %c0_97 = arith.constant 0 : index
    %384 = vector.load %arg7[%c8_95, %c0_96, %c0_97] : memref<15x2x128xf32, #tpu.memory_space<vmem>>, vector<1x2x128xf32>
    %385 = vector.shape_cast %384 : vector<1x2x128xf32> to vector<2x128xf32>
    %386 = vector.shape_cast %383 : vector<2x128xf32> to vector<1x2x128xf32>
    tpu.vector_store %arg7[%c8_95, %c0_96, %c0_97], %386 {strides = array<i32>} : memref<15x2x128xf32, #tpu.memory_space<vmem>>, vector<1x2x128xf32>,
    %c18 = arith.constant 18 : index
    %c0_98 = arith.constant 0 : index
    %387 = vector.load %arg8[%c18, %c0_98] : memref<32x128xf32, #tpu.memory_space<vmem>>, vector<2x128xf32>
    %cst_99 = arith.constant dense<0.000000e+00> : vector<2x128xf32>
    %388 = tpu.matmul %363, %7, %cst_99 {dimension_numbers = #tpu.dot_dimension_numbers<[1], [0], [0], [1], [0, 0, 1, 1], [], []>} : vector<2x32xf32>, vector<32x128xf32>, vector<2x128xf32> -> vector<2x128xf32>
    %389 = arith.addf %387, %388 : vector<2x128xf32>
    %390 = arith.negf %389 : vector<2x128xf32>
    %391 = math.exp %390 : vector<2x128xf32>
    %cst_100 = arith.constant 1.000000e+00 : f32
    %392 = vector.broadcast %cst_100 : f32 to vector<2x128xf32>
    %393 = arith.addf %392, %391 : vector<2x128xf32>
    %394 = arith.divf %392, %393 : vector<2x128xf32>
    %395 = math.tanh %389 : vector<2x128xf32>
    %396 = vector.extract_strided_slice %394 {offsets = [0, 0], sizes = [2, 32], strides = [1, 1]} : vector<2x128xf32> to vector<2x32xf32>
    %397 = vector.extract_strided_slice %394 {offsets = [0, 32], sizes = [2, 32], strides = [1, 1]} : vector<2x128xf32> to vector<2x32xf32>
    %398 = vector.extract_strided_slice %395 {offsets = [0, 64], sizes = [2, 32], strides = [1, 1]} : vector<2x128xf32> to vector<2x32xf32>
    %399 = vector.extract_strided_slice %394 {offsets = [0, 96], sizes = [2, 32], strides = [1, 1]} : vector<2x128xf32> to vector<2x32xf32>
    %400 = arith.mulf %397, %361 : vector<2x32xf32>
    %401 = arith.mulf %396, %398 : vector<2x32xf32>
    %402 = arith.addf %400, %401 : vector<2x32xf32>
    %403 = math.tanh %402 : vector<2x32xf32>
    %404 = arith.mulf %399, %403 : vector<2x32xf32>
    %cst_101 = arith.constant dense<0.000000e+00> : vector<2x20xf32>
    %405 = tpu.matmul %404, %8, %cst_101 {dimension_numbers = #tpu.dot_dimension_numbers<[1], [0], [0], [1], [0, 0, 1, 1], [], []>} : vector<2x32xf32>, vector<32x20xf32>, vector<2x20xf32> -> vector<2x20xf32>
    %cst_102 = arith.constant dense<0.000000e+00> : vector<2x20xf32>
    %406 = tpu.matmul %382, %9, %cst_102 {dimension_numbers = #tpu.dot_dimension_numbers<[1], [0], [0], [1], [0, 0, 1, 1], [], []>} : vector<2x5xf32>, vector<5x20xf32>, vector<2x20xf32> -> vector<2x20xf32>
    %407 = arith.addf %405, %406 : vector<2x20xf32>
    %408 = arith.addf %407, %12 : vector<2x20xf32>
    %409 = arith.negf %408 : vector<2x20xf32>
    %410 = math.exp %409 : vector<2x20xf32>
    %cst_103 = arith.constant 1.000000e+00 : f32
    %411 = vector.broadcast %cst_103 : f32 to vector<2x20xf32>
    %412 = arith.addf %411, %410 : vector<2x20xf32>
    %413 = arith.divf %411, %412 : vector<2x20xf32>
    %414 = math.tanh %408 : vector<2x20xf32>
    %415 = vector.extract_strided_slice %413 {offsets = [0, 0], sizes = [2, 5], strides = [1, 1]} : vector<2x20xf32> to vector<2x5xf32>
    %416 = vector.extract_strided_slice %413 {offsets = [0, 5], sizes = [2, 5], strides = [1, 1]} : vector<2x20xf32> to vector<2x5xf32>
    %417 = vector.extract_strided_slice %414 {offsets = [0, 10], sizes = [2, 5], strides = [1, 1]} : vector<2x20xf32> to vector<2x5xf32>
    %418 = vector.extract_strided_slice %413 {offsets = [0, 15], sizes = [2, 5], strides = [1, 1]} : vector<2x20xf32> to vector<2x5xf32>
    %419 = arith.mulf %416, %380 : vector<2x5xf32>
    %420 = arith.mulf %415, %417 : vector<2x5xf32>
    %421 = arith.addf %419, %420 : vector<2x5xf32>
    %422 = math.tanh %421 : vector<2x5xf32>
    %423 = arith.mulf %418, %422 : vector<2x5xf32>
    %424 = tpu.concatenate %423, %13 in 1 : vector<2x5xf32>, vector<2x123xf32> -> vector<2x128xf32>
    %c9 = arith.constant 9 : index
    %c0_104 = arith.constant 0 : index
    %c0_105 = arith.constant 0 : index
    %425 = vector.load %arg7[%c9, %c0_104, %c0_105] : memref<15x2x128xf32, #tpu.memory_space<vmem>>, vector<1x2x128xf32>
    %426 = vector.shape_cast %425 : vector<1x2x128xf32> to vector<2x128xf32>
    %427 = vector.shape_cast %424 : vector<2x128xf32> to vector<1x2x128xf32>
    tpu.vector_store %arg7[%c9, %c0_104, %c0_105], %427 {strides = array<i32>} : memref<15x2x128xf32, #tpu.memory_space<vmem>>, vector<1x2x128xf32>,
    %c20 = arith.constant 20 : index
    %c0_106 = arith.constant 0 : index
    %428 = vector.load %arg8[%c20, %c0_106] : memref<32x128xf32, #tpu.memory_space<vmem>>, vector<2x128xf32>
    %cst_107 = arith.constant dense<0.000000e+00> : vector<2x128xf32>
    %429 = tpu.matmul %404, %7, %cst_107 {dimension_numbers = #tpu.dot_dimension_numbers<[1], [0], [0], [1], [0, 0, 1, 1], [], []>} : vector<2x32xf32>, vector<32x128xf32>, vector<2x128xf32> -> vector<2x128xf32>
    %430 = arith.addf %428, %429 : vector<2x128xf32>
    %431 = arith.negf %430 : vector<2x128xf32>
    %432 = math.exp %431 : vector<2x128xf32>
    %cst_108 = arith.constant 1.000000e+00 : f32
    %433 = vector.broadcast %cst_108 : f32 to vector<2x128xf32>
    %434 = arith.addf %433, %432 : vector<2x128xf32>
    %435 = arith.divf %433, %434 : vector<2x128xf32>
    %436 = math.tanh %430 : vector<2x128xf32>
    %437 = vector.extract_strided_slice %435 {offsets = [0, 0], sizes = [2, 32], strides = [1, 1]} : vector<2x128xf32> to vector<2x32xf32>
    %438 = vector.extract_strided_slice %435 {offsets = [0, 32], sizes = [2, 32], strides = [1, 1]} : vector<2x128xf32> to vector<2x32xf32>
    %439 = vector.extract_strided_slice %436 {offsets = [0, 64], sizes = [2, 32], strides = [1, 1]} : vector<2x128xf32> to vector<2x32xf32>
    %440 = vector.extract_strided_slice %435 {offsets = [0, 96], sizes = [2, 32], strides = [1, 1]} : vector<2x128xf32> to vector<2x32xf32>
    %441 = arith.mulf %438, %402 : vector<2x32xf32>
    %442 = arith.mulf %437, %439 : vector<2x32xf32>
    %443 = arith.addf %441, %442 : vector<2x32xf32>
    %444 = math.tanh %443 : vector<2x32xf32>
    %445 = arith.mulf %440, %444 : vector<2x32xf32>
    %cst_109 = arith.constant dense<0.000000e+00> : vector<2x20xf32>
    %446 = tpu.matmul %445, %8, %cst_109 {dimension_numbers = #tpu.dot_dimension_numbers<[1], [0], [0], [1], [0, 0, 1, 1], [], []>} : vector<2x32xf32>, vector<32x20xf32>, vector<2x20xf32> -> vector<2x20xf32>
    %cst_110 = arith.constant dense<0.000000e+00> : vector<2x20xf32>
    %447 = tpu.matmul %423, %9, %cst_110 {dimension_numbers = #tpu.dot_dimension_numbers<[1], [0], [0], [1], [0, 0, 1, 1], [], []>} : vector<2x5xf32>, vector<5x20xf32>, vector<2x20xf32> -> vector<2x20xf32>
    %448 = arith.addf %446, %447 : vector<2x20xf32>
    %449 = arith.addf %448, %12 : vector<2x20xf32>
    %450 = arith.negf %449 : vector<2x20xf32>
    %451 = math.exp %450 : vector<2x20xf32>
    %cst_111 = arith.constant 1.000000e+00 : f32
    %452 = vector.broadcast %cst_111 : f32 to vector<2x20xf32>
    %453 = arith.addf %452, %451 : vector<2x20xf32>
    %454 = arith.divf %452, %453 : vector<2x20xf32>
    %455 = math.tanh %449 : vector<2x20xf32>
    %456 = vector.extract_strided_slice %454 {offsets = [0, 0], sizes = [2, 5], strides = [1, 1]} : vector<2x20xf32> to vector<2x5xf32>
    %457 = vector.extract_strided_slice %454 {offsets = [0, 5], sizes = [2, 5], strides = [1, 1]} : vector<2x20xf32> to vector<2x5xf32>
    %458 = vector.extract_strided_slice %455 {offsets = [0, 10], sizes = [2, 5], strides = [1, 1]} : vector<2x20xf32> to vector<2x5xf32>
    %459 = vector.extract_strided_slice %454 {offsets = [0, 15], sizes = [2, 5], strides = [1, 1]} : vector<2x20xf32> to vector<2x5xf32>
    %460 = arith.mulf %457, %421 : vector<2x5xf32>
    %461 = arith.mulf %456, %458 : vector<2x5xf32>
    %462 = arith.addf %460, %461 : vector<2x5xf32>
    %463 = math.tanh %462 : vector<2x5xf32>
    %464 = arith.mulf %459, %463 : vector<2x5xf32>
    %465 = tpu.concatenate %464, %13 in 1 : vector<2x5xf32>, vector<2x123xf32> -> vector<2x128xf32>
    %c10_112 = arith.constant 10 : index
    %c0_113 = arith.constant 0 : index
    %c0_114 = arith.constant 0 : index
    %466 = vector.load %arg7[%c10_112, %c0_113, %c0_114] : memref<15x2x128xf32, #tpu.memory_space<vmem>>, vector<1x2x128xf32>
    %467 = vector.shape_cast %466 : vector<1x2x128xf32> to vector<2x128xf32>
    %468 = vector.shape_cast %465 : vector<2x128xf32> to vector<1x2x128xf32>
    tpu.vector_store %arg7[%c10_112, %c0_113, %c0_114], %468 {strides = array<i32>} : memref<15x2x128xf32, #tpu.memory_space<vmem>>, vector<1x2x128xf32>,
    %c22 = arith.constant 22 : index
    %c0_115 = arith.constant 0 : index
    %469 = vector.load %arg8[%c22, %c0_115] : memref<32x128xf32, #tpu.memory_space<vmem>>, vector<2x128xf32>
    %cst_116 = arith.constant dense<0.000000e+00> : vector<2x128xf32>
    %470 = tpu.matmul %445, %7, %cst_116 {dimension_numbers = #tpu.dot_dimension_numbers<[1], [0], [0], [1], [0, 0, 1, 1], [], []>} : vector<2x32xf32>, vector<32x128xf32>, vector<2x128xf32> -> vector<2x128xf32>
    %471 = arith.addf %469, %470 : vector<2x128xf32>
    %472 = arith.negf %471 : vector<2x128xf32>
    %473 = math.exp %472 : vector<2x128xf32>
    %cst_117 = arith.constant 1.000000e+00 : f32
    %474 = vector.broadcast %cst_117 : f32 to vector<2x128xf32>
    %475 = arith.addf %474, %473 : vector<2x128xf32>
    %476 = arith.divf %474, %475 : vector<2x128xf32>
    %477 = math.tanh %471 : vector<2x128xf32>
    %478 = vector.extract_strided_slice %476 {offsets = [0, 0], sizes = [2, 32], strides = [1, 1]} : vector<2x128xf32> to vector<2x32xf32>
    %479 = vector.extract_strided_slice %476 {offsets = [0, 32], sizes = [2, 32], strides = [1, 1]} : vector<2x128xf32> to vector<2x32xf32>
    %480 = vector.extract_strided_slice %477 {offsets = [0, 64], sizes = [2, 32], strides = [1, 1]} : vector<2x128xf32> to vector<2x32xf32>
    %481 = vector.extract_strided_slice %476 {offsets = [0, 96], sizes = [2, 32], strides = [1, 1]} : vector<2x128xf32> to vector<2x32xf32>
    %482 = arith.mulf %479, %443 : vector<2x32xf32>
    %483 = arith.mulf %478, %480 : vector<2x32xf32>
    %484 = arith.addf %482, %483 : vector<2x32xf32>
    %485 = math.tanh %484 : vector<2x32xf32>
    %486 = arith.mulf %481, %485 : vector<2x32xf32>
    %cst_118 = arith.constant dense<0.000000e+00> : vector<2x20xf32>
    %487 = tpu.matmul %486, %8, %cst_118 {dimension_numbers = #tpu.dot_dimension_numbers<[1], [0], [0], [1], [0, 0, 1, 1], [], []>} : vector<2x32xf32>, vector<32x20xf32>, vector<2x20xf32> -> vector<2x20xf32>
    %cst_119 = arith.constant dense<0.000000e+00> : vector<2x20xf32>
    %488 = tpu.matmul %464, %9, %cst_119 {dimension_numbers = #tpu.dot_dimension_numbers<[1], [0], [0], [1], [0, 0, 1, 1], [], []>} : vector<2x5xf32>, vector<5x20xf32>, vector<2x20xf32> -> vector<2x20xf32>
    %489 = arith.addf %487, %488 : vector<2x20xf32>
    %490 = arith.addf %489, %12 : vector<2x20xf32>
    %491 = arith.negf %490 : vector<2x20xf32>
    %492 = math.exp %491 : vector<2x20xf32>
    %cst_120 = arith.constant 1.000000e+00 : f32
    %493 = vector.broadcast %cst_120 : f32 to vector<2x20xf32>
    %494 = arith.addf %493, %492 : vector<2x20xf32>
    %495 = arith.divf %493, %494 : vector<2x20xf32>
    %496 = math.tanh %490 : vector<2x20xf32>
    %497 = vector.extract_strided_slice %495 {offsets = [0, 0], sizes = [2, 5], strides = [1, 1]} : vector<2x20xf32> to vector<2x5xf32>
    %498 = vector.extract_strided_slice %495 {offsets = [0, 5], sizes = [2, 5], strides = [1, 1]} : vector<2x20xf32> to vector<2x5xf32>
    %499 = vector.extract_strided_slice %496 {offsets = [0, 10], sizes = [2, 5], strides = [1, 1]} : vector<2x20xf32> to vector<2x5xf32>
    %500 = vector.extract_strided_slice %495 {offsets = [0, 15], sizes = [2, 5], strides = [1, 1]} : vector<2x20xf32> to vector<2x5xf32>
    %501 = arith.mulf %498, %462 : vector<2x5xf32>
    %502 = arith.mulf %497, %499 : vector<2x5xf32>
    %503 = arith.addf %501, %502 : vector<2x5xf32>
    %504 = math.tanh %503 : vector<2x5xf32>
    %505 = arith.mulf %500, %504 : vector<2x5xf32>
    %506 = tpu.concatenate %505, %13 in 1 : vector<2x5xf32>, vector<2x123xf32> -> vector<2x128xf32>
    %c11 = arith.constant 11 : index
    %c0_121 = arith.constant 0 : index
    %c0_122 = arith.constant 0 : index
    %507 = vector.load %arg7[%c11, %c0_121, %c0_122] : memref<15x2x128xf32, #tpu.memory_space<vmem>>, vector<1x2x128xf32>
    %508 = vector.shape_cast %507 : vector<1x2x128xf32> to vector<2x128xf32>
    %509 = vector.shape_cast %506 : vector<2x128xf32> to vector<1x2x128xf32>
    tpu.vector_store %arg7[%c11, %c0_121, %c0_122], %509 {strides = array<i32>} : memref<15x2x128xf32, #tpu.memory_space<vmem>>, vector<1x2x128xf32>,
    %c24 = arith.constant 24 : index
    %c0_123 = arith.constant 0 : index
    %510 = vector.load %arg8[%c24, %c0_123] : memref<32x128xf32, #tpu.memory_space<vmem>>, vector<2x128xf32>
    %cst_124 = arith.constant dense<0.000000e+00> : vector<2x128xf32>
    %511 = tpu.matmul %486, %7, %cst_124 {dimension_numbers = #tpu.dot_dimension_numbers<[1], [0], [0], [1], [0, 0, 1, 1], [], []>} : vector<2x32xf32>, vector<32x128xf32>, vector<2x128xf32> -> vector<2x128xf32>
    %512 = arith.addf %510, %511 : vector<2x128xf32>
    %513 = arith.negf %512 : vector<2x128xf32>
    %514 = math.exp %513 : vector<2x128xf32>
    %cst_125 = arith.constant 1.000000e+00 : f32
    %515 = vector.broadcast %cst_125 : f32 to vector<2x128xf32>
    %516 = arith.addf %515, %514 : vector<2x128xf32>
    %517 = arith.divf %515, %516 : vector<2x128xf32>
    %518 = math.tanh %512 : vector<2x128xf32>
    %519 = vector.extract_strided_slice %517 {offsets = [0, 0], sizes = [2, 32], strides = [1, 1]} : vector<2x128xf32> to vector<2x32xf32>
    %520 = vector.extract_strided_slice %517 {offsets = [0, 32], sizes = [2, 32], strides = [1, 1]} : vector<2x128xf32> to vector<2x32xf32>
    %521 = vector.extract_strided_slice %518 {offsets = [0, 64], sizes = [2, 32], strides = [1, 1]} : vector<2x128xf32> to vector<2x32xf32>
    %522 = vector.extract_strided_slice %517 {offsets = [0, 96], sizes = [2, 32], strides = [1, 1]} : vector<2x128xf32> to vector<2x32xf32>
    %523 = arith.mulf %520, %484 : vector<2x32xf32>
    %524 = arith.mulf %519, %521 : vector<2x32xf32>
    %525 = arith.addf %523, %524 : vector<2x32xf32>
    %526 = math.tanh %525 : vector<2x32xf32>
    %527 = arith.mulf %522, %526 : vector<2x32xf32>
    %cst_126 = arith.constant dense<0.000000e+00> : vector<2x20xf32>
    %528 = tpu.matmul %527, %8, %cst_126 {dimension_numbers = #tpu.dot_dimension_numbers<[1], [0], [0], [1], [0, 0, 1, 1], [], []>} : vector<2x32xf32>, vector<32x20xf32>, vector<2x20xf32> -> vector<2x20xf32>
    %cst_127 = arith.constant dense<0.000000e+00> : vector<2x20xf32>
    %529 = tpu.matmul %505, %9, %cst_127 {dimension_numbers = #tpu.dot_dimension_numbers<[1], [0], [0], [1], [0, 0, 1, 1], [], []>} : vector<2x5xf32>, vector<5x20xf32>, vector<2x20xf32> -> vector<2x20xf32>
    %530 = arith.addf %528, %529 : vector<2x20xf32>
    %531 = arith.addf %530, %12 : vector<2x20xf32>
    %532 = arith.negf %531 : vector<2x20xf32>
    %533 = math.exp %532 : vector<2x20xf32>
    %cst_128 = arith.constant 1.000000e+00 : f32
    %534 = vector.broadcast %cst_128 : f32 to vector<2x20xf32>
    %535 = arith.addf %534, %533 : vector<2x20xf32>
    %536 = arith.divf %534, %535 : vector<2x20xf32>
    %537 = math.tanh %531 : vector<2x20xf32>
    %538 = vector.extract_strided_slice %536 {offsets = [0, 0], sizes = [2, 5], strides = [1, 1]} : vector<2x20xf32> to vector<2x5xf32>
    %539 = vector.extract_strided_slice %536 {offsets = [0, 5], sizes = [2, 5], strides = [1, 1]} : vector<2x20xf32> to vector<2x5xf32>
    %540 = vector.extract_strided_slice %537 {offsets = [0, 10], sizes = [2, 5], strides = [1, 1]} : vector<2x20xf32> to vector<2x5xf32>
    %541 = vector.extract_strided_slice %536 {offsets = [0, 15], sizes = [2, 5], strides = [1, 1]} : vector<2x20xf32> to vector<2x5xf32>
    %542 = arith.mulf %539, %503 : vector<2x5xf32>
    %543 = arith.mulf %538, %540 : vector<2x5xf32>
    %544 = arith.addf %542, %543 : vector<2x5xf32>
    %545 = math.tanh %544 : vector<2x5xf32>
    %546 = arith.mulf %541, %545 : vector<2x5xf32>
    %547 = tpu.concatenate %546, %13 in 1 : vector<2x5xf32>, vector<2x123xf32> -> vector<2x128xf32>
    %c12_129 = arith.constant 12 : index
    %c0_130 = arith.constant 0 : index
    %c0_131 = arith.constant 0 : index
    %548 = vector.load %arg7[%c12_129, %c0_130, %c0_131] : memref<15x2x128xf32, #tpu.memory_space<vmem>>, vector<1x2x128xf32>
    %549 = vector.shape_cast %548 : vector<1x2x128xf32> to vector<2x128xf32>
    %550 = vector.shape_cast %547 : vector<2x128xf32> to vector<1x2x128xf32>
    tpu.vector_store %arg7[%c12_129, %c0_130, %c0_131], %550 {strides = array<i32>} : memref<15x2x128xf32, #tpu.memory_space<vmem>>, vector<1x2x128xf32>,
    %c26 = arith.constant 26 : index
    %c0_132 = arith.constant 0 : index
    %551 = vector.load %arg8[%c26, %c0_132] : memref<32x128xf32, #tpu.memory_space<vmem>>, vector<2x128xf32>
    %cst_133 = arith.constant dense<0.000000e+00> : vector<2x128xf32>
    %552 = tpu.matmul %527, %7, %cst_133 {dimension_numbers = #tpu.dot_dimension_numbers<[1], [0], [0], [1], [0, 0, 1, 1], [], []>} : vector<2x32xf32>, vector<32x128xf32>, vector<2x128xf32> -> vector<2x128xf32>
    %553 = arith.addf %551, %552 : vector<2x128xf32>
    %554 = arith.negf %553 : vector<2x128xf32>
    %555 = math.exp %554 : vector<2x128xf32>
    %cst_134 = arith.constant 1.000000e+00 : f32
    %556 = vector.broadcast %cst_134 : f32 to vector<2x128xf32>
    %557 = arith.addf %556, %555 : vector<2x128xf32>
    %558 = arith.divf %556, %557 : vector<2x128xf32>
    %559 = math.tanh %553 : vector<2x128xf32>
    %560 = vector.extract_strided_slice %558 {offsets = [0, 0], sizes = [2, 32], strides = [1, 1]} : vector<2x128xf32> to vector<2x32xf32>
    %561 = vector.extract_strided_slice %558 {offsets = [0, 32], sizes = [2, 32], strides = [1, 1]} : vector<2x128xf32> to vector<2x32xf32>
    %562 = vector.extract_strided_slice %559 {offsets = [0, 64], sizes = [2, 32], strides = [1, 1]} : vector<2x128xf32> to vector<2x32xf32>
    %563 = vector.extract_strided_slice %558 {offsets = [0, 96], sizes = [2, 32], strides = [1, 1]} : vector<2x128xf32> to vector<2x32xf32>
    %564 = arith.mulf %561, %525 : vector<2x32xf32>
    %565 = arith.mulf %560, %562 : vector<2x32xf32>
    %566 = arith.addf %564, %565 : vector<2x32xf32>
    %567 = math.tanh %566 : vector<2x32xf32>
    %568 = arith.mulf %563, %567 : vector<2x32xf32>
    %cst_135 = arith.constant dense<0.000000e+00> : vector<2x20xf32>
    %569 = tpu.matmul %568, %8, %cst_135 {dimension_numbers = #tpu.dot_dimension_numbers<[1], [0], [0], [1], [0, 0, 1, 1], [], []>} : vector<2x32xf32>, vector<32x20xf32>, vector<2x20xf32> -> vector<2x20xf32>
    %cst_136 = arith.constant dense<0.000000e+00> : vector<2x20xf32>
    %570 = tpu.matmul %546, %9, %cst_136 {dimension_numbers = #tpu.dot_dimension_numbers<[1], [0], [0], [1], [0, 0, 1, 1], [], []>} : vector<2x5xf32>, vector<5x20xf32>, vector<2x20xf32> -> vector<2x20xf32>
    %571 = arith.addf %569, %570 : vector<2x20xf32>
    %572 = arith.addf %571, %12 : vector<2x20xf32>
    %573 = arith.negf %572 : vector<2x20xf32>
    %574 = math.exp %573 : vector<2x20xf32>
    %cst_137 = arith.constant 1.000000e+00 : f32
    %575 = vector.broadcast %cst_137 : f32 to vector<2x20xf32>
    %576 = arith.addf %575, %574 : vector<2x20xf32>
    %577 = arith.divf %575, %576 : vector<2x20xf32>
    %578 = math.tanh %572 : vector<2x20xf32>
    %579 = vector.extract_strided_slice %577 {offsets = [0, 0], sizes = [2, 5], strides = [1, 1]} : vector<2x20xf32> to vector<2x5xf32>
    %580 = vector.extract_strided_slice %577 {offsets = [0, 5], sizes = [2, 5], strides = [1, 1]} : vector<2x20xf32> to vector<2x5xf32>
    %581 = vector.extract_strided_slice %578 {offsets = [0, 10], sizes = [2, 5], strides = [1, 1]} : vector<2x20xf32> to vector<2x5xf32>
    %582 = vector.extract_strided_slice %577 {offsets = [0, 15], sizes = [2, 5], strides = [1, 1]} : vector<2x20xf32> to vector<2x5xf32>
    %583 = arith.mulf %580, %544 : vector<2x5xf32>
    %584 = arith.mulf %579, %581 : vector<2x5xf32>
    %585 = arith.addf %583, %584 : vector<2x5xf32>
    %586 = math.tanh %585 : vector<2x5xf32>
    %587 = arith.mulf %582, %586 : vector<2x5xf32>
    %588 = tpu.concatenate %587, %13 in 1 : vector<2x5xf32>, vector<2x123xf32> -> vector<2x128xf32>
    %c13 = arith.constant 13 : index
    %c0_138 = arith.constant 0 : index
    %c0_139 = arith.constant 0 : index
    %589 = vector.load %arg7[%c13, %c0_138, %c0_139] : memref<15x2x128xf32, #tpu.memory_space<vmem>>, vector<1x2x128xf32>
    %590 = vector.shape_cast %589 : vector<1x2x128xf32> to vector<2x128xf32>
    %591 = vector.shape_cast %588 : vector<2x128xf32> to vector<1x2x128xf32>
    tpu.vector_store %arg7[%c13, %c0_138, %c0_139], %591 {strides = array<i32>} : memref<15x2x128xf32, #tpu.memory_space<vmem>>, vector<1x2x128xf32>,
    %c28 = arith.constant 28 : index
    %c0_140 = arith.constant 0 : index
    %592 = vector.load %arg8[%c28, %c0_140] : memref<32x128xf32, #tpu.memory_space<vmem>>, vector<2x128xf32>
    %cst_141 = arith.constant dense<0.000000e+00> : vector<2x128xf32>
    %593 = tpu.matmul %568, %7, %cst_141 {dimension_numbers = #tpu.dot_dimension_numbers<[1], [0], [0], [1], [0, 0, 1, 1], [], []>} : vector<2x32xf32>, vector<32x128xf32>, vector<2x128xf32> -> vector<2x128xf32>
    %594 = arith.addf %592, %593 : vector<2x128xf32>
    %595 = arith.negf %594 : vector<2x128xf32>
    %596 = math.exp %595 : vector<2x128xf32>
    %cst_142 = arith.constant 1.000000e+00 : f32
    %597 = vector.broadcast %cst_142 : f32 to vector<2x128xf32>
    %598 = arith.addf %597, %596 : vector<2x128xf32>
    %599 = arith.divf %597, %598 : vector<2x128xf32>
    %600 = math.tanh %594 : vector<2x128xf32>
    %601 = vector.extract_strided_slice %599 {offsets = [0, 0], sizes = [2, 32], strides = [1, 1]} : vector<2x128xf32> to vector<2x32xf32>
    %602 = vector.extract_strided_slice %599 {offsets = [0, 32], sizes = [2, 32], strides = [1, 1]} : vector<2x128xf32> to vector<2x32xf32>
    %603 = vector.extract_strided_slice %600 {offsets = [0, 64], sizes = [2, 32], strides = [1, 1]} : vector<2x128xf32> to vector<2x32xf32>
    %604 = vector.extract_strided_slice %599 {offsets = [0, 96], sizes = [2, 32], strides = [1, 1]} : vector<2x128xf32> to vector<2x32xf32>
    %605 = arith.mulf %602, %566 : vector<2x32xf32>
    %606 = arith.mulf %601, %603 : vector<2x32xf32>
    %607 = arith.addf %605, %606 : vector<2x32xf32>
    %608 = math.tanh %607 : vector<2x32xf32>
    %609 = arith.mulf %604, %608 : vector<2x32xf32>
    %cst_143 = arith.constant dense<0.000000e+00> : vector<2x20xf32>
    %610 = tpu.matmul %609, %8, %cst_143 {dimension_numbers = #tpu.dot_dimension_numbers<[1], [0], [0], [1], [0, 0, 1, 1], [], []>} : vector<2x32xf32>, vector<32x20xf32>, vector<2x20xf32> -> vector<2x20xf32>
    %cst_144 = arith.constant dense<0.000000e+00> : vector<2x20xf32>
    %611 = tpu.matmul %587, %9, %cst_144 {dimension_numbers = #tpu.dot_dimension_numbers<[1], [0], [0], [1], [0, 0, 1, 1], [], []>} : vector<2x5xf32>, vector<5x20xf32>, vector<2x20xf32> -> vector<2x20xf32>
    %612 = arith.addf %610, %611 : vector<2x20xf32>
    %613 = arith.addf %612, %12 : vector<2x20xf32>
    %614 = arith.negf %613 : vector<2x20xf32>
    %615 = math.exp %614 : vector<2x20xf32>
    %cst_145 = arith.constant 1.000000e+00 : f32
    %616 = vector.broadcast %cst_145 : f32 to vector<2x20xf32>
    %617 = arith.addf %616, %615 : vector<2x20xf32>
    %618 = arith.divf %616, %617 : vector<2x20xf32>
    %619 = math.tanh %613 : vector<2x20xf32>
    %620 = vector.extract_strided_slice %618 {offsets = [0, 0], sizes = [2, 5], strides = [1, 1]} : vector<2x20xf32> to vector<2x5xf32>
    %621 = vector.extract_strided_slice %618 {offsets = [0, 5], sizes = [2, 5], strides = [1, 1]} : vector<2x20xf32> to vector<2x5xf32>
    %622 = vector.extract_strided_slice %619 {offsets = [0, 10], sizes = [2, 5], strides = [1, 1]} : vector<2x20xf32> to vector<2x5xf32>
    %623 = vector.extract_strided_slice %618 {offsets = [0, 15], sizes = [2, 5], strides = [1, 1]} : vector<2x20xf32> to vector<2x5xf32>
    %624 = arith.mulf %621, %585 : vector<2x5xf32>
    %625 = arith.mulf %620, %622 : vector<2x5xf32>
    %626 = arith.addf %624, %625 : vector<2x5xf32>
    %627 = math.tanh %626 : vector<2x5xf32>
    %628 = arith.mulf %623, %627 : vector<2x5xf32>
    %629 = tpu.concatenate %628, %13 in 1 : vector<2x5xf32>, vector<2x123xf32> -> vector<2x128xf32>
    %c14_146 = arith.constant 14 : index
    %c0_147 = arith.constant 0 : index
    %c0_148 = arith.constant 0 : index
    %630 = vector.load %arg7[%c14_146, %c0_147, %c0_148] : memref<15x2x128xf32, #tpu.memory_space<vmem>>, vector<1x2x128xf32>
    %631 = vector.shape_cast %630 : vector<1x2x128xf32> to vector<2x128xf32>
    %632 = vector.shape_cast %629 : vector<2x128xf32> to vector<1x2x128xf32>
    tpu.vector_store %arg7[%c14_146, %c0_147, %c0_148], %632 {strides = array<i32>} : memref<15x2x128xf32, #tpu.memory_space<vmem>>, vector<1x2x128xf32>,
    return
  }
}

</mosaic_0001>

<bundles_post_ra>
// kernel: mann_forward.1
= control target key start
LH: loop header
LB: loop body
LE: loop exit
PB: predicated region body
PF: predicated region fallthrough
CT: control target
= control target key end

     0   :  { %s7231_s0 = inlined_call_operand.vmem [shape: f32[32,896], index: 0, kind: input, shape index: {}]   ;;  %s7232_s1 = inlined_call_operand.vmem [shape: f32[896,128], index: 1, kind: input, shape index: {}]   ;;  %s7233_s2 = inlined_call_operand.vmem [shape: f32[32,128], index: 2, kind: input, shape index: {}]   ;;  %s7234_s3 = inlined_call_operand.vmem [shape: f32[1,128], index: 3, kind: input, shape index: {}]   ;;  %s7235_s4 = inlined_call_operand.vmem [shape: f32[32,20], index: 4, kind: input, shape index: {}]   ;;  %s7236_s5 = inlined_call_operand.vmem [shape: f32[5,20], index: 5, kind: input, shape index: {}]   ;;  %s7237_s6 = inlined_call_operand.vmem [shape: f32[1,20], index: 6, kind: input, shape index: {}]   ;;  %s7238_s7 = inlined_call_operand.hbm [shape: f32[15,2,128], index: 7, kind: output, shape index: {}]  }
   0x1   :  { %v71_v0 = vld [vmem:[%s7232_s1 + $0x80] sm:$0xff]  ;;  %v72_v1 = vld [vmem:[%s7232_s1 + $0x88] sm:$0xff]  ;;  %v73_v11 = vld [vmem:[%s7232_s1 + $0x90] sm:$0xff] }
   0x2   :  { %v55_v2 = vld [vmem:[%s7232_s1] sm:$0xff]  ;;  %v5548_v3 = vpack.c.bf16 %v72_v1, %v71_v0  ;;  %v56_v4 = vld [vmem:[%s7232_s1 + $0x8] sm:$0xff]  ;;  %v74_v13 = vld [vmem:[%s7232_s1 + $0x98] sm:$0xff] }
   0x3   :  { %v103_v5 = vld [vmem:[%s7232_s1 + $0x180] sm:$0xff]  ;;  %v104_v6 = vld [vmem:[%s7232_s1 + $0x188] sm:$0xff]  ;;  %v5550_v7 = vpack.c.bf16 %v56_v4, %v55_v2  ;;  %v57_v14 = vld [vmem:[%s7232_s1 + $0x10] sm:$0xff]  ;;  %v5552_v16 = vpack.c.bf16 %v74_v13, %v73_v11 }
   0x4   :  { %v5580_v8 = vpack.c.bf16 %v104_v6, %v103_v5  ;;  %v87_v9 = vld [vmem:[%s7232_s1 + $0x100] sm:$0xff]  ;;  %v88_v10 = vld [vmem:[%s7232_s1 + $0x108] sm:$0xff]  ;;  %5549 = vmatprep.subr.bf16.mxu0 %v5548_v3  ;;  %v58_v15 = vld [vmem:[%s7232_s1 + $0x18] sm:$0xff] }
   0x5   :  { %v5582_v12 = vpack.c.bf16 %v88_v10, %v87_v9  ;;  %5551 = vmatpush3.bf16.msra.mxu0 %v5550_v7  ;;  %v5554_v17 = vpack.c.bf16 %v58_v15, %v57_v14  ;;  %v105_v18 = vld [vmem:[%s7232_s1 + $0x190] sm:$0xff]  ;;  %v106_v19 = vld [vmem:[%s7232_s1 + $0x198] sm:$0xff]  ;;  %v75_v23 = vld [vmem:[%s7232_s1 + $0xa0] sm:$0xff] }
   0x6   :  { %5581 = vmatprep.subr.bf16.mxu1 %v5580_v8  ;;  %v89_v20 = vld [vmem:[%s7232_s1 + $0x110] sm:$0xff]  ;;  %v5584_v21 = vpack.c.bf16 %v106_v19, %v105_v18  ;;  %v90_v22 = vld [vmem:[%s7232_s1 + $0x118] sm:$0xff]  ;;  %v76_v24 = vld [vmem:[%s7232_s1 + $0xa8] sm:$0xff]  ;;  %5553 = vmatprep.subr.bf16.mxu0 %v5552_v16 }
   0x7   :  { %5583 = vmatpush3.bf16.msra.mxu1 %v5582_v12  ;;  %v5586_v25 = vpack.c.bf16 %v90_v22, %v89_v20  ;;  %v5556_v26 = vpack.c.bf16 %v76_v24, %v75_v23  ;;  %v59_v27 = vld [vmem:[%s7232_s1 + $0x20] sm:$0xff]  ;;  %v60_v28 = vld [vmem:[%s7232_s1 + $0x28] sm:$0xff]  ;;  %v77_v35 = vld [vmem:[%s7232_s1 + $0xb0] sm:$0xff] }
   0x8   :  { %v107_v29 = vld [vmem:[%s7232_s1 + $0x1a0] sm:$0xff]  ;;  %5585 = vmatprep.subr.bf16.mxu1 %v5584_v21  ;;  %v108_v30 = vld [vmem:[%s7232_s1 + $0x1a8] sm:$0xff]  ;;  %v5558_v33 = vpack.c.bf16 %v60_v28, %v59_v27  ;;  %v78_v36 = vld [vmem:[%s7232_s1 + $0xb8] sm:$0xff] }
   0x9   :  { %v91_v31 = vld [vmem:[%s7232_s1 + $0x120] sm:$0xff]  ;;  %v92_v32 = vld [vmem:[%s7232_s1 + $0x128] sm:$0xff]  ;;  %5555 = vmatpush3.bf16.msra.mxu0 %v5554_v17  ;;  %v5588_v34 = vpack.c.bf16 %v108_v30, %v107_v29  ;;  %v61_v37 = vld [vmem:[%s7232_s1 + $0x30] sm:$0xff]  ;;  %v5560_v39 = vpack.c.bf16 %v78_v36, %v77_v35 }
   0xa   :  { %5557 = vmatprep.subr.bf16.mxu0 %v5556_v26  ;;  %v5590_v38 = vpack.c.bf16 %v92_v32, %v91_v31  ;;  %v62_v40 = vld [vmem:[%s7232_s1 + $0x38] sm:$0xff]  ;;  %v109_v41 = vld [vmem:[%s7232_s1 + $0x1b0] sm:$0xff]  ;;  %v79_v46 = vld [vmem:[%s7232_s1 + $0xc0] sm:$0xff] }
   0xb   :  { %5587 = vmatpush3.bf16.msra.mxu1 %v5586_v25  ;;  %v110_v42 = vld [vmem:[%s7232_s1 + $0x1b8] sm:$0xff]  ;;  %v93_v44 = vld [vmem:[%s7232_s1 + $0x130] sm:$0xff]  ;;  %v80_v47 = vld [vmem:[%s7232_s1 + $0xc8] sm:$0xff]  ;;  %v5562_v48 = vpack.c.bf16 %v62_v40, %v61_v37 }
   0xc   :  { %5589 = vmatprep.subr.bf16.mxu1 %v5588_v34  ;;  %v5592_v43 = vpack.c.bf16 %v110_v42, %v109_v41  ;;  %v94_v45 = vld [vmem:[%s7232_s1 + $0x138] sm:$0xff]  ;;  %v111_v49 = vld [vmem:[%s7232_s1 + $0x1c0] sm:$0xff]  ;;  %v112_v50 = vld [vmem:[%s7232_s1 + $0x1c8] sm:$0xff]  ;;  %v5564_v52 = vpack.c.bf16 %v80_v47, %v79_v46 }
   0xd   :  { %5559 = vmatpush3.bf16.msra.mxu0 %v5558_v33  ;;  %v5594_v51 = vpack.c.bf16 %v94_v45, %v93_v44  ;;  %v63_v53 = vld [vmem:[%s7232_s1 + $0x40] sm:$0xff]  ;;  %v64_v54 = vld [vmem:[%s7232_s1 + $0x48] sm:$0xff]  ;;  %v5596_v56 = vpack.c.bf16 %v112_v50, %v111_v49  ;;  %v81_v58 = vld [vmem:[%s7232_s1 + $0xd0] sm:$0xff] }
   0xe   :  { %5561 = vmatprep.subr.bf16.mxu0 %v5560_v39  ;;  %v95_v55 = vld [vmem:[%s7232_s1 + $0x140] sm:$0xff]  ;;  %v96_v57 = vld [vmem:[%s7232_s1 + $0x148] sm:$0xff]  ;;  %v82_v59 = vld [vmem:[%s7232_s1 + $0xd8] sm:$0xff]  ;;  %v5566_v62 = vpack.c.bf16 %v64_v54, %v63_v53 }
   0xf   :  { %5591 = vmatpush3.bf16.msra.mxu1 %v5590_v38  ;;  %v113_v60 = vld [vmem:[%s7232_s1 + $0x1d0] sm:$0xff]  ;;  %v114_v61 = vld [vmem:[%s7232_s1 + $0x1d8] sm:$0xff]  ;;  %v5598_v63 = vpack.c.bf16 %v96_v57, %v95_v55  ;;  %v5568_v0 = vpack.c.bf16 %v82_v59, %v81_v58  ;;  %v83_v6 = vld [vmem:[%s7232_s1 + $0xe0] sm:$0xff] }
  0x10   :  { %5593 = vmatprep.subr.bf16.mxu1 %v5592_v43  ;;  %v65_v1 = vld [vmem:[%s7232_s1 + $0x50] sm:$0xff]  ;;  %v66_v2 = vld [vmem:[%s7232_s1 + $0x58] sm:$0xff]  ;;  %v5600_v4 = vpack.c.bf16 %v114_v61, %v113_v60  ;;  %v84_v7 = vld [vmem:[%s7232_s1 + $0xe8] sm:$0xff] }
  0x11   :  { %5563 = vmatpush3.bf16.msra.mxu0 %v5562_v48  ;;  %v97_v3 = vld [vmem:[%s7232_s1 + $0x150] sm:$0xff]  ;;  %v98_v5 = vld [vmem:[%s7232_s1 + $0x158] sm:$0xff]  ;;  %v115_v8 = vld [vmem:[%s7232_s1 + $0x1e0] sm:$0xff]  ;;  %v5570_v10 = vpack.c.bf16 %v66_v2, %v65_v1  ;;  %v5572_v14 = vpack.c.bf16 %v84_v7, %v83_v6 }
  0x12   :  { %5565 = vmatprep.subr.bf16.mxu0 %v5564_v52  ;;  %v116_v9 = vld [vmem:[%s7232_s1 + $0x1e8] sm:$0xff]  ;;  %v67_v11 = vld [vmem:[%s7232_s1 + $0x60] sm:$0xff]  ;;  %v5602_v13 = vpack.c.bf16 %v98_v5, %v97_v3  ;;  %v85_v19 = vld [vmem:[%s7232_s1 + $0xf0] sm:$0xff] }
  0x13   :  { %5595 = vmatpush3.bf16.msra.mxu1 %v5594_v51  ;;  %v28_v12 = vld [vmem:[%s7231_s0 + $0x8] sm:$0xff]  ;;  %v99_v16 = vld [vmem:[%s7232_s1 + $0x160] sm:$0xff]  ;;  %v5604_v18 = vpack.c.bf16 %v116_v9, %v115_v8  ;;  %v86_v20 = vld [vmem:[%s7232_s1 + $0xf8] sm:$0xff] }
  0x14   :  { %5597 = vmatprep.subr.bf16.mxu1 %v5596_v56  ;;  %v68_v15 = vld [vmem:[%s7232_s1 + $0x68] sm:$0xff]  ;;  %238 = vmatprep.mubr.f32.mxu0 %v28_v12  ;;  %v30_v21 = vld [vmem:[%s7231_s0 + $0x18] sm:$0xff]  ;;  %v117_v22 = vld [vmem:[%s7232_s1 + $0x1f0] sm:$0xff]  ;;  %v5576_v26 = vpack.c.bf16 %v86_v20, %v85_v19 }
  0x15   :  { %5567 = vmatpush3.bf16.msra.mxu0 %v5566_v62  ;;  %v100_v17 = vld [vmem:[%s7232_s1 + $0x168] sm:$0xff]  ;;  %v118_v23 = vld [vmem:[%s7232_s1 + $0x1f8] sm:$0xff]  ;;  %323 = vmatprep.mubr.f32.mxu1 %v30_v21  ;;  %v5574_v24 = vpack.c.bf16 %v68_v15, %v67_v11  ;;  %v69_v27 = vld [vmem:[%s7232_s1 + $0x70] sm:$0xff] }
  0x16   :  { %5569 = vmatprep.subr.bf16.mxu0 %v5568_v0  ;;  %v5606_v25 = vpack.c.bf16 %v100_v17, %v99_v16  ;;  %v70_v28 = vld [vmem:[%s7232_s1 + $0x78] sm:$0xff]  ;;  %v101_v29 = vld [vmem:[%s7232_s1 + $0x170] sm:$0xff]  ;;  %v5608_v30 = vpack.c.bf16 %v118_v23, %v117_v22  ;;  %v135_v32 = vld [vmem:[%s7232_s1 + $0x280] sm:$0xff] }
  0x17   :  { %5599 = vmatpush3.bf16.msra.mxu1 %v5598_v63  ;;  %v102_v31 = vld [vmem:[%s7232_s1 + $0x178] sm:$0xff]  ;;  %v136_v33 = vld [vmem:[%s7232_s1 + $0x288] sm:$0xff]  ;;  %v151_v34 = vld [vmem:[%s7232_s1 + $0x300] sm:$0xff]  ;;  %v5578_v36 = vpack.c.bf16 %v70_v28, %v69_v27 }
  0x18   :  { %5601 = vmatprep.subr.bf16.mxu1 %v5600_v4  ;;  %v152_v35 = vld [vmem:[%s7232_s1 + $0x308] sm:$0xff]  ;;  %v5610_v37 = vpack.c.bf16 %v102_v31, %v101_v29  ;;  %v5612_v38 = vpack.c.bf16 %v136_v33, %v135_v32  ;;  %v119_v39 = vld [vmem:[%s7232_s1 + $0x200] sm:$0xff]  ;;  %v137_v42 = vld [vmem:[%s7232_s1 + $0x290] sm:$0xff] }
  0x19   :  { %5571 = vmatpush3.bf16.msra.mxu0 %v5570_v10  ;;  %v120_v40 = vld [vmem:[%s7232_s1 + $0x208] sm:$0xff]  ;;  %v5644_v41 = vpack.c.bf16 %v152_v35, %v151_v34  ;;  %v138_v43 = vld [vmem:[%s7232_s1 + $0x298] sm:$0xff]  ;;  %v153_v44 = vld [vmem:[%s7232_s1 + $0x310] sm:$0xff] }
  0x1a   :  { %5573 = vmatprep.subr.bf16.mxu0 %v5572_v14  ;;  %v154_v45 = vld [vmem:[%s7232_s1 + $0x318] sm:$0xff]  ;;  %v27_v46 = vld [vmem:[%s7231_s0] sm:$0xff]  ;;  %v5614_v47 = vpack.c.bf16 %v120_v40, %v119_v39  ;;  %v29_v48 = vld [vmem:[%s7231_s0 + $0x10] sm:$0xff]  ;;  %v5616_v49 = vpack.c.bf16 %v138_v43, %v137_v42 }
  0x1b   :  { %5603 = vmatpush3.bf16.msra.mxu1 %v5602_v13  ;;  %v121_v50 = vld [vmem:[%s7232_s1 + $0x210] sm:$0xff]  ;;  %v122_v51 = vld [vmem:[%s7232_s1 + $0x218] sm:$0xff]  ;;  %v5648_v52 = vpack.c.bf16 %v154_v45, %v153_v44  ;;  %v139_v53 = vld [vmem:[%s7232_s1 + $0x2a0] sm:$0xff] }
  0x1c   :  { %5605 = vmatprep.subr.bf16.mxu1 %v5604_v18  ;;  %v140_v54 = vld [vmem:[%s7232_s1 + $0x2a8] sm:$0xff]  ;;  %v155_v55 = vld [vmem:[%s7232_s1 + $0x320] sm:$0xff]  ;;  %v5618_v58 = vpack.c.bf16 %v122_v51, %v121_v50  ;;  %v34_v59 = vld [vmem:[%s7231_s0 + $0x38] sm:$0xff] }
  0x1d   :  { %5575 = vmatpush3.bf16.msra.mxu0 %v5574_v24  ;;  %v156_v56 = vld [vmem:[%s7232_s1 + $0x328] sm:$0xff]  ;;  %v35_v57 = vld [vmem:[%s7231_s0 + $0x40] sm:$0xff]  ;;  %v37_v60 = vld [vmem:[%s7231_s0 + $0x50] sm:$0xff]  ;;  %v5620_v61 = vpack.c.bf16 %v140_v54, %v139_v53 }
  0x1e   :  { %5577 = vmatprep.subr.bf16.mxu0 %v5576_v26  ;;  %v123_v62 = vld [vmem:[%s7232_s1 + $0x220] sm:$0xff]  ;;  %v124_v63 = vld [vmem:[%s7232_s1 + $0x228] sm:$0xff]  ;;  %v5652_v1 = vpack.c.bf16 %v156_v56, %v155_v55  ;;  %v141_v2 = vld [vmem:[%s7232_s1 + $0x2b0] sm:$0xff] }
  0x1f   :  { %5607 = vmatpush3.bf16.msra.mxu1 %v5606_v25  ;;  %v36_v0 = vld [vmem:[%s7231_s0 + $0x48] sm:$0xff]  ;;  %v142_v3 = vld [vmem:[%s7232_s1 + $0x2b8] sm:$0xff]  ;;  %v157_v4 = vld [vmem:[%s7232_s1 + $0x330] sm:$0xff]  ;;  %v5622_v7 = vpack.c.bf16 %v124_v63, %v123_v62 }
  0x20   :  { %5609 = vmatprep.subr.bf16.mxu1 %v5608_v30  ;;  %v158_v5 = vld [vmem:[%s7232_s1 + $0x338] sm:$0xff]  ;;  %v41_v8 = vld [vmem:[%s7231_s0 + $0x70] sm:$0xff]  ;;  %v44_v9 = vld [vmem:[%s7231_s0 + $0x88] sm:$0xff]  ;;  %v5624_v10 = vpack.c.bf16 %v142_v3, %v141_v2 }
  0x21   :  { %5579 = vmatpush3.bf16.msra.mxu0 %v5578_v36  ;;  %v42_v6 = vld [vmem:[%s7231_s0 + $0x78] sm:$0xff]  ;;  %v125_v11 = vld [vmem:[%s7232_s1 + $0x230] sm:$0xff]  ;;  %v43_v13 = vld [vmem:[%s7231_s0 + $0x80] sm:$0xff]  ;;  %v5656_v14 = vpack.c.bf16 %v158_v5, %v157_v4 }
  0x22   :  { %5613 = vmatprep.subr.bf16.mxu0 %v5612_v38  ;;  %v126_v12 = vld [vmem:[%s7232_s1 + $0x238] sm:$0xff]  ;;  %v143_v15 = vld [vmem:[%s7232_s1 + $0x2c0] sm:$0xff]  ;;  %v144_v16 = vld [vmem:[%s7232_s1 + $0x2c8] sm:$0xff] }
  0x23   :  { %5611 = vmatpush3.bf16.msra.mxu1 %v5610_v37  ;;  %v159_v17 = vld [vmem:[%s7232_s1 + $0x340] sm:$0xff]  ;;  %v160_v18 = vld [vmem:[%s7232_s1 + $0x348] sm:$0xff]  ;;  %v49_v19 = vld [vmem:[%s7231_s0 + $0xb0] sm:$0xff]  ;;  %v5626_v20 = vpack.c.bf16 %v126_v12, %v125_v11  ;;  %v5628_v23 = vpack.c.bf16 %v144_v16, %v143_v15 }
  0x24   :  { %5645 = vmatprep.subr.bf16.mxu1 %v5644_v41  ;;  %239 = vmatmul.mubr.f32.vlgmr.msra.gmra.mrb[0].mxu0 %v27_v46  ;;  %v48_v21 = vld [vmem:[%s7231_s0 + $0xa8] sm:$0xff]  ;;  %v51_v22 = vld [vmem:[%s7231_s0 + $0xc0] sm:$0xff]  ;;  %v50_v26 = vld [vmem:[%s7231_s0 + $0xb8] sm:$0xff]  ;;  %v5660_v27 = vpack.c.bf16 %v160_v18, %v159_v17 }
  0x25   :  { %5615 = vmatpush3.bf16.msra.mxu0 %v5614_v47  ;;  %243 = vmatprep.mubr.f32.mxu0 %v35_v57  ;;  %v127_v24 = vld [vmem:[%s7232_s1 + $0x240] sm:$0xff]  ;;  %v128_v25 = vld [vmem:[%s7232_s1 + $0x248] sm:$0xff]  ;;  %v145_v28 = vld [vmem:[%s7232_s1 + $0x2d0] sm:$0xff] }
  0x26   :  { %324 = vmatmul.mubr.f32.vlgmr.msra.gmra.mrb[0].mxu1 %v29_v48  ;;  %5617 = vmatprep.subr.bf16.mxu0 %v5616_v49  ;;  %v146_v29 = vld [vmem:[%s7232_s1 + $0x2d8] sm:$0xff]  ;;  %v161_v30 = vld [vmem:[%s7232_s1 + $0x350] sm:$0xff]  ;;  %v32_v32 = vld [vmem:[%s7231_s0 + $0x28] sm:$0xff]  ;;  %v5630_v33 = vpack.c.bf16 %v128_v25, %v127_v24 }
  0x27   :  { %5647 = vmatpush3.bf16.msra.mxu1 %v5644_v41  ;;  %328 = vmatprep.mubr.f32.mxu1 %v37_v60  ;;  %v162_v31 = vld [vmem:[%s7232_s1 + $0x358] sm:$0xff]  ;;  %v33_v34 = vld [vmem:[%s7231_s0 + $0x30] sm:$0xff] }
  0x28   :  { %5649 = vmatprep.subr.bf16.mxu1 %v5648_v52  ;;  %244 = vmatmul.mubr.f32.gmra.mrb[2].mxu0 %v34_v59 }
  0x29   :  { %5619 = vmatpush3.bf16.msra.mxu0 %v5618_v58  ;;  %248 = vmatprep.mubr.f32.mxu0 %v42_v6 }
  0x2a   :  { %329 = vmatmul.mubr.f32.gmra.mrb[2].mxu1 %v36_v0  ;;  %5621 = vmatprep.subr.bf16.mxu0 %v5620_v61 }
  0x2b   :  { %5651 = vmatpush3.bf16.msra.mxu1 %v5648_v52  ;;  %333 = vmatprep.mubr.f32.mxu1 %v44_v9 }
  0x2c   :  { %5653 = vmatprep.subr.bf16.mxu1 %v5652_v1  ;;  %249 = vmatmul.mubr.f32.gmra.mrb[4].mxu0 %v41_v8 }
  0x2d   :  { %5623 = vmatpush3.bf16.msra.mxu0 %v5622_v7  ;;  %253 = vmatprep.mubr.f32.mxu0 %v49_v19 }
  0x2e   :  { %334 = vmatmul.mubr.f32.gmra.mrb[4].mxu1 %v43_v13  ;;  %5625 = vmatprep.subr.bf16.mxu0 %v5624_v10 }
  0x2f   :  { %5655 = vmatpush3.bf16.msra.mxu1 %v5652_v1  ;;  %338 = vmatprep.mubr.f32.mxu1 %v51_v22 }
  0x30   :  { %5657 = vmatprep.subr.bf16.mxu1 %v5656_v14  ;;  %254 = vmatmul.mubr.f32.gmra.mrb[6].mxu0 %v48_v21 }
  0x31   :  { %5627 = vmatpush3.bf16.msra.mxu0 %v5626_v20 }
  0x32   :  { %339 = vmatmul.mubr.f32.gmra.mrb[6].mxu1 %v50_v26 }
  0x33   :  { %12 = vsyncpa [#allocation4], 0  ;;  %5629 = vmatprep.subr.bf16.mxu0 %v5628_v23  ;;  %5659 = vmatpush3.bf16.msra.mxu1 %v5656_v14  ;;  %v5632_v35 = vpack.c.bf16 %v146_v29, %v145_v28  ;;  %v129_v36 = vld [vmem:[%s7232_s1 + $0x250] sm:$0xff]  ;;  %v130_v37 = vld [vmem:[%s7232_s1 + $0x258] sm:$0xff]  ;;  %v5664_v38 = vpack.c.bf16 %v162_v31, %v161_v30  ;;  %v6133_v0 = vmov 0.0|0.0   ;;  %vm6134_vm0 = vmmov 0  }
  0x34   :  { %5661 = vmatprep.subr.bf16.mxu1 %v5660_v27  ;;  %v147_v39 = vld [vmem:[%s7232_s1 + $0x2e0] sm:$0xff]  ;;  %v148_v40 = vld [vmem:[%s7232_s1 + $0x2e8] sm:$0xff]  ;;  %408 = vmatprep.mubr.f32.mxu0 %v32_v32  ;;  %v5634_v43 = vpack.c.bf16 %v130_v37, %v129_v36  ;;  %v149_v48 = vld [vmem:[%s7232_s1 + $0x2f0] sm:$0xff]  ;;  %v6135_v10 = vmov 0.0   ;;  %vm637_vm1 = vcmask 1044480   ;;  %vm535_vm2 = vcmask 261120  }
  0x35   :  { %v163_v41 = vld [vmem:[%s7232_s1 + $0x360] sm:$0xff]  ;;  %v164_v42 = vld [vmem:[%s7232_s1 + $0x368] sm:$0xff]  ;;  %5137 = vmatprep.mubr.f32.mxu1 %v33_v34  ;;  %5631 = vmatpush3.bf16.msra.mxu0 %v5630_v33  ;;  %v5636_v44 = vpack.c.bf16 %v148_v40, %v147_v39  ;;  %v150_v49 = vld [vmem:[%s7232_s1 + $0x2f8] sm:$0xff]  ;;  %s6138_s23 = smov 118   ;;  %s6139_s24 = smov 5   ;;  %vm634_vm3 = vcmask 39936  }
  0x36   :  { %5633 = vmatprep.subr.bf16.mxu0 %v5632_v35  ;;  %v131_v45 = vld [vmem:[%s7232_s1 + $0x260] sm:$0xff]  ;;  %v132_v46 = vld [vmem:[%s7232_s1 + $0x268] sm:$0xff]  ;;  %v5668_v47 = vpack.c.bf16 %v164_v42, %v163_v41  ;;  %v165_v50 = vld [vmem:[%s7232_s1 + $0x370] sm:$0xff]  ;;  %v5640_v53 = vpack.c.bf16 %v150_v49, %v149_v48  ;;  %s6140_s25 = smov 10   ;;  %s6141_s26 = smov 113  }
  0x37   :  { %5663 = vmatpush3.bf16.msra.mxu1 %v5660_v27  ;;  %v166_v51 = vld [vmem:[%s7232_s1 + $0x378] sm:$0xff]  ;;  %v5638_v52 = vpack.c.bf16 %v132_v46, %v131_v45  ;;  %v133_v54 = vld [vmem:[%s7232_s1 + $0x270] sm:$0xff]  ;;  %v518_v58 = vld [vmem:[%s7233_s2] sm:$0xff] }
  0x38   :  { %5665 = vmatprep.subr.bf16.mxu1 %v5664_v38  ;;  %v134_v55 = vld [vmem:[%s7232_s1 + $0x278] sm:$0xff]  ;;  %v5672_v56 = vpack.c.bf16 %v166_v51, %v165_v50  ;;  %v519_v59 = vld [vmem:[%s7233_s2 + $0x8] sm:$0xff]  ;;  %v31_v60 = vld [vmem:[%s7231_s0 + $0x20] sm:$0xff] }
  0x39   :  { %5635 = vmatpush3.bf16.msra.mxu0 %v5634_v43  ;;  %v5642_v57 = vpack.c.bf16 %v134_v55, %v133_v54  ;;  %v39_v61 = vld [vmem:[%s7231_s0 + $0x60] sm:$0xff]  ;;  %v40_v62 = vld [vmem:[%s7231_s0 + $0x68] sm:$0xff]  ;;  %v6589_v63 = vpack.c.bf16 %v519_v59, %v518_v58  ;;  %v520_v2 = vld [vmem:[%s7233_s2 + $0x10] sm:$0xff] }
  0x3a   :  { %5637 = vmatprep.subr.bf16.mxu0 %v5636_v44  ;;  %v47_v1 = vld [vmem:[%s7231_s0 + $0xa0] sm:$0xff]  ;;  %v521_v3 = vld [vmem:[%s7233_s2 + $0x18] sm:$0xff]  ;;  %v45_v8 = vld [vmem:[%s7231_s0 + $0x90] sm:$0xff] }
  0x3b   :  { %5667 = vmatpush3.bf16.msra.mxu1 %v5664_v38  ;;  %v38_v4 = vld [vmem:[%s7231_s0 + $0x58] sm:$0xff]  ;;  %v6612_v7 = vpack.c.bf16 %v521_v3, %v520_v2  ;;  %v53_v9 = vld [vmem:[%s7231_s0 + $0xd0] sm:$0xff]  ;;  %v52_v11 = vld [vmem:[%s7231_s0 + $0xc8] sm:$0xff] }
  0x3c   :  { %5669 = vmatprep.subr.bf16.mxu1 %v5668_v47  ;;  %v46_v5 = vld [vmem:[%s7231_s0 + $0x98] sm:$0xff]  ;;  %v4683_v13 = vld [vmem:[%s7234_s3] ss:$0 sm:$0xff]  ;;  %s6137_s3 = smov 32  }
  0x3d   :  { %5639 = vmatpush3.bf16.msra.mxu0 %v5638_v52  ;;  %v54_v6 = vld [vmem:[%s7231_s0 + $0xd8] sm:$0xff]  ;;  %s6136_s0 = smov 64  }
  0x3e   :  { %5641 = vmatprep.subr.bf16.mxu0 %v5640_v53 }
  0x3f   :  { %5671 = vmatpush3.bf16.msra.mxu1 %v5668_v47 }
  0x40   :  { %5673 = vmatprep.subr.bf16.mxu1 %v5672_v56 }
  0x41   :  { %5643 = vmatpush3.bf16.msra.mxu0 %v5642_v57 }
  0x42   :  { %5682 = vmatprep.subr.bf16.mxu0 %v6133_v0 }
  0x43   :  { %5675 = vmatpush3.bf16.msra.mxu1 %v5672_v56 }
  0x44   :  { %5676 = vmatprep.subr.bf16.mxu1 %v6133_v0  ;;  %409 = vmatmul.mubr.f32.vlgmr.msra.gmra.mrb[8].mxu0 %v31_v60 }
  0x45   :  { %413 = vmatprep.mubr.f32.mxu0 %v39_v61 }
  0x46   :  { %5138 = vmatmul.mubr.f32.vlgmr.msra.gmra.mrb[8].mxu1 %v40_v62 }
  0x47   :  { %5678 = vmatpush3.bf16.msra.mxu1 %v6589_v63  ;;  %5140 = vmatprep.mubr.f32.mxu1 %v47_v1 }
  0x48   :  { %5679 = vmatprep.subr.bf16.mxu1 %v6133_v0  ;;  %414 = vmatmul.mubr.f32.gmra.mrb[10].mxu0 %v38_v4 }
  0x49   :  { %418 = vmatprep.mubr.f32.mxu0 %v46_v5 }
  0x4a   :  { %5141 = vmatmul.mubr.f32.gmra.mrb[10].mxu1 %v54_v6 }
  0x4b   :  { %5681 = vmatpush3.bf16.msra.mxu1 %v6612_v7  ;;  %5151 = vmatprep.mubr.msk.f32.mxu1 %vm6134_vm0, %v6135_v10 }
  0x4c   :  { %5154 = vmatprep.subr.mxu1 %v6135_v10  ;;  %419 = vmatmul.mubr.f32.gmra.mrb[12].mxu0 %v45_v8 }
  0x4d   :  { %423 = vmatprep.mubr.f32.mxu0 %v53_v9 }
  0x4e   :  { %5152 = vmatmul.mubr.f32.vlgmr.msra.gmra.mrb[12].mxu1 %v6135_v10 }
  0x4f   :  { %5156 = vmatprep.mubr.msk.f32.mxu1 %vm6134_vm0, %v6135_v10 }
  0x50   :  { %424 = vmatmul.mubr.f32.gmra.mrb[14].mxu0 %v52_v11 }
  0x51   :  { %5167 = vmatprep.mubr.msk.f32.mxu0 %vm6134_vm0, %v6135_v10 }
  0xf7   :  { %v4805_v12 = vpop.f32.mrb[0].mxu0 }
  0xf8   :  { %v4806_v14 = vpop.f32.mrb[1].mxu0 }
  0xf9   :  { %v4849_v15 = vpop.f32.mrb[0].mxu1  ;;  %v4807_v16 = vadd.f32 %v4806_v14, %v4805_v12 }
  0xfa   :  { %v4850_v17 = vpop.f32.mrb[1].mxu1 }
  0xfb   :  { %v4851_v18 = vadd.f32 %v4850_v17, %v4849_v15  ;;  %v241_v19 = vadd.f32 %v4807_v16, %v4683_v13  ;;  %v4808_v20 = vpop.f32.mrb[2].mxu0 }
  0xfc   :  { %v4809_v21 = vpop.f32.mrb[3].mxu0 }
  0xfd   :  { %v4852_v22 = vpop.f32.mrb[2].mxu1  ;;  %v326_v23 = vadd.f32 %v4851_v18, %v241_v19  ;;  %v4810_v24 = vadd.f32 %v4809_v21, %v4808_v20 }
  0xfe   :  { %v4853_v25 = vpop.f32.mrb[3].mxu1 }
  0xff   :  { %v4854_v26 = vadd.f32 %v4853_v25, %v4852_v22  ;;  %v246_v27 = vadd.f32 %v4810_v24, %v4683_v13  ;;  %v4811_v28 = vpop.f32.mrb[4].mxu0  ;;  %v523_v24 = vld [vmem:[%s7235_s4 + $0x8] sm:$0xff]  ;;  %v6650_v25 = vld [vmem:[%s7236_s5] sm:$0x1f] }
 0x100   :  { %v4812_v29 = vpop.f32.mrb[5].mxu0  ;;  %5155 = vmatpush3.msk.msra.mxu1 %vm637_vm1, %v6650_v25 }
 0x101   :  { %v4855_v30 = vpop.f32.mrb[4].mxu1  ;;  %v331_v31 = vadd.f32 %v4854_v26, %v246_v27  ;;  %v4813_v32 = vadd.f32 %v4812_v29, %v4811_v28  ;;  %v524_v27 = vld [vmem:[%s7235_s4 + $0x10] sm:$0xff]  ;;  %v525_v28 = vld [vmem:[%s7235_s4 + $0x18] sm:$0xff]  ;;  %5688 = vmatprep.subr.bf16.mxu1 %v6133_v0  ;;  %5157 = vmatmul.mubr.f32.vlgmr.msra.gmra.mrb[14].mxu1 %v6135_v10 }
 0x102   :  { %v4856_v33 = vpop.f32.mrb[5].mxu1  ;;  %v6665_v29 = vpack.c.bf16 %v525_v28, %v524_v27  ;;  %5690 = vmatpush3.bf16.msra.mxu1 %v6589_v63  ;;  %5178 = vmatprep.mubr.msk.f32.mxu1 %vm6134_vm0, %v6135_v10 }
 0x103   :  { %v4857_v34 = vadd.f32 %v4856_v33, %v4855_v30  ;;  %v251_v35 = vadd.f32 %v4813_v32, %v4683_v13  ;;  %v4814_v36 = vpop.f32.mrb[6].mxu0  ;;  %5691 = vmatprep.subr.bf16.mxu1 %v6133_v0 }
 0x104   :  { %v4815_v37 = vpop.f32.mrb[7].mxu0 }
 0x105   :  { %v4858_v38 = vpop.f32.mrb[6].mxu1  ;;  %v336_v39 = vadd.f32 %v4857_v34, %v251_v35  ;;  %v4816_v40 = vadd.f32 %v4815_v37, %v4814_v36  ;;  %v6694_v36 = vld [vmem:[%s7237_s6] ss:$0 sm:$0xff] }
 0x106   :  { %v4859_v41 = vpop.f32.mrb[7].mxu1  ;;  %5693 = vmatpush3.bf16.msra.mxu1 %v6612_v7 }
 0x107   :  { %v4860_v42 = vadd.f32 %v4859_v41, %v4858_v38  ;;  %v256_v43 = vadd.f32 %v4816_v40, %v4683_v13  ;;  %5700 = vmatprep.subr.bf16.mxu1 %v6133_v0 }
 0x109   :  { %v341_v44 = vadd.f32 %v4860_v42, %v256_v43 }
 0x117   :  { %v4893_v45 = vpop.f32.mrb[8].mxu0 }
 0x118   :  { %v4894_v46 = vpop.f32.mrb[9].mxu0 }
 0x119   :  { %v5139_v47 = vpop.f32.mrb[8].mxu1  ;;  %v4895_v48 = vadd.f32 %v4894_v46, %v4893_v45 }
 0x11a   :  { %v495_v49 = vpop.f32.mrb[9].mxu1 }
 0x11b   :  { %v4896_v50 = vpop.f32.mrb[10].mxu0  ;;  %v411_v51 = vadd.f32 %v4895_v48, %v326_v23  ;;  %v522_v23 = vld [vmem:[%s7235_s4] sm:$0xff] }
 0x11c   :  { %v4897_v52 = vpop.f32.mrb[11].mxu0  ;;  %v6652_v26 = vpack.c.bf16 %v523_v24, %v522_v23 }
 0x11d   :  { %v5142_v53 = vpop.f32.mrb[10].mxu1  ;;  %v496_v54 = vadd.f32 %v495_v49, %v411_v51  ;;  %v4898_v55 = vadd.f32 %v4897_v52, %v4896_v50 }
 0x11e   :  { %v505_v56 = vpop.f32.mrb[11].mxu1  ;;  %5684 = vmatpush3.bf16.msra.mxu0 %v6652_v26 }
 0x11f   :  { %514 = vst [vmem:[#allocation2] sm:$0xff] %v496_v54  ;;  %v416_v57 = vadd.f32 %v4898_v55, %v331_v31  ;;  %v4899_v58 = vpop.f32.mrb[12].mxu0  ;;  %5685 = vmatprep.subr.bf16.mxu0 %v6133_v0 }
 0x120   :  { %v4900_v59 = vpop.f32.mrb[13].mxu0 }
 0x121   :  { %v605_v60 = vpop.f32.mrb[12].mxu1  ;;  %v501_v61 = vadd.f32 %v5139_v47, %v416_v57  ;;  %v4901_v62 = vadd.f32 %v4900_v59, %v4899_v58 }
 0x122   :  { %v5153_v1 = vpop.f32.mrb[13].mxu1  ;;  %5687 = vmatpush3.bf16.msra.mxu0 %v6665_v29 }
 0x123   :  { %515 = vst [vmem:[#allocation2 + $0x8] sm:$0xff] %v501_v61  ;;  %v421_v2 = vadd.f32 %v4901_v62, %v336_v39  ;;  %v4902_v3 = vpop.f32.mrb[14].mxu0  ;;  %5181 = vmatprep.subr.mxu0 %v6135_v10 }
 0x124   :  { %v4903_v4 = vpop.f32.mrb[15].mxu0 }
 0x125   :  { %v506_v5 = vadd.f32 %v505_v56, %v421_v2  ;;  %v4904_v6 = vadd.f32 %v4903_v4, %v4902_v3 }
 0x126   :  { %v534_v8 = vld [vmem:[#allocation2] sm:$0x3]  ;;  %v817_v38 = vld [vmem:[#allocation2 + $0x2] sm:$0x3] }
 0x127   :  { %516 = vst [vmem:[#allocation2 + $0x10] sm:$0xff] %v506_v5  ;;  %v426_v9 = vadd.f32 %v4904_v6, %v341_v44  ;;  %v609_v11 = vadd.f32 %v605_v60, %v534_v8 }
 0x129   :  { %v511_v12 = vadd.f32 %v5142_v53, %v426_v9  ;;  %5867 = vtanh.f32 %v609_v11  ;;  %v4685_v14 = vmul.f32 -1.442695, %v609_v11 }
 0x12b   :  { %517 = vst [vmem:[#allocation2 + $0x18] sm:$0xff] %v511_v12  ;;  %5869 = vpow2.f32 %v4685_v14  ;;  %v1092_v14 = vld [vmem:[#allocation2 + $0x4] sm:$0x3] }
 0x133   :  { %v5868_v13 = vpop.eup %5867 }
 0x134   :  { %619 = vrot.lane.b32.xlu0 %v5868_v13, %s6136_s0 }
 0x135   :  { %v5870_v15 = vpop.eup %5869 }
 0x136   :  { %v613_v16 = vadd.f32 1.0, %v5870_v15 }
 0x138   :  { %5871 = vrcp.f32 %v613_v16 }
 0x142   :  { %v5872_v17 = vpop.eup %5871 }
 0x143   :  { %v617_v20 = vmul.f32 0.0, %v5872_v17 }
 0x1a6   :  { %v620_v18 = vpop.permute.xlu0 %619 }
 0x1a7   :  { %v622_v19 = vmul.f32 %v5872_v17, %v620_v18 }
 0x1a9   :  { %624 = vrot.lane.b32.xlu0 %v622_v19, %s6137_s3 }
 0x1d4   :  { %v707_v33 = vpop.f32.mrb[14].mxu1 }
 0x1d5   :  { %v5158_v34 = vpop.f32.mrb[15].mxu1 }
 0x21b   :  { %v625_v21 = vpop.permute.xlu0 %624 }
 0x21c   :  { %v6638_v22 = vadd.f32 %v625_v21, %v617_v20 }
 0x21e   :  { %5873 = vtanh.f32 %v6638_v22 }
 0x228   :  { %v5874_v30 = vpop.eup %5873 }
 0x229   :  { %630 = vrot.lane.b32.xlu1 %v5874_v30, %s6136_s0 }
 0x29b   :  { %v631_v31 = vpop.permute.xlu1 %630 }
 0x29c   :  { %v633_v32 = vmul.f32 %v5872_v17, %v631_v31 }
 0x29e   :  { %712 = vrot.lane.b32.xlu1 %v633_v32, %s6137_s3 }
 0x310   :  { %v713_v35 = vpop.permute.xlu1 %712 }
 0x311   :  { %5168 = vmatmul.mubr.msk.f32.vlgmr.msra.gmra.mrb[16].mxu0 %vm535_vm2, %v713_v35  ;;  %5179 = vmatmul.mubr.msk.f32.vlgmr.msra.gmra.mrb[16].mxu1 %vm535_vm2, %v713_v35 }
 0x312   :  { %5702 = vmatpush3.bf16.msra.mxu1 %v6589_v63  ;;  %5182 = vmatpush3.msk.msra.mxu0 %vm637_vm1, %v6650_v25 }
 0x313   :  { %5703 = vmatprep.subr.bf16.mxu1 %v6133_v0  ;;  %5205 = vmatprep.mubr.msk.f32.mxu1 %vm6134_vm0, %v6135_v10 }
 0x314   :  { %5183 = vmatprep.mubr.msk.f32.mxu0 %vm6134_vm0, %v6135_v10  ;;  %5694 = vmatprep.subr.bf16.mxu0 %v6133_v0 }
 0x316   :  { %5705 = vmatpush3.bf16.msra.mxu1 %v6612_v7 }
 0x317   :  { %5706 = vmatprep.subr.bf16.mxu1 %v6133_v0 }
 0x3e4   :  { %v782_v37 = vpop.f32.mrb[16].mxu0  ;;  %v884_v39 = vpop.f32.mrb[16].mxu1 }
 0x3e5   :  { %v783_v40 = vadd.f32 %v782_v37, %v707_v33  ;;  %v888_v41 = vadd.f32 %v884_v39, %v817_v38  ;;  %v5169_v42 = vpop.f32.mrb[17].mxu0  ;;  %v5180_v43 = vpop.f32.mrb[17].mxu1 }
 0x3e7   :  { %v786_v44 = vadd.f32 %v6694_v36, %v783_v40  ;;  %5875 = vtanh.f32 %v888_v41  ;;  %v4690_v47 = vmul.f32 -1.442695, %v888_v41 }
 0x3e9   :  { %5877 = vtanh.f32 %v786_v44  ;;  %v4688_v48 = vmul.f32 -1.442695, %v786_v44 }
 0x3ea   :  { %5879 = vpow2.f32 %v4690_v47 }
 0x3eb   :  { %5881 = vpow2.f32 %v4688_v48 }
 0x3f1   :  { %v5876_v45 = vpop.eup %5875 }
 0x3f2   :  { %898 = vrot.lane.b32.xlu1 %v5876_v45, %s6136_s0 }
 0x3f3   :  { %v5878_v46 = vpop.eup %5877 }
 0x3f4   :  { %796 = vrot.lane.b32.xlu0 %v5878_v46, %s6138_s23  ;;  %v5880_v49 = vpop.eup %5879 }
 0x3f5   :  { %v5882_v50 = vpop.eup %5881  ;;  %v892_v51 = vadd.f32 1.0, %v5880_v49 }
 0x3f6   :  { %v790_v52 = vadd.f32 1.0, %v5882_v50 }
 0x3f7   :  { %5883 = vrcp.f32 %v892_v51 }
 0x3f8   :  { %5885 = vrcp.f32 %v790_v52 }
 0x401   :  { %v5884_v53 = vpop.eup %5883 }
 0x402   :  { %v5886_v56 = vpop.eup %5885  ;;  %v896_v59 = vmul.f32 %v5884_v53, %v6638_v22 }
 0x403   :  { %v794_v62 = vmul.f32 0.0, %v5886_v56 }
 0x464   :  { %v899_v54 = vpop.permute.xlu1 %898 }
 0x465   :  { %v901_v55 = vmul.f32 %v5884_v53, %v899_v54 }
 0x466   :  { %v797_v57 = vpop.permute.xlu0 %796 }
 0x467   :  { %v799_v58 = vmul.f32 %v5886_v56, %v797_v57  ;;  %903 = vrot.lane.b32.xlu1 %v901_v55, %s6137_s3 }
 0x469   :  { %801 = vrot.lane.b32.xlu0 %v799_v58, %s6139_s24 }
 0x4d9   :  { %v904_v60 = vpop.permute.xlu1 %903 }
 0x4da   :  { %v6702_v61 = vadd.f32 %v904_v60, %v896_v59 }
 0x4db   :  { %v802_v1 = vpop.permute.xlu0 %801 }
 0x4dc   :  { %5887 = vtanh.f32 %v6702_v61  ;;  %v6705_v2 = vadd.f32 %v802_v1, %v794_v62  ;;  %v1367_v1 = vld [vmem:[#allocation2 + $0x6] sm:$0x3] }
 0x4de   :  { %5889 = vtanh.f32 %v6705_v2 }
 0x4e6   :  { %v5888_v3 = vpop.eup %5887 }
 0x4e7   :  { %909 = vrot.lane.b32.xlu1 %v5888_v3, %s6136_s0 }
 0x4e8   :  { %v5890_v4 = vpop.eup %5889 }
 0x4e9   :  { %807 = vrot.lane.b32.xlu0 %v5890_v4, %s6140_s25 }
 0x559   :  { %v910_v5 = vpop.permute.xlu1 %909 }
 0x55a   :  { %v912_v6 = vmul.f32 %v5884_v53, %v910_v5 }
 0x55b   :  { %v808_v8 = vpop.permute.xlu0 %807 }
 0x55c   :  { %v810_v9 = vmul.f32 %v5886_v56, %v808_v8  ;;  %986 = vrot.lane.b32.xlu1 %v912_v6, %s6137_s3 }
 0x55e   :  { %812 = vrot.lane.b32.xlu0 %v810_v9, %s6141_s26 }
 0x5ce   :  { %v987_v11 = vpop.permute.xlu1 %986 }
 0x5cf   :  { %5206 = vmatmul.mubr.msk.f32.vlgmr.msra.gmra.mrb[18].mxu1 %vm535_vm2, %v987_v11 }
 0x5d0   :  { %v813_v12 = vpop.permute.xlu0 %812  ;;  %5708 = vmatpush3.bf16.msra.mxu1 %v6652_v26  ;;  %5221 = vmatprep.mubr.msk.f32.mxu1 %vm6134_vm0, %v6135_v10 }
 0x5d1   :  { %v815_v13 = vsel %vm634_vm3, %v813_v12, 0.0  ;;  %5184 = vmatmul.mubr.msk.f32.vlgmr.msra.gmra.mrb[18].mxu0 %vm634_vm3, %v813_v12  ;;  %5709 = vmatprep.subr.bf16.mxu1 %v6133_v0 }
 0x5d2   :  { %816 = vst [vmem:[#allocation3] sm:$0x3] %v815_v13  ;;  %5696 = vmatpush3.bf16.msra.mxu0 %v6652_v26  ;;  %5194 = vmatprep.mubr.msk.f32.mxu0 %vm6134_vm0, %v6135_v10 }
 0x5d3   :  { %5697 = vmatprep.subr.bf16.mxu0 %v6133_v0 }
 0x5d4   :  { %5711 = vmatpush3.bf16.msra.mxu1 %v6665_v29 }
 0x5d5   :  { %5235 = vmatprep.subr.mxu1 %v6135_v10 }
 0x5d6   :  { %5699 = vmatpush3.bf16.msra.mxu0 %v6665_v29 }
 0x5d7   :  { %5208 = vmatprep.subr.mxu0 %v6135_v10 }
 0x5d9   :  { %5195 = vmatmul.mubr.msk.f32.vlgmr.msra.gmra.mrb[20].mxu0 %vm535_vm2, %v987_v11 }
 0x5da   :  { %5209 = vmatpush3.msk.msra.mxu0 %vm637_vm1, %v6650_v25  ;;  %5210 = vmatprep.mubr.msk.f32.mxu0 %vm6134_vm0, %v6135_v10 }
 0x5db   :  { %5712 = vmatprep.subr.bf16.mxu0 %v6133_v0 }
 0x6a2   :  { %v1159_v15 = vpop.f32.mrb[18].mxu1 }
 0x6a3   :  { %v1163_v16 = vadd.f32 %v1159_v15, %v1092_v14  ;;  %v5207_v17 = vpop.f32.mrb[19].mxu1 }
 0x6a4   :  { %v981_v18 = vpop.f32.mrb[18].mxu0 }
 0x6a5   :  { %5891 = vtanh.f32 %v1163_v16  ;;  %v5185_v19 = vpop.f32.mrb[19].mxu0  ;;  %v4696_v28 = vmul.f32 -1.442695, %v1163_v16 }
 0x6ac   :  { %v1056_v20 = vpop.f32.mrb[20].mxu0 }
 0x6ad   :  { %v1057_v21 = vadd.f32 %v1056_v20, %v981_v18  ;;  %v5196_v22 = vpop.f32.mrb[21].mxu0 }
 0x6af   :  { %v5892_v23 = vpop.eup %5891  ;;  %v1060_v24 = vadd.f32 %v6694_v36, %v1057_v21 }
 0x6b0   :  { %1173 = vrot.lane.b32.xlu1 %v5892_v23, %s6136_s0 }
 0x6b1   :  { %5893 = vtanh.f32 %v1060_v24  ;;  %v4694_v30 = vmul.f32 -1.442695, %v1060_v24 }
 0x6b2   :  { %5895 = vpow2.f32 %v4696_v28 }
 0x6b3   :  { %5897 = vpow2.f32 %v4694_v30 }
 0x6bb   :  { %v5894_v27 = vpop.eup %5893 }
 0x6bc   :  { %1070 = vrot.lane.b32.xlu0 %v5894_v27, %s6138_s23  ;;  %v5896_v31 = vpop.eup %5895 }
 0x6bd   :  { %v1167_v32 = vadd.f32 1.0, %v5896_v31  ;;  %v5898_v33 = vpop.eup %5897 }
 0x6be   :  { %v1064_v34 = vadd.f32 1.0, %v5898_v33 }
 0x6bf   :  { %5899 = vrcp.f32 %v1167_v32 }
 0x6c0   :  { %5901 = vrcp.f32 %v1064_v34 }
 0x6c9   :  { %v5900_v35 = vpop.eup %5899 }
 0x6ca   :  { %v5902_v39 = vpop.eup %5901  ;;  %v1171_v42 = vmul.f32 %v5900_v35, %v6702_v61 }
 0x6cb   :  { %v1068_v45 = vmul.f32 %v5902_v39, %v6705_v2 }
 0x722   :  { %v1174_v37 = vpop.permute.xlu1 %1173 }
 0x723   :  { %v1176_v38 = vmul.f32 %v5900_v35, %v1174_v37 }
 0x725   :  { %1178 = vrot.lane.b32.xlu1 %v1176_v38, %s6137_s3 }
 0x72e   :  { %v1071_v40 = vpop.permute.xlu0 %1070 }
 0x72f   :  { %v1073_v41 = vmul.f32 %v5902_v39, %v1071_v40 }
 0x731   :  { %1075 = vrot.lane.b32.xlu0 %v1073_v41, %s6139_s24 }
 0x797   :  { %v1179_v43 = vpop.permute.xlu1 %1178 }
 0x798   :  { %v6739_v44 = vadd.f32 %v1179_v43, %v1171_v42 }
 0x79a   :  { %5903 = vtanh.f32 %v6739_v44 }
 0x7a3   :  { %v1076_v46 = vpop.permute.xlu0 %1075 }
 0x7a4   :  { %v5904_v47 = vpop.eup %5903  ;;  %v6743_v48 = vadd.f32 %v1076_v46, %v1068_v45  ;;  %v1642_v45 = vld [vmem:[#allocation2 + $0x8] sm:$0x3] }
 0x7a5   :  { %1184 = vrot.lane.b32.xlu1 %v5904_v47, %s6136_s0 }
 0x7a6   :  { %5905 = vtanh.f32 %v6743_v48 }
 0x7b0   :  { %v5906_v49 = vpop.eup %5905 }
 0x7b1   :  { %1081 = vrot.lane.b32.xlu0 %v5906_v49, %s6140_s25 }
 0x817   :  { %v1185_v50 = vpop.permute.xlu1 %1184 }
 0x818   :  { %v1187_v51 = vmul.f32 %v5900_v35, %v1185_v50 }
 0x81a   :  { %1261 = vrot.lane.b32.xlu1 %v1187_v51, %s6137_s3 }
 0x823   :  { %v1082_v52 = vpop.permute.xlu0 %1081 }
 0x824   :  { %v1084_v53 = vmul.f32 %v5902_v39, %v1082_v52 }
 0x826   :  { %1086 = vrot.lane.b32.xlu0 %v1084_v53, %s6141_s26 }
 0x88c   :  { %v1262_v54 = vpop.permute.xlu1 %1261 }
 0x88d   :  { %5222 = vmatmul.mubr.msk.f32.vlgmr.msra.gmra.mrb[20].mxu1 %vm535_vm2, %v1262_v54 }
 0x88e   :  { %5236 = vmatpush3.msk.msra.mxu1 %vm637_vm1, %v6650_v25  ;;  %5237 = vmatprep.mubr.msk.f32.mxu1 %vm6134_vm0, %v6135_v10 }
 0x88f   :  { %5724 = vmatprep.subr.bf16.mxu1 %v6133_v0 }
 0x898   :  { %v1087_v55 = vpop.permute.xlu0 %1086 }
 0x899   :  { %v1089_v56 = vsel %vm634_vm3, %v1087_v55, 0.0  ;;  %5211 = vmatmul.mubr.msk.f32.vlgmr.msra.gmra.mrb[22].mxu0 %vm634_vm3, %v1087_v55 }
 0x89a   :  { %1091 = vst [vmem:[#allocation3 + $0x2] sm:$0x3] %v1089_v56  ;;  %5714 = vmatpush3.bf16.msra.mxu0 %v6589_v63  ;;  %5232 = vmatprep.mubr.msk.f32.mxu0 %vm6134_vm0, %v6135_v10 }
 0x89b   :  { %5715 = vmatprep.subr.bf16.mxu0 %v6133_v0 }
 0x89e   :  { %5717 = vmatpush3.bf16.msra.mxu0 %v6612_v7 }
 0x89f   :  { %5718 = vmatprep.subr.bf16.mxu0 %v6133_v0 }
 0x8a1   :  { %5233 = vmatmul.mubr.msk.f32.vlgmr.msra.gmra.mrb[24].mxu0 %vm535_vm2, %v1262_v54 }
 0x8a2   :  { %5720 = vmatpush3.bf16.msra.mxu0 %v6652_v26  ;;  %5248 = vmatprep.mubr.msk.f32.mxu0 %vm6134_vm0, %v6135_v10 }
 0x8a3   :  { %5721 = vmatprep.subr.bf16.mxu0 %v6133_v0 }
 0x8a6   :  { %5723 = vmatpush3.bf16.msra.mxu0 %v6665_v29 }
 0x8a7   :  { %5262 = vmatprep.subr.mxu0 %v6135_v10 }
 0x960   :  { %v1331_v57 = vpop.f32.mrb[20].mxu1 }
 0x961   :  { %v5223_v58 = vpop.f32.mrb[21].mxu1 }
 0x96c   :  { %v1256_v59 = vpop.f32.mrb[22].mxu0 }
 0x96d   :  { %v1332_v60 = vadd.f32 %v1331_v57, %v1256_v59  ;;  %v5212_v61 = vpop.f32.mrb[23].mxu0 }
 0x96f   :  { %v1335_v62 = vadd.f32 %v6694_v36, %v1332_v60 }
 0x971   :  { %5907 = vtanh.f32 %v1335_v62  ;;  %v4700_v8 = vmul.f32 -1.442695, %v1335_v62 }
 0x974   :  { %v1434_v2 = vpop.f32.mrb[24].mxu0 }
 0x975   :  { %v1438_v3 = vadd.f32 %v1434_v2, %v1367_v1  ;;  %v5234_v4 = vpop.f32.mrb[25].mxu0 }
 0x977   :  { %5909 = vtanh.f32 %v1438_v3  ;;  %v4702_v9 = vmul.f32 -1.442695, %v1438_v3 }
 0x978   :  { %5911 = vpow2.f32 %v4700_v8 }
 0x979   :  { %5913 = vpow2.f32 %v4702_v9 }
 0x97b   :  { %v5908_v5 = vpop.eup %5907 }
 0x97c   :  { %1345 = vrot.lane.b32.xlu0 %v5908_v5, %s6138_s23 }
 0x981   :  { %v5910_v6 = vpop.eup %5909 }
 0x982   :  { %1448 = vrot.lane.b32.xlu1 %v5910_v6, %s6136_s0  ;;  %v5912_v11 = vpop.eup %5911 }
 0x983   :  { %v1339_v12 = vadd.f32 1.0, %v5912_v11  ;;  %v5914_v13 = vpop.eup %5913 }
 0x984   :  { %v1442_v14 = vadd.f32 1.0, %v5914_v13 }
 0x985   :  { %5915 = vrcp.f32 %v1339_v12 }
 0x986   :  { %5917 = vrcp.f32 %v1442_v14 }
 0x98f   :  { %v5916_v15 = vpop.eup %5915 }
 0x990   :  { %v5918_v18 = vpop.eup %5917  ;;  %v1343_v21 = vmul.f32 %v5916_v15, %v6743_v48 }
 0x991   :  { %v1446_v24 = vmul.f32 %v5918_v18, %v6739_v44 }
 0x9ee   :  { %v1346_v16 = vpop.permute.xlu0 %1345 }
 0x9ef   :  { %v1348_v17 = vmul.f32 %v5916_v15, %v1346_v16 }
 0x9f1   :  { %1350 = vrot.lane.b32.xlu0 %v1348_v17, %s6139_s24 }
 0x9f4   :  { %v1449_v19 = vpop.permute.xlu1 %1448 }
 0x9f5   :  { %v1451_v20 = vmul.f32 %v5918_v18, %v1449_v19 }
 0x9f7   :  { %1453 = vrot.lane.b32.xlu1 %v1451_v20, %s6137_s3 }
 0xa63   :  { %v1351_v22 = vpop.permute.xlu0 %1350 }
 0xa64   :  { %v6777_v23 = vadd.f32 %v1351_v22, %v1343_v21 }
 0xa66   :  { %5919 = vtanh.f32 %v6777_v23 }
 0xa69   :  { %v1454_v27 = vpop.permute.xlu1 %1453 }
 0xa6a   :  { %v6781_v28 = vadd.f32 %v1454_v27, %v1446_v24  ;;  %v1917_v27 = vld [vmem:[#allocation2 + $0xa] sm:$0x3] }
 0xa6c   :  { %5921 = vtanh.f32 %v6781_v28 }
 0xa70   :  { %v5920_v30 = vpop.eup %5919 }
 0xa71   :  { %1356 = vrot.lane.b32.xlu0 %v5920_v30, %s6140_s25 }
 0xa76   :  { %v5922_v31 = vpop.eup %5921 }
 0xa77   :  { %1459 = vrot.lane.b32.xlu1 %v5922_v31, %s6136_s0 }
 0xae3   :  { %v1357_v32 = vpop.permute.xlu0 %1356 }
 0xae4   :  { %v1359_v33 = vmul.f32 %v5916_v15, %v1357_v32 }
 0xae6   :  { %1361 = vrot.lane.b32.xlu0 %v1359_v33, %s6141_s26 }
 0xae9   :  { %v1460_v34 = vpop.permute.xlu1 %1459 }
 0xaea   :  { %v1462_v35 = vmul.f32 %v5918_v18, %v1460_v34 }
 0xaec   :  { %1536 = vrot.lane.b32.xlu1 %v1462_v35, %s6137_s3 }
 0xb58   :  { %v1362_v37 = vpop.permute.xlu0 %1361 }
 0xb59   :  { %v1364_v38 = vsel %vm634_vm3, %v1362_v37, 0.0  ;;  %5238 = vmatmul.mubr.msk.f32.vlgmr.msra.gmra.mrb[22].mxu1 %vm634_vm3, %v1362_v37 }
 0xb5a   :  { %1366 = vst [vmem:[#allocation3 + $0x4] sm:$0x3] %v1364_v38  ;;  %5726 = vmatpush3.bf16.msra.mxu1 %v6589_v63  ;;  %5259 = vmatprep.mubr.msk.f32.mxu1 %vm6134_vm0, %v6135_v10 }
 0xb5b   :  { %5727 = vmatprep.subr.bf16.mxu1 %v6133_v0 }
 0xb5e   :  { %5729 = vmatpush3.bf16.msra.mxu1 %v6612_v7  ;;  %v1537_v39 = vpop.permute.xlu1 %1536 }
 0xb5f   :  { %5249 = vmatmul.mubr.msk.f32.vlgmr.msra.gmra.mrb[26].mxu0 %vm535_vm2, %v1537_v39  ;;  %5730 = vmatprep.subr.bf16.mxu1 %v6133_v0 }
 0xb60   :  { %5263 = vmatpush3.msk.msra.mxu0 %vm637_vm1, %v6650_v25  ;;  %5264 = vmatprep.mubr.msk.f32.mxu0 %vm6134_vm0, %v6135_v10 }
 0xb61   :  { %5260 = vmatmul.mubr.msk.f32.vlgmr.msra.gmra.mrb[24].mxu1 %vm535_vm2, %v1537_v39  ;;  %5736 = vmatprep.subr.bf16.mxu0 %v6133_v0 }
 0xb62   :  { %5732 = vmatpush3.bf16.msra.mxu1 %v6652_v26  ;;  %5275 = vmatprep.mubr.msk.f32.mxu1 %vm6134_vm0, %v6135_v10 }
 0xb63   :  { %5733 = vmatprep.subr.bf16.mxu1 %v6133_v0 }
 0xb66   :  { %5735 = vmatpush3.bf16.msra.mxu1 %v6665_v29 }
 0xb67   :  { %5289 = vmatprep.subr.mxu1 %v6135_v10 }
 0xc2c   :  { %v1531_v40 = vpop.f32.mrb[22].mxu1 }
 0xc2d   :  { %v5239_v41 = vpop.f32.mrb[23].mxu1 }
 0xc32   :  { %v1606_v42 = vpop.f32.mrb[26].mxu0 }
 0xc33   :  { %v1607_v43 = vadd.f32 %v1606_v42, %v1531_v40  ;;  %v5250_v44 = vpop.f32.mrb[27].mxu0 }
 0xc34   :  { %v1709_v46 = vpop.f32.mrb[24].mxu1 }
 0xc35   :  { %v1610_v47 = vadd.f32 %v6694_v36, %v1607_v43  ;;  %v1713_v48 = vadd.f32 %v1709_v46, %v1642_v45  ;;  %v5261_v49 = vpop.f32.mrb[25].mxu1 }
 0xc37   :  { %5923 = vtanh.f32 %v1610_v47  ;;  %v4706_v52 = vmul.f32 -1.442695, %v1610_v47  ;;  %v4708_v53 = vmul.f32 -1.442695, %v1713_v48 }
 0xc38   :  { %5925 = vtanh.f32 %v1713_v48 }
 0xc39   :  { %5927 = vpow2.f32 %v4706_v52 }
 0xc3a   :  { %5929 = vpow2.f32 %v4708_v53 }
 0xc41   :  { %v5924_v50 = vpop.eup %5923 }
 0xc42   :  { %v5926_v51 = vpop.eup %5925  ;;  %1620 = vrot.lane.b32.xlu0 %v5924_v50, %s6138_s23 }
 0xc43   :  { %1723 = vrot.lane.b32.xlu1 %v5926_v51, %s6136_s0  ;;  %v5928_v54 = vpop.eup %5927 }
 0xc44   :  { %v5930_v55 = vpop.eup %5929  ;;  %v1614_v56 = vadd.f32 1.0, %v5928_v54 }
 0xc45   :  { %v1717_v57 = vadd.f32 1.0, %v5930_v55 }
 0xc46   :  { %5931 = vrcp.f32 %v1614_v56 }
 0xc47   :  { %5933 = vrcp.f32 %v1717_v57 }
 0xc50   :  { %v5932_v58 = vpop.eup %5931 }
 0xc51   :  { %v5934_v60 = vpop.eup %5933  ;;  %v1618_v2 = vmul.f32 %v5932_v58, %v6777_v23 }
 0xc52   :  { %v1721_v3 = vmul.f32 %v5934_v60, %v6781_v28 }
 0xcb4   :  { %v1621_v59 = vpop.permute.xlu0 %1620 }
 0xcb5   :  { %v1724_v61 = vpop.permute.xlu1 %1723  ;;  %v1623_v62 = vmul.f32 %v5932_v58, %v1621_v59 }
 0xcb6   :  { %v1726_v1 = vmul.f32 %v5934_v60, %v1724_v61 }
 0xcb7   :  { %1625 = vrot.lane.b32.xlu0 %v1623_v62, %s6139_s24 }
 0xcb8   :  { %1728 = vrot.lane.b32.xlu1 %v1726_v1, %s6137_s3 }
 0xd29   :  { %v1626_v4 = vpop.permute.xlu0 %1625 }
 0xd2a   :  { %v1729_v5 = vpop.permute.xlu1 %1728  ;;  %v6816_v6 = vadd.f32 %v1626_v4, %v1618_v2 }
 0xd2b   :  { %v6818_v8 = vadd.f32 %v1729_v5, %v1721_v3 }
 0xd2c   :  { %5935 = vtanh.f32 %v6816_v6 }
 0xd2d   :  { %5937 = vtanh.f32 %v6818_v8 }
 0xd36   :  { %v5936_v9 = vpop.eup %5935 }
 0xd37   :  { %v5938_v11 = vpop.eup %5937  ;;  %1631 = vrot.lane.b32.xlu0 %v5936_v9, %s6140_s25 }
 0xd38   :  { %1734 = vrot.lane.b32.xlu1 %v5938_v11, %s6136_s0 }
 0xda9   :  { %v1632_v12 = vpop.permute.xlu0 %1631 }
 0xdaa   :  { %v1735_v13 = vpop.permute.xlu1 %1734  ;;  %v1634_v14 = vmul.f32 %v5932_v58, %v1632_v12 }
 0xdab   :  { %v1737_v15 = vmul.f32 %v5934_v60, %v1735_v13 }
 0xdac   :  { %1636 = vrot.lane.b32.xlu0 %v1634_v14, %s6141_s26 }
 0xdad   :  { %1811 = vrot.lane.b32.xlu1 %v1737_v15, %s6137_s3 }
 0xe1e   :  { %v1637_v16 = vpop.permute.xlu0 %1636 }
 0xe1f   :  { %v1812_v17 = vpop.permute.xlu1 %1811  ;;  %v1639_v18 = vsel %vm634_vm3, %v1637_v16, 0.0  ;;  %5265 = vmatmul.mubr.msk.f32.vlgmr.msra.gmra.mrb[28].mxu0 %vm634_vm3, %v1637_v16 }
 0xe20   :  { %1641 = vst [vmem:[#allocation3 + $0x6] sm:$0x3] %v1639_v18  ;;  %5276 = vmatmul.mubr.msk.f32.vlgmr.msra.gmra.mrb[26].mxu1 %vm535_vm2, %v1812_v17  ;;  %5738 = vmatpush3.bf16.msra.mxu0 %v6589_v63 }
 0xe21   :  { %5739 = vmatprep.subr.bf16.mxu0 %v6133_v0  ;;  %5286 = vmatprep.mubr.msk.f32.mxu0 %vm6134_vm0, %v6135_v10 }
 0xe22   :  { %5290 = vmatpush3.msk.msra.mxu1 %vm637_vm1, %v6650_v25  ;;  %5291 = vmatprep.mubr.msk.f32.mxu1 %vm6134_vm0, %v6135_v10 }
 0xe23   :  { %5748 = vmatprep.subr.bf16.mxu1 %v6133_v0 }
 0xe24   :  { %5741 = vmatpush3.bf16.msra.mxu0 %v6612_v7 }
 0xe25   :  { %5742 = vmatprep.subr.bf16.mxu0 %v6133_v0 }
 0xe27   :  { %5287 = vmatmul.mubr.msk.f32.vlgmr.msra.gmra.mrb[30].mxu0 %vm535_vm2, %v1812_v17 }
 0xe28   :  { %5744 = vmatpush3.bf16.msra.mxu0 %v6652_v26  ;;  %5302 = vmatprep.mubr.msk.f32.mxu0 %vm6134_vm0, %v6135_v10 }
 0xe29   :  { %5745 = vmatprep.subr.bf16.mxu0 %v6133_v0 }
 0xe2c   :  { %5747 = vmatpush3.bf16.msra.mxu0 %v6665_v29 }
 0xe2d   :  { %5316 = vmatprep.subr.mxu0 %v6135_v10 }
 0xef2   :  { %v1806_v19 = vpop.f32.mrb[28].mxu0 }
 0xef3   :  { %v1881_v20 = vpop.f32.mrb[26].mxu1  ;;  %v5266_v21 = vpop.f32.mrb[29].mxu0 }
 0xef4   :  { %v1882_v22 = vadd.f32 %v1881_v20, %v1806_v19  ;;  %v5277_v23 = vpop.f32.mrb[27].mxu1 }
 0xef6   :  { %v1885_v24 = vadd.f32 %v6694_v36, %v1882_v22 }
 0xef8   :  { %5939 = vtanh.f32 %v1885_v24  ;;  %v4712_v34 = vmul.f32 -1.442695, %v1885_v24 }
 0xefa   :  { %v1984_v28 = vpop.f32.mrb[30].mxu0 }
 0xefb   :  { %v1988_v30 = vadd.f32 %v1984_v28, %v1917_v27  ;;  %v5288_v31 = vpop.f32.mrb[31].mxu0 }
 0xefd   :  { %5941 = vtanh.f32 %v1988_v30  ;;  %v4714_v35 = vmul.f32 -1.442695, %v1988_v30 }
 0xefe   :  { %5943 = vpow2.f32 %v4712_v34 }
 0xeff   :  { %5945 = vpow2.f32 %v4714_v35 }
 0xf02   :  { %v5940_v32 = vpop.eup %5939 }
 0xf03   :  { %1895 = vrot.lane.b32.xlu0 %v5940_v32, %s6138_s23 }
 0xf07   :  { %v5942_v33 = vpop.eup %5941 }
 0xf08   :  { %1998 = vrot.lane.b32.xlu1 %v5942_v33, %s6136_s0  ;;  %v5944_v37 = vpop.eup %5943 }
 0xf09   :  { %v1889_v38 = vadd.f32 1.0, %v5944_v37  ;;  %v5946_v39 = vpop.eup %5945 }
 0xf0a   :  { %v1992_v40 = vadd.f32 1.0, %v5946_v39 }
 0xf0b   :  { %5947 = vrcp.f32 %v1889_v38 }
 0xf0c   :  { %5949 = vrcp.f32 %v1992_v40 }
 0xf15   :  { %v5948_v41 = vpop.eup %5947 }
 0xf16   :  { %v5950_v44 = vpop.eup %5949  ;;  %v1893_v47 = vmul.f32 %v5948_v41, %v6816_v6  ;;  %v2192_v6 = vld [vmem:[#allocation2 + $0xc] sm:$0x3] }
 0xf17   :  { %v1996_v50 = vmul.f32 %v5950_v44, %v6818_v8 }
 0xf75   :  { %v1896_v42 = vpop.permute.xlu0 %1895 }
 0xf76   :  { %v1898_v43 = vmul.f32 %v5948_v41, %v1896_v42 }
 0xf78   :  { %1900 = vrot.lane.b32.xlu0 %v1898_v43, %s6139_s24 }
 0xf7a   :  { %v1999_v45 = vpop.permute.xlu1 %1998 }
 0xf7b   :  { %v2001_v46 = vmul.f32 %v5950_v44, %v1999_v45 }
 0xf7d   :  { %2003 = vrot.lane.b32.xlu1 %v2001_v46, %s6137_s3 }
 0xfea   :  { %v1901_v48 = vpop.permute.xlu0 %1900 }
 0xfeb   :  { %v6853_v49 = vadd.f32 %v1901_v48, %v1893_v47 }
 0xfed   :  { %5951 = vtanh.f32 %v6853_v49 }
 0xfef   :  { %v2004_v51 = vpop.permute.xlu1 %2003 }
 0xff0   :  { %v6857_v52 = vadd.f32 %v2004_v51, %v1996_v50  ;;  %v2467_v50 = vld [vmem:[#allocation2 + $0xe] sm:$0x3] }
 0xff2   :  { %5953 = vtanh.f32 %v6857_v52 }
 0xff7   :  { %v5952_v53 = vpop.eup %5951 }
 0xff8   :  { %1906 = vrot.lane.b32.xlu0 %v5952_v53, %s6140_s25 }
 0xffc   :  { %v5954_v54 = vpop.eup %5953 }
 0xffd   :  { %2009 = vrot.lane.b32.xlu1 %v5954_v54, %s6136_s0 }
0x106a   :  { %v1907_v55 = vpop.permute.xlu0 %1906 }
0x106b   :  { %v1909_v56 = vmul.f32 %v5948_v41, %v1907_v55 }
0x106d   :  { %1911 = vrot.lane.b32.xlu0 %v1909_v56, %s6141_s26 }
0x106f   :  { %v2010_v57 = vpop.permute.xlu1 %2009 }
0x1070   :  { %v2012_v58 = vmul.f32 %v5950_v44, %v2010_v57 }
0x1072   :  { %2086 = vrot.lane.b32.xlu1 %v2012_v58, %s6137_s3 }
0x10df   :  { %v1912_v59 = vpop.permute.xlu0 %1911 }
0x10e0   :  { %v1914_v60 = vsel %vm634_vm3, %v1912_v59, 0.0  ;;  %5292 = vmatmul.mubr.msk.f32.vlgmr.msra.gmra.mrb[28].mxu1 %vm634_vm3, %v1912_v59 }
0x10e1   :  { %1916 = vst [vmem:[#allocation3 + $0x8] sm:$0x3] %v1914_v60  ;;  %5750 = vmatpush3.bf16.msra.mxu1 %v6589_v63  ;;  %5313 = vmatprep.mubr.msk.f32.mxu1 %vm6134_vm0, %v6135_v10 }
0x10e2   :  { %5751 = vmatprep.subr.bf16.mxu1 %v6133_v0 }
0x10e4   :  { %v2087_v61 = vpop.permute.xlu1 %2086 }
0x10e5   :  { %5753 = vmatpush3.bf16.msra.mxu1 %v6612_v7  ;;  %5303 = vmatmul.mubr.msk.f32.vlgmr.msra.gmra.mrb[32].mxu0 %vm535_vm2, %v2087_v61 }
0x10e6   :  { %5754 = vmatprep.subr.bf16.mxu1 %v6133_v0  ;;  %5317 = vmatpush3.msk.msra.mxu0 %vm637_vm1, %v6650_v25 }
0x10e7   :  { %5318 = vmatprep.mubr.msk.f32.mxu0 %vm6134_vm0, %v6135_v10  ;;  %5760 = vmatprep.subr.bf16.mxu0 %v6133_v0 }
0x10e8   :  { %5314 = vmatmul.mubr.msk.f32.vlgmr.msra.gmra.mrb[30].mxu1 %vm535_vm2, %v2087_v61 }
0x10e9   :  { %5756 = vmatpush3.bf16.msra.mxu1 %v6652_v26  ;;  %5329 = vmatprep.mubr.msk.f32.mxu1 %vm6134_vm0, %v6135_v10 }
0x10ea   :  { %5757 = vmatprep.subr.bf16.mxu1 %v6133_v0 }
0x10ed   :  { %5759 = vmatpush3.bf16.msra.mxu1 %v6665_v29 }
0x10ee   :  { %5343 = vmatprep.subr.mxu1 %v6135_v10 }
0x11b3   :  { %v2081_v62 = vpop.f32.mrb[28].mxu1 }
0x11b4   :  { %v5293_v1 = vpop.f32.mrb[29].mxu1 }
0x11b8   :  { %v2156_v2 = vpop.f32.mrb[32].mxu0 }
0x11b9   :  { %v2157_v3 = vadd.f32 %v2156_v2, %v2081_v62  ;;  %v5304_v4 = vpop.f32.mrb[33].mxu0 }
0x11bb   :  { %v2160_v5 = vadd.f32 %v6694_v36, %v2157_v3  ;;  %v2259_v8 = vpop.f32.mrb[30].mxu1 }
0x11bc   :  { %v2263_v9 = vadd.f32 %v2259_v8, %v2192_v6  ;;  %v5315_v11 = vpop.f32.mrb[31].mxu1 }
0x11bd   :  { %5955 = vtanh.f32 %v2160_v5  ;;  %v4718_v14 = vmul.f32 -1.442695, %v2160_v5 }
0x11be   :  { %5957 = vtanh.f32 %v2263_v9  ;;  %v4720_v15 = vmul.f32 -1.442695, %v2263_v9 }
0x11bf   :  { %5959 = vpow2.f32 %v4718_v14 }
0x11c0   :  { %5961 = vpow2.f32 %v4720_v15 }
0x11c7   :  { %v5956_v12 = vpop.eup %5955 }
0x11c8   :  { %v5958_v13 = vpop.eup %5957  ;;  %2170 = vrot.lane.b32.xlu0 %v5956_v12, %s6138_s23 }
0x11c9   :  { %2273 = vrot.lane.b32.xlu1 %v5958_v13, %s6136_s0  ;;  %v5960_v16 = vpop.eup %5959 }
0x11ca   :  { %v5962_v17 = vpop.eup %5961  ;;  %v2164_v18 = vadd.f32 1.0, %v5960_v16 }
0x11cb   :  { %v2267_v19 = vadd.f32 1.0, %v5962_v17 }
0x11cc   :  { %5963 = vrcp.f32 %v2164_v18 }
0x11cd   :  { %5965 = vrcp.f32 %v2267_v19 }
0x11d6   :  { %v5964_v20 = vpop.eup %5963 }
0x11d7   :  { %v5966_v22 = vpop.eup %5965  ;;  %v2168_v28 = vmul.f32 %v5964_v20, %v6853_v49 }
0x11d8   :  { %v2271_v30 = vmul.f32 %v5966_v22, %v6857_v52 }
0x123a   :  { %v2171_v21 = vpop.permute.xlu0 %2170 }
0x123b   :  { %v2274_v23 = vpop.permute.xlu1 %2273  ;;  %v2173_v24 = vmul.f32 %v5964_v20, %v2171_v21 }
0x123c   :  { %v2276_v27 = vmul.f32 %v5966_v22, %v2274_v23 }
0x123d   :  { %2175 = vrot.lane.b32.xlu0 %v2173_v24, %s6139_s24 }
0x123e   :  { %2278 = vrot.lane.b32.xlu1 %v2276_v27, %s6137_s3 }
0x12af   :  { %v2176_v31 = vpop.permute.xlu0 %2175 }
0x12b0   :  { %v2279_v32 = vpop.permute.xlu1 %2278  ;;  %v6892_v33 = vadd.f32 %v2176_v31, %v2168_v28  ;;  %v6969_v31 = vld [vmem:[%s7237_s6] ss:$0 sm:$0xff]  ;;  %s6142_s6 = smov [#allocation3]  }
0x12b1   :  { %v6894_v34 = vadd.f32 %v2279_v32, %v2271_v30  ;;  %s4672_s29 = sshll.u32 %s6142_s6, 4  ;;  %s4673_s29 = int_to_ptr.vmem [resolvable:$true] %s4672_s29 }
0x12b2   :  { %5967 = vtanh.f32 %v6892_v33  ;;  %s6109_s30 = scalar_lea.vmem %s4673_s29, 480  ;;  %p6114_p1 = scmp.lt.s32.totalorder %s4673_s29, %s4673_s29 }
0x12b3   :  { %5969 = vtanh.f32 %v6894_v34  ;;  %p6110_p0 = scmp.ne.s32.totalorder %s4673_s29, %s6109_s30  ;;  %p6115_p2 = scmp.lt.s32.totalorder %s6109_s30, %s6109_s30 }
0x12b5   :  { %p6116_p3 = por %p6115_p2, %p6114_p1 }
0x12b7   :  { %p6117_p4 = pnand %p6116_p3, %p6110_p0 }
0x12bc   :  { %v5968_v35 = vpop.eup %5967 }
0x12bd   :  { %v5970_v37 = vpop.eup %5969  ;;  %2181 = vrot.lane.b32.xlu0 %v5968_v35, %s6140_s25 }
0x12be   :  { %2284 = vrot.lane.b32.xlu1 %v5970_v37, %s6136_s0 }
0x132f   :  { %v2182_v38 = vpop.permute.xlu0 %2181 }
0x1330   :  { %v2285_v39 = vpop.permute.xlu1 %2284  ;;  %v2184_v40 = vmul.f32 %v5964_v20, %v2182_v38 }
0x1331   :  { %v2287_v41 = vmul.f32 %v5966_v22, %v2285_v39  ;;  %v6952_v22 = vld [vmem:[%s7236_s5] sm:$0x1f] }
0x1332   :  { %2186 = vrot.lane.b32.xlu0 %v2184_v40, %s6141_s26 }
0x1333   :  { %2361 = vrot.lane.b32.xlu1 %v2287_v41, %s6137_s3 }
0x13a4   :  { %v2187_v42 = vpop.permute.xlu0 %2186 }
0x13a5   :  { %v2362_v43 = vpop.permute.xlu1 %2361  ;;  %v2189_v44 = vsel %vm634_vm3, %v2187_v42, 0.0  ;;  %5319 = vmatmul.mubr.msk.f32.vlgmr.msra.gmra.mrb[34].mxu0 %vm634_vm3, %v2187_v42 }
0x13a6   :  { %2191 = vst [vmem:[#allocation3 + $0xa] sm:$0x3] %v2189_v44  ;;  %5330 = vmatmul.mubr.msk.f32.vlgmr.msra.gmra.mrb[32].mxu1 %vm535_vm2, %v2362_v43  ;;  %5762 = vmatpush3.bf16.msra.mxu0 %v6589_v63 }
0x13a7   :  { %5763 = vmatprep.subr.bf16.mxu0 %v6133_v0  ;;  %5340 = vmatprep.mubr.msk.f32.mxu0 %vm6134_vm0, %v6135_v10 }
0x13a8   :  { %5344 = vmatpush3.msk.msra.mxu1 %vm637_vm1, %v6650_v25  ;;  %5345 = vmatprep.mubr.msk.f32.mxu1 %vm6134_vm0, %v6135_v10 }
0x13a9   :  { %5772 = vmatprep.subr.bf16.mxu1 %v6133_v0 }
0x13aa   :  { %5765 = vmatpush3.bf16.msra.mxu0 %v6612_v7 }
0x13ab   :  { %5766 = vmatprep.subr.bf16.mxu0 %v6133_v0 }
0x13ad   :  { %5341 = vmatmul.mubr.msk.f32.vlgmr.msra.gmra.mrb[36].mxu0 %vm535_vm2, %v2362_v43 }
0x13ae   :  { %5768 = vmatpush3.bf16.msra.mxu0 %v6652_v26  ;;  %5356 = vmatprep.mubr.msk.f32.mxu0 %vm6134_vm0, %v6135_v10 }
0x13af   :  { %5769 = vmatprep.subr.bf16.mxu0 %v6133_v0 }
0x13b2   :  { %5771 = vmatpush3.bf16.msra.mxu0 %v6665_v29 }
0x13b3   :  { %5370 = vmatprep.subr.mxu0 %v6135_v10 }
0x1478   :  { %v2356_v25 = vpop.f32.mrb[34].mxu0 }
0x1479   :  { %v2431_v45 = vpop.f32.mrb[32].mxu1  ;;  %v5320_v46 = vpop.f32.mrb[35].mxu0 }
0x147a   :  { %v2432_v47 = vadd.f32 %v2431_v45, %v2356_v25  ;;  %v5331_v48 = vpop.f32.mrb[33].mxu1 }
0x147c   :  { %v2435_v49 = vadd.f32 %v6694_v36, %v2432_v47 }
0x147e   :  { %5971 = vtanh.f32 %v2435_v49  ;;  %v4724_v56 = vmul.f32 -1.442695, %v2435_v49 }
0x1480   :  { %v2534_v51 = vpop.f32.mrb[36].mxu0 }
0x1481   :  { %v2538_v52 = vadd.f32 %v2534_v51, %v2467_v50  ;;  %v5342_v53 = vpop.f32.mrb[37].mxu0 }
0x1483   :  { %5973 = vtanh.f32 %v2538_v52  ;;  %v4726_v57 = vmul.f32 -1.442695, %v2538_v52 }
0x1484   :  { %5975 = vpow2.f32 %v4724_v56 }
0x1485   :  { %5977 = vpow2.f32 %v4726_v57 }
0x1488   :  { %v5972_v54 = vpop.eup %5971 }
0x1489   :  { %2445 = vrot.lane.b32.xlu0 %v5972_v54, %s6138_s23 }
0x148d   :  { %v5974_v55 = vpop.eup %5973 }
0x148e   :  { %2548 = vrot.lane.b32.xlu1 %v5974_v55, %s6136_s0  ;;  %v5976_v58 = vpop.eup %5975 }
0x148f   :  { %v2439_v59 = vadd.f32 1.0, %v5976_v58  ;;  %v5978_v60 = vpop.eup %5977 }
0x1490   :  { %v2542_v36 = vadd.f32 1.0, %v5978_v60 }
0x1491   :  { %5979 = vrcp.f32 %v2439_v59 }
0x1492   :  { %5981 = vrcp.f32 %v2542_v36 }
0x149b   :  { %v5980_v61 = vpop.eup %5979 }
0x149c   :  { %v5982_v2 = vpop.eup %5981  ;;  %v2443_v5 = vmul.f32 %v5980_v61, %v6892_v33  ;;  %v2742_v33 = vld [vmem:[#allocation2 + $0x10] sm:$0x3] }
0x149d   :  { %v2546_v9 = vmul.f32 %v5982_v2, %v6894_v34 }
0x14fb   :  { %v2446_v62 = vpop.permute.xlu0 %2445 }
0x14fc   :  { %v2448_v1 = vmul.f32 %v5980_v61, %v2446_v62 }
0x14fe   :  { %2450 = vrot.lane.b32.xlu0 %v2448_v1, %s6139_s24 }
0x1500   :  { %v2549_v3 = vpop.permute.xlu1 %2548 }
0x1501   :  { %v2551_v4 = vmul.f32 %v5982_v2, %v2549_v3 }
0x1503   :  { %2553 = vrot.lane.b32.xlu1 %v2551_v4, %s6137_s3 }
0x1570   :  { %v2451_v6 = vpop.permute.xlu0 %2450 }
0x1571   :  { %v6929_v8 = vadd.f32 %v2451_v6, %v2443_v5 }
0x1573   :  { %5983 = vtanh.f32 %v6929_v8 }
0x1575   :  { %v2554_v11 = vpop.permute.xlu1 %2553 }
0x1576   :  { %v6933_v12 = vadd.f32 %v2554_v11, %v2546_v9  ;;  %v3017_v11 = vld [vmem:[#allocation2 + $0x12] sm:$0x3] }
0x1578   :  { %5985 = vtanh.f32 %v6933_v12 }
0x157d   :  { %v5984_v13 = vpop.eup %5983 }
0x157e   :  { %2456 = vrot.lane.b32.xlu0 %v5984_v13, %s6140_s25 }
0x1582   :  { %v5986_v14 = vpop.eup %5985 }
0x1583   :  { %2559 = vrot.lane.b32.xlu1 %v5986_v14, %s6136_s0 }
0x15f0   :  { %v2457_v15 = vpop.permute.xlu0 %2456 }
0x15f1   :  { %v2459_v16 = vmul.f32 %v5980_v61, %v2457_v15 }
0x15f3   :  { %2461 = vrot.lane.b32.xlu0 %v2459_v16, %s6141_s26 }
0x15f5   :  { %v2560_v17 = vpop.permute.xlu1 %2559 }
0x15f6   :  { %v2562_v18 = vmul.f32 %v5982_v2, %v2560_v17 }
0x15f8   :  { %2636 = vrot.lane.b32.xlu1 %v2562_v18, %s6137_s3 }
0x1665   :  { %v2462_v19 = vpop.permute.xlu0 %2461 }
0x1666   :  { %v2464_v20 = vsel %vm634_vm3, %v2462_v19, 0.0  ;;  %5346 = vmatmul.mubr.msk.f32.vlgmr.msra.gmra.mrb[34].mxu1 %vm634_vm3, %v2462_v19 }
0x1667   :  { %2466 = vst [vmem:[#allocation3 + $0xc] sm:$0x3] %v2464_v20  ;;  %5774 = vmatpush3.bf16.msra.mxu1 %v6589_v63  ;;  %5367 = vmatprep.mubr.msk.f32.mxu1 %vm6134_vm0, %v6135_v10 }
0x1668   :  { %5775 = vmatprep.subr.bf16.mxu1 %v6133_v0 }
0x166a   :  { %v2637_v21 = vpop.permute.xlu1 %2636 }
0x166b   :  { %5777 = vmatpush3.bf16.msra.mxu1 %v6612_v7  ;;  %5357 = vmatmul.mubr.msk.f32.vlgmr.msra.gmra.mrb[38].mxu0 %vm535_vm2, %v2637_v21 }
0x166c   :  { %5778 = vmatprep.subr.bf16.mxu1 %v6133_v0  ;;  %5371 = vmatpush3.msk.msra.mxu0 %vm637_vm1, %v6952_v22 }
0x166d   :  { %5372 = vmatprep.mubr.msk.f32.mxu0 %vm6134_vm0, %v6135_v10  ;;  %5784 = vmatprep.subr.bf16.mxu0 %v6133_v0 }
0x166e   :  { %5368 = vmatmul.mubr.msk.f32.vlgmr.msra.gmra.mrb[36].mxu1 %vm535_vm2, %v2637_v21 }
0x166f   :  { %5780 = vmatpush3.bf16.msra.mxu1 %v6652_v26  ;;  %5383 = vmatprep.mubr.msk.f32.mxu1 %vm6134_vm0, %v6135_v10 }
0x1670   :  { %5781 = vmatprep.subr.bf16.mxu1 %v6133_v0 }
0x1673   :  { %5783 = vmatpush3.bf16.msra.mxu1 %v6665_v29 }
0x1674   :  { %5397 = vmatprep.subr.mxu1 %v6135_v10 }
0x1739   :  { %v2631_v23 = vpop.f32.mrb[34].mxu1 }
0x173a   :  { %v5347_v24 = vpop.f32.mrb[35].mxu1 }
0x173e   :  { %v2706_v27 = vpop.f32.mrb[38].mxu0 }
0x173f   :  { %v2707_v28 = vadd.f32 %v2706_v27, %v2631_v23  ;;  %v5358_v30 = vpop.f32.mrb[39].mxu0 }
0x1741   :  { %v2710_v32 = vadd.f32 %v6969_v31, %v2707_v28  ;;  %v2809_v34 = vpop.f32.mrb[36].mxu1 }
0x1742   :  { %v2813_v35 = vadd.f32 %v2809_v34, %v2742_v33  ;;  %v5369_v37 = vpop.f32.mrb[37].mxu1 }
0x1743   :  { %5987 = vtanh.f32 %v2710_v32  ;;  %v4730_v40 = vmul.f32 -1.442695, %v2710_v32 }
0x1744   :  { %5989 = vtanh.f32 %v2813_v35  ;;  %v4732_v41 = vmul.f32 -1.442695, %v2813_v35 }
0x1745   :  { %5991 = vpow2.f32 %v4730_v40 }
0x1746   :  { %5993 = vpow2.f32 %v4732_v41 }
0x174d   :  { %v5988_v38 = vpop.eup %5987 }
0x174e   :  { %v5990_v39 = vpop.eup %5989  ;;  %2720 = vrot.lane.b32.xlu0 %v5988_v38, %s6138_s23 }
0x174f   :  { %2823 = vrot.lane.b32.xlu1 %v5990_v39, %s6136_s0  ;;  %v5992_v42 = vpop.eup %5991 }
0x1750   :  { %v5994_v43 = vpop.eup %5993  ;;  %v2714_v44 = vadd.f32 1.0, %v5992_v42 }
0x1751   :  { %v2817_v25 = vadd.f32 1.0, %v5994_v43 }
0x1752   :  { %5995 = vrcp.f32 %v2714_v44 }
0x1753   :  { %5997 = vrcp.f32 %v2817_v25 }
0x175c   :  { %v5996_v45 = vpop.eup %5995 }
0x175d   :  { %v5998_v47 = vpop.eup %5997  ;;  %v2718_v51 = vmul.f32 %v5996_v45, %v6929_v8 }
0x175e   :  { %v2821_v52 = vmul.f32 %v5998_v47, %v6933_v12 }
0x17c0   :  { %v2721_v46 = vpop.permute.xlu0 %2720 }
0x17c1   :  { %v2824_v48 = vpop.permute.xlu1 %2823  ;;  %v2723_v49 = vmul.f32 %v5996_v45, %v2721_v46 }
0x17c2   :  { %v2826_v50 = vmul.f32 %v5998_v47, %v2824_v48 }
0x17c3   :  { %2725 = vrot.lane.b32.xlu0 %v2723_v49, %s6139_s24 }
0x17c4   :  { %2828 = vrot.lane.b32.xlu1 %v2826_v50, %s6137_s3 }
0x1835   :  { %v2726_v53 = vpop.permute.xlu0 %2725 }
0x1836   :  { %v2829_v54 = vpop.permute.xlu1 %2828  ;;  %v6978_v55 = vadd.f32 %v2726_v53, %v2718_v51 }
0x1837   :  { %v6980_v56 = vadd.f32 %v2829_v54, %v2821_v52 }
0x1838   :  { %5999 = vtanh.f32 %v6978_v55 }
0x1839   :  { %6001 = vtanh.f32 %v6980_v56 }
0x1842   :  { %v6000_v57 = vpop.eup %5999 }
0x1843   :  { %v6002_v58 = vpop.eup %6001  ;;  %2731 = vrot.lane.b32.xlu0 %v6000_v57, %s6140_s25 }
0x1844   :  { %2834 = vrot.lane.b32.xlu1 %v6002_v58, %s6136_s0 }
0x18b5   :  { %v2732_v59 = vpop.permute.xlu0 %2731 }
0x18b6   :  { %v2835_v60 = vpop.permute.xlu1 %2834  ;;  %v2734_v36 = vmul.f32 %v5996_v45, %v2732_v59 }
0x18b7   :  { %v2837_v61 = vmul.f32 %v5998_v47, %v2835_v60 }
0x18b8   :  { %2736 = vrot.lane.b32.xlu0 %v2734_v36, %s6141_s26 }
0x18b9   :  { %2911 = vrot.lane.b32.xlu1 %v2837_v61, %s6137_s3 }
0x192a   :  { %v2737_v62 = vpop.permute.xlu0 %2736 }
0x192b   :  { %v2912_v1 = vpop.permute.xlu1 %2911  ;;  %v2739_v2 = vsel %vm634_vm3, %v2737_v62, 0.0  ;;  %5373 = vmatmul.mubr.msk.f32.vlgmr.msra.gmra.mrb[40].mxu0 %vm634_vm3, %v2737_v62 }
0x192c   :  { %2741 = vst [vmem:[#allocation3 + $0xe] sm:$0x3] %v2739_v2  ;;  %5384 = vmatmul.mubr.msk.f32.vlgmr.msra.gmra.mrb[38].mxu1 %vm535_vm2, %v2912_v1  ;;  %5786 = vmatpush3.bf16.msra.mxu0 %v6589_v63 }
0x192d   :  { %5787 = vmatprep.subr.bf16.mxu0 %v6133_v0  ;;  %5394 = vmatprep.mubr.msk.f32.mxu0 %vm6134_vm0, %v6135_v10 }
0x192e   :  { %5398 = vmatpush3.msk.msra.mxu1 %vm637_vm1, %v6952_v22  ;;  %5399 = vmatprep.mubr.msk.f32.mxu1 %vm6134_vm0, %v6135_v10 }
0x192f   :  { %5796 = vmatprep.subr.bf16.mxu1 %v6133_v0 }
0x1930   :  { %5789 = vmatpush3.bf16.msra.mxu0 %v6612_v7 }
0x1931   :  { %5790 = vmatprep.subr.bf16.mxu0 %v6133_v0 }
0x1933   :  { %5395 = vmatmul.mubr.msk.f32.vlgmr.msra.gmra.mrb[42].mxu0 %vm535_vm2, %v2912_v1 }
0x1934   :  { %5792 = vmatpush3.bf16.msra.mxu0 %v6652_v26  ;;  %5410 = vmatprep.mubr.msk.f32.mxu0 %vm6134_vm0, %v6135_v10 }
0x1935   :  { %5793 = vmatprep.subr.bf16.mxu0 %v6133_v0 }
0x1938   :  { %5795 = vmatpush3.bf16.msra.mxu0 %v6665_v29 }
0x1939   :  { %5424 = vmatprep.subr.mxu0 %v6135_v10 }
0x19fe   :  { %v2906_v3 = vpop.f32.mrb[40].mxu0 }
0x19ff   :  { %v2981_v4 = vpop.f32.mrb[38].mxu1  ;;  %v5374_v5 = vpop.f32.mrb[41].mxu0 }
0x1a00   :  { %v2982_v6 = vadd.f32 %v2981_v4, %v2906_v3  ;;  %v5385_v8 = vpop.f32.mrb[39].mxu1 }
0x1a02   :  { %v2985_v9 = vadd.f32 %v6969_v31, %v2982_v6 }
0x1a04   :  { %6003 = vtanh.f32 %v2985_v9  ;;  %v4736_v17 = vmul.f32 -1.442695, %v2985_v9 }
0x1a06   :  { %v3084_v12 = vpop.f32.mrb[42].mxu0 }
0x1a07   :  { %v3088_v13 = vadd.f32 %v3084_v12, %v3017_v11  ;;  %v5396_v14 = vpop.f32.mrb[43].mxu0 }
0x1a09   :  { %6005 = vtanh.f32 %v3088_v13  ;;  %v4738_v18 = vmul.f32 -1.442695, %v3088_v13 }
0x1a0a   :  { %6007 = vpow2.f32 %v4736_v17 }
0x1a0b   :  { %6009 = vpow2.f32 %v4738_v18 }
0x1a0e   :  { %v6004_v15 = vpop.eup %6003 }
0x1a0f   :  { %2995 = vrot.lane.b32.xlu0 %v6004_v15, %s6138_s23 }
0x1a13   :  { %v6006_v16 = vpop.eup %6005 }
0x1a14   :  { %3098 = vrot.lane.b32.xlu1 %v6006_v16, %s6136_s0  ;;  %v6008_v19 = vpop.eup %6007 }
0x1a15   :  { %v2989_v20 = vadd.f32 1.0, %v6008_v19  ;;  %v6010_v21 = vpop.eup %6009 }
0x1a16   :  { %v3092_v23 = vadd.f32 1.0, %v6010_v21 }
0x1a17   :  { %6011 = vrcp.f32 %v2989_v20 }
0x1a18   :  { %6013 = vrcp.f32 %v3092_v23 }
0x1a21   :  { %v6012_v24 = vpop.eup %6011 }
0x1a22   :  { %v6014_v30 = vpop.eup %6013  ;;  %v2993_v34 = vmul.f32 %v6012_v24, %v6978_v55  ;;  %v3292_v55 = vld [vmem:[#allocation2 + $0x14] sm:$0x3] }
0x1a23   :  { %v3096_v38 = vmul.f32 %v6014_v30, %v6980_v56 }
0x1a81   :  { %v2996_v27 = vpop.permute.xlu0 %2995 }
0x1a82   :  { %v2998_v28 = vmul.f32 %v6012_v24, %v2996_v27 }
0x1a84   :  { %3000 = vrot.lane.b32.xlu0 %v2998_v28, %s6139_s24 }
0x1a86   :  { %v3099_v32 = vpop.permute.xlu1 %3098 }
0x1a87   :  { %v3101_v33 = vmul.f32 %v6014_v30, %v3099_v32 }
0x1a89   :  { %3103 = vrot.lane.b32.xlu1 %v3101_v33, %s6137_s3 }
0x1af6   :  { %v3001_v35 = vpop.permute.xlu0 %3000 }
0x1af7   :  { %v7015_v37 = vadd.f32 %v3001_v35, %v2993_v34 }
0x1af9   :  { %6015 = vtanh.f32 %v7015_v37 }
0x1afb   :  { %v3104_v39 = vpop.permute.xlu1 %3103 }
0x1afc   :  { %v7019_v40 = vadd.f32 %v3104_v39, %v3096_v38  ;;  %v3567_v39 = vld [vmem:[#allocation2 + $0x16] sm:$0x3] }
0x1afe   :  { %6017 = vtanh.f32 %v7019_v40 }
0x1b03   :  { %v6016_v41 = vpop.eup %6015 }
0x1b04   :  { %3006 = vrot.lane.b32.xlu0 %v6016_v41, %s6140_s25 }
0x1b08   :  { %v6018_v42 = vpop.eup %6017 }
0x1b09   :  { %3109 = vrot.lane.b32.xlu1 %v6018_v42, %s6136_s0 }
0x1b76   :  { %v3007_v43 = vpop.permute.xlu0 %3006 }
0x1b77   :  { %v3009_v44 = vmul.f32 %v6012_v24, %v3007_v43 }
0x1b79   :  { %3011 = vrot.lane.b32.xlu0 %v3009_v44, %s6141_s26 }
0x1b7b   :  { %v3110_v25 = vpop.permute.xlu1 %3109 }
0x1b7c   :  { %v3112_v45 = vmul.f32 %v6014_v30, %v3110_v25 }
0x1b7e   :  { %3186 = vrot.lane.b32.xlu1 %v3112_v45, %s6137_s3 }
0x1beb   :  { %v3012_v46 = vpop.permute.xlu0 %3011 }
0x1bec   :  { %v3014_v47 = vsel %vm634_vm3, %v3012_v46, 0.0  ;;  %5400 = vmatmul.mubr.msk.f32.vlgmr.msra.gmra.mrb[40].mxu1 %vm634_vm3, %v3012_v46 }
0x1bed   :  { %3016 = vst [vmem:[#allocation3 + $0x10] sm:$0x3] %v3014_v47  ;;  %5798 = vmatpush3.bf16.msra.mxu1 %v6589_v63  ;;  %5421 = vmatprep.mubr.msk.f32.mxu1 %vm6134_vm0, %v6135_v10 }
0x1bee   :  { %5799 = vmatprep.subr.bf16.mxu1 %v6133_v0 }
0x1bf0   :  { %v3187_v48 = vpop.permute.xlu1 %3186 }
0x1bf1   :  { %5801 = vmatpush3.bf16.msra.mxu1 %v6612_v7  ;;  %5411 = vmatmul.mubr.msk.f32.vlgmr.msra.gmra.mrb[44].mxu0 %vm535_vm2, %v3187_v48 }
0x1bf2   :  { %5802 = vmatprep.subr.bf16.mxu1 %v6133_v0  ;;  %5425 = vmatpush3.msk.msra.mxu0 %vm637_vm1, %v6952_v22 }
0x1bf3   :  { %5426 = vmatprep.mubr.msk.f32.mxu0 %vm6134_vm0, %v6135_v10  ;;  %5808 = vmatprep.subr.bf16.mxu0 %v6133_v0 }
0x1bf4   :  { %5422 = vmatmul.mubr.msk.f32.vlgmr.msra.gmra.mrb[42].mxu1 %vm535_vm2, %v3187_v48 }
0x1bf5   :  { %5804 = vmatpush3.bf16.msra.mxu1 %v6652_v26  ;;  %5437 = vmatprep.mubr.msk.f32.mxu1 %vm6134_vm0, %v6135_v10 }
0x1bf6   :  { %5805 = vmatprep.subr.bf16.mxu1 %v6133_v0 }
0x1bf9   :  { %5807 = vmatpush3.bf16.msra.mxu1 %v6665_v29 }
0x1bfa   :  { %5451 = vmatprep.subr.mxu1 %v6135_v10 }
0x1cbf   :  { %v3181_v49 = vpop.f32.mrb[40].mxu1 }
0x1cc0   :  { %v5401_v50 = vpop.f32.mrb[41].mxu1 }
0x1cc4   :  { %v3256_v51 = vpop.f32.mrb[44].mxu0 }
0x1cc5   :  { %v3257_v52 = vadd.f32 %v3256_v51, %v3181_v49  ;;  %v5412_v53 = vpop.f32.mrb[45].mxu0 }
0x1cc7   :  { %v3260_v54 = vadd.f32 %v6969_v31, %v3257_v52  ;;  %v3359_v56 = vpop.f32.mrb[42].mxu1 }
0x1cc8   :  { %v3363_v57 = vadd.f32 %v3359_v56, %v3292_v55  ;;  %v5423_v58 = vpop.f32.mrb[43].mxu1 }
0x1cc9   :  { %6019 = vtanh.f32 %v3260_v54  ;;  %v4742_v36 = vmul.f32 -1.442695, %v3260_v54 }
0x1cca   :  { %6021 = vtanh.f32 %v3363_v57  ;;  %v4744_v61 = vmul.f32 -1.442695, %v3363_v57 }
0x1ccb   :  { %6023 = vpow2.f32 %v4742_v36 }
0x1ccc   :  { %6025 = vpow2.f32 %v4744_v61 }
0x1cd3   :  { %v6020_v59 = vpop.eup %6019 }
0x1cd4   :  { %v6022_v60 = vpop.eup %6021  ;;  %3270 = vrot.lane.b32.xlu0 %v6020_v59, %s6138_s23 }
0x1cd5   :  { %3373 = vrot.lane.b32.xlu1 %v6022_v60, %s6136_s0  ;;  %v6024_v62 = vpop.eup %6023 }
0x1cd6   :  { %v6026_v1 = vpop.eup %6025  ;;  %v3264_v2 = vadd.f32 1.0, %v6024_v62 }
0x1cd7   :  { %v3367_v3 = vadd.f32 1.0, %v6026_v1 }
0x1cd8   :  { %6027 = vrcp.f32 %v3264_v2 }
0x1cd9   :  { %6029 = vrcp.f32 %v3367_v3 }
0x1ce2   :  { %v6028_v4 = vpop.eup %6027 }
0x1ce3   :  { %v6030_v6 = vpop.eup %6029  ;;  %v3268_v12 = vmul.f32 %v6028_v4, %v7015_v37 }
0x1ce4   :  { %v3371_v13 = vmul.f32 %v6030_v6, %v7019_v40 }
0x1d46   :  { %v3271_v5 = vpop.permute.xlu0 %3270 }
0x1d47   :  { %v3374_v8 = vpop.permute.xlu1 %3373  ;;  %v3273_v9 = vmul.f32 %v6028_v4, %v3271_v5 }
0x1d48   :  { %v3376_v11 = vmul.f32 %v6030_v6, %v3374_v8 }
0x1d49   :  { %3275 = vrot.lane.b32.xlu0 %v3273_v9, %s6139_s24 }
0x1d4a   :  { %3378 = vrot.lane.b32.xlu1 %v3376_v11, %s6137_s3 }
0x1dbb   :  { %v3276_v14 = vpop.permute.xlu0 %3275 }
0x1dbc   :  { %v3379_v15 = vpop.permute.xlu1 %3378  ;;  %v7054_v16 = vadd.f32 %v3276_v14, %v3268_v12 }
0x1dbd   :  { %v7056_v17 = vadd.f32 %v3379_v15, %v3371_v13 }
0x1dbe   :  { %6031 = vtanh.f32 %v7054_v16 }
0x1dbf   :  { %6033 = vtanh.f32 %v7056_v17 }
0x1dc8   :  { %v6032_v18 = vpop.eup %6031 }
0x1dc9   :  { %v6034_v19 = vpop.eup %6033  ;;  %3281 = vrot.lane.b32.xlu0 %v6032_v18, %s6140_s25 }
0x1dca   :  { %3384 = vrot.lane.b32.xlu1 %v6034_v19, %s6136_s0 }
0x1e3b   :  { %v3282_v20 = vpop.permute.xlu0 %3281 }
0x1e3c   :  { %v3385_v21 = vpop.permute.xlu1 %3384  ;;  %v3284_v23 = vmul.f32 %v6028_v4, %v3282_v20 }
0x1e3d   :  { %v3387_v24 = vmul.f32 %v6030_v6, %v3385_v21 }
0x1e3e   :  { %3286 = vrot.lane.b32.xlu0 %v3284_v23, %s6141_s26 }
0x1e3f   :  { %3461 = vrot.lane.b32.xlu1 %v3387_v24, %s6137_s3 }
0x1eb0   :  { %v3287_v27 = vpop.permute.xlu0 %3286 }
0x1eb1   :  { %v3462_v28 = vpop.permute.xlu1 %3461  ;;  %v3289_v30 = vsel %vm634_vm3, %v3287_v27, 0.0  ;;  %5427 = vmatmul.mubr.msk.f32.vlgmr.msra.gmra.mrb[46].mxu0 %vm634_vm3, %v3287_v27 }
0x1eb2   :  { %3291 = vst [vmem:[#allocation3 + $0x12] sm:$0x3] %v3289_v30  ;;  %5438 = vmatmul.mubr.msk.f32.vlgmr.msra.gmra.mrb[44].mxu1 %vm535_vm2, %v3462_v28  ;;  %5810 = vmatpush3.bf16.msra.mxu0 %v6589_v63 }
0x1eb3   :  { %5811 = vmatprep.subr.bf16.mxu0 %v6133_v0  ;;  %5448 = vmatprep.mubr.msk.f32.mxu0 %vm6134_vm0, %v6135_v10 }
0x1eb4   :  { %5452 = vmatpush3.msk.msra.mxu1 %vm637_vm1, %v6952_v22  ;;  %5453 = vmatprep.mubr.msk.f32.mxu1 %vm6134_vm0, %v6135_v10 }
0x1eb5   :  { %5820 = vmatprep.subr.bf16.mxu1 %v6133_v0 }
0x1eb6   :  { %5813 = vmatpush3.bf16.msra.mxu0 %v6612_v7 }
0x1eb7   :  { %5814 = vmatprep.subr.bf16.mxu0 %v6133_v0 }
0x1eb9   :  { %5449 = vmatmul.mubr.msk.f32.vlgmr.msra.gmra.mrb[48].mxu0 %vm535_vm2, %v3462_v28 }
0x1eba   :  { %5816 = vmatpush3.bf16.msra.mxu0 %v6652_v26  ;;  %5464 = vmatprep.mubr.msk.f32.mxu0 %vm6134_vm0, %v6135_v10 }
0x1ebb   :  { %5817 = vmatprep.subr.bf16.mxu0 %v6133_v0 }
0x1ebe   :  { %5819 = vmatpush3.bf16.msra.mxu0 %v6665_v29 }
0x1ebf   :  { %5478 = vmatprep.subr.mxu0 %v6135_v10 }
0x1f84   :  { %v3456_v32 = vpop.f32.mrb[46].mxu0 }
0x1f85   :  { %v3531_v33 = vpop.f32.mrb[44].mxu1  ;;  %v5428_v34 = vpop.f32.mrb[47].mxu0 }
0x1f86   :  { %v3532_v35 = vadd.f32 %v3531_v33, %v3456_v32  ;;  %v5439_v37 = vpop.f32.mrb[45].mxu1 }
0x1f88   :  { %v3535_v38 = vadd.f32 %v6969_v31, %v3532_v35 }
0x1f8a   :  { %6035 = vtanh.f32 %v3535_v38  ;;  %v4748_v25 = vmul.f32 -1.442695, %v3535_v38 }
0x1f8c   :  { %v3634_v40 = vpop.f32.mrb[48].mxu0 }
0x1f8d   :  { %v3638_v41 = vadd.f32 %v3634_v40, %v3567_v39  ;;  %v5450_v42 = vpop.f32.mrb[49].mxu0 }
0x1f8f   :  { %6037 = vtanh.f32 %v3638_v41  ;;  %v4750_v45 = vmul.f32 -1.442695, %v3638_v41 }
0x1f90   :  { %6039 = vpow2.f32 %v4748_v25 }
0x1f91   :  { %6041 = vpow2.f32 %v4750_v45 }
0x1f94   :  { %v6036_v43 = vpop.eup %6035 }
0x1f95   :  { %3545 = vrot.lane.b32.xlu0 %v6036_v43, %s6138_s23 }
0x1f99   :  { %v6038_v44 = vpop.eup %6037 }
0x1f9a   :  { %3648 = vrot.lane.b32.xlu1 %v6038_v44, %s6136_s0  ;;  %v6040_v46 = vpop.eup %6039 }
0x1f9b   :  { %v3539_v47 = vadd.f32 1.0, %v6040_v46  ;;  %v6042_v48 = vpop.eup %6041 }
0x1f9c   :  { %v3642_v49 = vadd.f32 1.0, %v6042_v48 }
0x1f9d   :  { %6043 = vrcp.f32 %v3539_v47 }
0x1f9e   :  { %6045 = vrcp.f32 %v3642_v49 }
0x1fa7   :  { %v6044_v50 = vpop.eup %6043 }
0x1fa8   :  { %v6046_v53 = vpop.eup %6045  ;;  %v3543_v56 = vmul.f32 %v6044_v50, %v7054_v16  ;;  %v3842_v16 = vld [vmem:[#allocation2 + $0x18] sm:$0x3] }
0x1fa9   :  { %v3646_v59 = vmul.f32 %v6046_v53, %v7056_v17 }
0x2007   :  { %v3546_v51 = vpop.permute.xlu0 %3545 }
0x2008   :  { %v3548_v52 = vmul.f32 %v6044_v50, %v3546_v51 }
0x200a   :  { %3550 = vrot.lane.b32.xlu0 %v3548_v52, %s6139_s24 }
0x200c   :  { %v3649_v54 = vpop.permute.xlu1 %3648 }
0x200d   :  { %v3651_v55 = vmul.f32 %v6046_v53, %v3649_v54 }
0x200f   :  { %3653 = vrot.lane.b32.xlu1 %v3651_v55, %s6137_s3 }
0x207c   :  { %v3551_v57 = vpop.permute.xlu0 %3550 }
0x207d   :  { %v7091_v58 = vadd.f32 %v3551_v57, %v3543_v56 }
0x207f   :  { %6047 = vtanh.f32 %v7091_v58 }
0x2081   :  { %v3654_v60 = vpop.permute.xlu1 %3653 }
0x2082   :  { %v7095_v36 = vadd.f32 %v3654_v60, %v3646_v59  ;;  %v4117_v60 = vld [vmem:[#allocation2 + $0x1a] sm:$0x3] }
0x2084   :  { %6049 = vtanh.f32 %v7095_v36 }
0x2089   :  { %v6048_v61 = vpop.eup %6047 }
0x208a   :  { %3556 = vrot.lane.b32.xlu0 %v6048_v61, %s6140_s25 }
0x208e   :  { %v6050_v62 = vpop.eup %6049 }
0x208f   :  { %3659 = vrot.lane.b32.xlu1 %v6050_v62, %s6136_s0 }
0x20fc   :  { %v3557_v1 = vpop.permute.xlu0 %3556 }
0x20fd   :  { %v3559_v2 = vmul.f32 %v6044_v50, %v3557_v1 }
0x20ff   :  { %3561 = vrot.lane.b32.xlu0 %v3559_v2, %s6141_s26 }
0x2101   :  { %v3660_v3 = vpop.permute.xlu1 %3659 }
0x2102   :  { %v3662_v4 = vmul.f32 %v6046_v53, %v3660_v3 }
0x2104   :  { %3736 = vrot.lane.b32.xlu1 %v3662_v4, %s6137_s3 }
0x2171   :  { %v3562_v5 = vpop.permute.xlu0 %3561 }
0x2172   :  { %v3564_v6 = vsel %vm634_vm3, %v3562_v5, 0.0  ;;  %5454 = vmatmul.mubr.msk.f32.vlgmr.msra.gmra.mrb[46].mxu1 %vm634_vm3, %v3562_v5 }
0x2173   :  { %3566 = vst [vmem:[#allocation3 + $0x14] sm:$0x3] %v3564_v6  ;;  %5822 = vmatpush3.bf16.msra.mxu1 %v6589_v63  ;;  %5475 = vmatprep.mubr.msk.f32.mxu1 %vm6134_vm0, %v6135_v10 }
0x2174   :  { %5823 = vmatprep.subr.bf16.mxu1 %v6133_v0 }
0x2176   :  { %v3737_v8 = vpop.permute.xlu1 %3736 }
0x2177   :  { %5825 = vmatpush3.bf16.msra.mxu1 %v6612_v7  ;;  %5465 = vmatmul.mubr.msk.f32.vlgmr.msra.gmra.mrb[50].mxu0 %vm535_vm2, %v3737_v8 }
0x2178   :  { %5826 = vmatprep.subr.bf16.mxu1 %v6133_v0  ;;  %5479 = vmatpush3.msk.msra.mxu0 %vm637_vm1, %v6952_v22 }
0x2179   :  { %5480 = vmatprep.mubr.msk.f32.mxu0 %vm6134_vm0, %v6135_v10  ;;  %5832 = vmatprep.subr.bf16.mxu0 %v6133_v0 }
0x217a   :  { %5476 = vmatmul.mubr.msk.f32.vlgmr.msra.gmra.mrb[48].mxu1 %vm535_vm2, %v3737_v8 }
0x217b   :  { %5828 = vmatpush3.bf16.msra.mxu1 %v6652_v26  ;;  %5491 = vmatprep.mubr.msk.f32.mxu1 %vm6134_vm0, %v6135_v10 }
0x217c   :  { %5829 = vmatprep.subr.bf16.mxu1 %v6133_v0 }
0x217f   :  { %5831 = vmatpush3.bf16.msra.mxu1 %v6665_v29 }
0x2180   :  { %5505 = vmatprep.subr.mxu1 %v6135_v10 }
0x2245   :  { %v3731_v9 = vpop.f32.mrb[46].mxu1 }
0x2246   :  { %v5455_v11 = vpop.f32.mrb[47].mxu1 }
0x224a   :  { %v3806_v12 = vpop.f32.mrb[50].mxu0 }
0x224b   :  { %v3807_v13 = vadd.f32 %v3806_v12, %v3731_v9  ;;  %v5466_v14 = vpop.f32.mrb[51].mxu0 }
0x224d   :  { %v3810_v15 = vadd.f32 %v6969_v31, %v3807_v13  ;;  %v3909_v17 = vpop.f32.mrb[48].mxu1 }
0x224e   :  { %v3913_v18 = vadd.f32 %v3909_v17, %v3842_v16  ;;  %v5477_v19 = vpop.f32.mrb[49].mxu1 }
0x224f   :  { %6051 = vtanh.f32 %v3810_v15  ;;  %v4754_v23 = vmul.f32 -1.442695, %v3810_v15 }
0x2250   :  { %6053 = vtanh.f32 %v3913_v18  ;;  %v4756_v24 = vmul.f32 -1.442695, %v3913_v18 }
0x2251   :  { %6055 = vpow2.f32 %v4754_v23 }
0x2252   :  { %6057 = vpow2.f32 %v4756_v24 }
0x2259   :  { %v6052_v20 = vpop.eup %6051 }
0x225a   :  { %v6054_v21 = vpop.eup %6053  ;;  %3820 = vrot.lane.b32.xlu0 %v6052_v20, %s6138_s23 }
0x225b   :  { %3923 = vrot.lane.b32.xlu1 %v6054_v21, %s6136_s0  ;;  %v6056_v27 = vpop.eup %6055 }
0x225c   :  { %v6058_v28 = vpop.eup %6057  ;;  %v3814_v30 = vadd.f32 1.0, %v6056_v27 }
0x225d   :  { %v3917_v32 = vadd.f32 1.0, %v6058_v28 }
0x225e   :  { %6059 = vrcp.f32 %v3814_v30 }
0x225f   :  { %6061 = vrcp.f32 %v3917_v32 }
0x2268   :  { %v6060_v33 = vpop.eup %6059 }
0x2269   :  { %v6062_v35 = vpop.eup %6061  ;;  %v3818_v40 = vmul.f32 %v6060_v33, %v7091_v58 }
0x226a   :  { %v3921_v41 = vmul.f32 %v6062_v35, %v7095_v36 }
0x22cc   :  { %v3821_v34 = vpop.permute.xlu0 %3820 }
0x22cd   :  { %v3924_v37 = vpop.permute.xlu1 %3923  ;;  %v3823_v38 = vmul.f32 %v6060_v33, %v3821_v34 }
0x22ce   :  { %v3926_v39 = vmul.f32 %v6062_v35, %v3924_v37 }
0x22cf   :  { %3825 = vrot.lane.b32.xlu0 %v3823_v38, %s6139_s24 }
0x22d0   :  { %3928 = vrot.lane.b32.xlu1 %v3926_v39, %s6137_s3 }
0x2341   :  { %v3826_v42 = vpop.permute.xlu0 %3825 }
0x2342   :  { %v3929_v43 = vpop.permute.xlu1 %3928  ;;  %v7130_v44 = vadd.f32 %v3826_v42, %v3818_v40 }
0x2343   :  { %v7132_v25 = vadd.f32 %v3929_v43, %v3921_v41  ;;  %v4392_v41 = vld [vmem:[#allocation2 + $0x1c] sm:$0x3] }
0x2344   :  { %6063 = vtanh.f32 %v7130_v44 }
0x2345   :  { %6065 = vtanh.f32 %v7132_v25 }
0x234e   :  { %v6064_v45 = vpop.eup %6063 }
0x234f   :  { %v6066_v46 = vpop.eup %6065  ;;  %3831 = vrot.lane.b32.xlu0 %v6064_v45, %s6140_s25 }
0x2350   :  { %3934 = vrot.lane.b32.xlu1 %v6066_v46, %s6136_s0 }
0x23c1   :  { %v3832_v47 = vpop.permute.xlu0 %3831 }
0x23c2   :  { %v3935_v48 = vpop.permute.xlu1 %3934  ;;  %v3834_v49 = vmul.f32 %v6060_v33, %v3832_v47 }
0x23c3   :  { %v3937_v50 = vmul.f32 %v6062_v35, %v3935_v48 }
0x23c4   :  { %3836 = vrot.lane.b32.xlu0 %v3834_v49, %s6141_s26 }
0x23c5   :  { %4011 = vrot.lane.b32.xlu1 %v3937_v50, %s6137_s3 }
0x2436   :  { %v3837_v51 = vpop.permute.xlu0 %3836 }
0x2437   :  { %v4012_v52 = vpop.permute.xlu1 %4011  ;;  %v3839_v53 = vsel %vm634_vm3, %v3837_v51, 0.0  ;;  %5481 = vmatmul.mubr.msk.f32.vlgmr.msra.gmra.mrb[52].mxu0 %vm634_vm3, %v3837_v51 }
0x2438   :  { %3841 = vst [vmem:[#allocation3 + $0x16] sm:$0x3] %v3839_v53  ;;  %5492 = vmatmul.mubr.msk.f32.vlgmr.msra.gmra.mrb[50].mxu1 %vm535_vm2, %v4012_v52  ;;  %5834 = vmatpush3.bf16.msra.mxu0 %v6589_v63 }
0x2439   :  { %5835 = vmatprep.subr.bf16.mxu0 %v6133_v0  ;;  %5502 = vmatprep.mubr.msk.f32.mxu0 %vm6134_vm0, %v6135_v10 }
0x243a   :  { %5506 = vmatpush3.msk.msra.mxu1 %vm637_vm1, %v6952_v22  ;;  %5507 = vmatprep.mubr.msk.f32.mxu1 %vm6134_vm0, %v6135_v10 }
0x243b   :  { %5844 = vmatprep.subr.bf16.mxu1 %v6133_v0 }
0x243c   :  { %5837 = vmatpush3.bf16.msra.mxu0 %v6612_v7 }
0x243d   :  { %5838 = vmatprep.subr.bf16.mxu0 %v6133_v0 }
0x243f   :  { %5503 = vmatmul.mubr.msk.f32.vlgmr.msra.gmra.mrb[54].mxu0 %vm535_vm2, %v4012_v52 }
0x2440   :  { %5840 = vmatpush3.bf16.msra.mxu0 %v6652_v26  ;;  %5518 = vmatprep.mubr.msk.f32.mxu0 %vm6134_vm0, %v6135_v10 }
0x2441   :  { %5841 = vmatprep.subr.bf16.mxu0 %v6133_v0 }
0x2444   :  { %5843 = vmatpush3.bf16.msra.mxu0 %v6665_v29 }
0x2445   :  { %5532 = vmatprep.subr.mxu0 %v6135_v10 }
0x250a   :  { %v4006_v54 = vpop.f32.mrb[52].mxu0 }
0x250b   :  { %v4081_v55 = vpop.f32.mrb[50].mxu1  ;;  %v5482_v56 = vpop.f32.mrb[53].mxu0 }
0x250c   :  { %v4082_v57 = vadd.f32 %v4081_v55, %v4006_v54  ;;  %v5493_v58 = vpop.f32.mrb[51].mxu1 }
0x250e   :  { %v4085_v59 = vadd.f32 %v6969_v31, %v4082_v57 }
0x2510   :  { %6067 = vtanh.f32 %v4085_v59  ;;  %v4760_v3 = vmul.f32 -1.442695, %v4085_v59 }
0x2512   :  { %v4184_v36 = vpop.f32.mrb[54].mxu0 }
0x2513   :  { %v4188_v61 = vadd.f32 %v4184_v36, %v4117_v60  ;;  %v5504_v62 = vpop.f32.mrb[55].mxu0 }
0x2515   :  { %6069 = vtanh.f32 %v4188_v61  ;;  %v4762_v4 = vmul.f32 -1.442695, %v4188_v61 }
0x2516   :  { %6071 = vpow2.f32 %v4760_v3 }
0x2517   :  { %6073 = vpow2.f32 %v4762_v4 }
0x251a   :  { %v6068_v1 = vpop.eup %6067 }
0x251b   :  { %4095 = vrot.lane.b32.xlu0 %v6068_v1, %s6138_s23 }
0x251f   :  { %v6070_v2 = vpop.eup %6069 }
0x2520   :  { %4198 = vrot.lane.b32.xlu1 %v6070_v2, %s6136_s0  ;;  %v6072_v5 = vpop.eup %6071 }
0x2521   :  { %v4089_v6 = vadd.f32 1.0, %v6072_v5  ;;  %v6074_v8 = vpop.eup %6073 }
0x2522   :  { %v4192_v9 = vadd.f32 1.0, %v6074_v8 }
0x2523   :  { %6075 = vrcp.f32 %v4089_v6 }
0x2524   :  { %6077 = vrcp.f32 %v4192_v9 }
0x252d   :  { %v6076_v11 = vpop.eup %6075 }
0x252e   :  { %v6078_v14 = vpop.eup %6077  ;;  %v4093_v17 = vmul.f32 %v6076_v11, %v7130_v44 }
0x252f   :  { %v4196_v20 = vmul.f32 %v6078_v14, %v7132_v25 }
0x258d   :  { %v4096_v12 = vpop.permute.xlu0 %4095 }
0x258e   :  { %v4098_v13 = vmul.f32 %v6076_v11, %v4096_v12 }
0x2590   :  { %4100 = vrot.lane.b32.xlu0 %v4098_v13, %s6139_s24 }
0x2592   :  { %v4199_v15 = vpop.permute.xlu1 %4198 }
0x2593   :  { %v4201_v16 = vmul.f32 %v6078_v14, %v4199_v15 }
0x2595   :  { %4203 = vrot.lane.b32.xlu1 %v4201_v16, %s6137_s3 }
0x2602   :  { %v4101_v18 = vpop.permute.xlu0 %4100 }
0x2603   :  { %v7167_v19 = vadd.f32 %v4101_v18, %v4093_v17 }
0x2605   :  { %6079 = vtanh.f32 %v7167_v19 }
0x2607   :  { %v4204_v21 = vpop.permute.xlu1 %4203 }
0x2608   :  { %v7171_v23 = vadd.f32 %v4204_v21, %v4196_v20 }
0x260a   :  { %6081 = vtanh.f32 %v7171_v23 }
0x260f   :  { %v6080_v24 = vpop.eup %6079 }
0x2610   :  { %4106 = vrot.lane.b32.xlu0 %v6080_v24, %s6140_s25 }
0x2614   :  { %v6082_v27 = vpop.eup %6081 }
0x2615   :  { %4209 = vrot.lane.b32.xlu1 %v6082_v27, %s6136_s0 }
0x2682   :  { %v4107_v28 = vpop.permute.xlu0 %4106 }
0x2683   :  { %v4109_v30 = vmul.f32 %v6076_v11, %v4107_v28 }
0x2685   :  { %4111 = vrot.lane.b32.xlu0 %v4109_v30, %s6141_s26 }
0x2687   :  { %v4210_v32 = vpop.permute.xlu1 %4209 }
0x2688   :  { %v4212_v33 = vmul.f32 %v6078_v14, %v4210_v32 }
0x268a   :  { %4286 = vrot.lane.b32.xlu1 %v4212_v33, %s6137_s3 }
0x26f7   :  { %v4112_v34 = vpop.permute.xlu0 %4111 }
0x26f8   :  { %v4114_v35 = vsel %vm634_vm3, %v4112_v34, 0.0  ;;  %5508 = vmatmul.mubr.msk.f32.vlgmr.msra.gmra.mrb[52].mxu1 %vm634_vm3, %v4112_v34 }
0x26f9   :  { %4116 = vst [vmem:[#allocation3 + $0x18] sm:$0x3] %v4114_v35  ;;  %5846 = vmatpush3.bf16.msra.mxu1 %v6589_v63  ;;  %5529 = vmatprep.mubr.msk.f32.mxu1 %vm6134_vm0, %v6135_v10 }
0x26fa   :  { %5847 = vmatprep.subr.bf16.mxu1 %v6133_v0 }
0x26fc   :  { %v4287_v37 = vpop.permute.xlu1 %4286 }
0x26fd   :  { %5849 = vmatpush3.bf16.msra.mxu1 %v6612_v7  ;;  %5519 = vmatmul.mubr.msk.f32.vlgmr.msra.gmra.mrb[56].mxu0 %vm535_vm2, %v4287_v37 }
0x26fe   :  { %5850 = vmatprep.subr.bf16.mxu1 %v6133_v0  ;;  %5533 = vmatpush3.msk.msra.mxu0 %vm637_vm1, %v6952_v22 }
0x26ff   :  { %5534 = vmatprep.mubr.msk.f32.mxu0 %vm6134_vm0, %v6135_v10 }
0x2700   :  { %5530 = vmatmul.mubr.msk.f32.vlgmr.msra.gmra.mrb[54].mxu1 %vm535_vm2, %v4287_v37 }
0x2701   :  { %5852 = vmatpush3.bf16.msra.mxu1 %v6652_v26  ;;  %5545 = vmatprep.mubr.msk.f32.mxu1 %vm6134_vm0, %v6135_v10 }
0x2702   :  { %5853 = vmatprep.subr.bf16.mxu1 %v6133_v0 }
0x2705   :  { %5855 = vmatpush3.bf16.msra.mxu1 %v6665_v29 }
0x27cb   :  { %v4281_v63 = vpop.f32.mrb[52].mxu1 }
0x27cc   :  { %v5509_v7 = vpop.f32.mrb[53].mxu1 }
0x27d0   :  { %v4356_v38 = vpop.f32.mrb[56].mxu0 }
0x27d1   :  { %v4357_v39 = vadd.f32 %v4356_v38, %v4281_v63  ;;  %v5520_v40 = vpop.f32.mrb[57].mxu0 }
0x27d3   :  { %v4360_v22 = vadd.f32 %v6969_v31, %v4357_v39  ;;  %v4459_v42 = vpop.f32.mrb[54].mxu1 }
0x27d4   :  { %v4463_v43 = vadd.f32 %v4459_v42, %v4392_v41  ;;  %v5531_v44 = vpop.f32.mrb[55].mxu1 }
0x27d5   :  { %6083 = vtanh.f32 %v4360_v22  ;;  %v4766_v0 = vmul.f32 -1.442695, %v4360_v22 }
0x27d6   :  { %6085 = vtanh.f32 %v4463_v43  ;;  %v4768_v10 = vmul.f32 -1.442695, %v4463_v43 }
0x27d7   :  { %6087 = vpow2.f32 %v4766_v0 }
0x27d8   :  { %6089 = vpow2.f32 %v4768_v10 }
0x27df   :  { %v6084_v26 = vpop.eup %6083 }
0x27e0   :  { %v6086_v25 = vpop.eup %6085  ;;  %4370 = vrot.lane.b32.xlu0 %v6084_v26, %s6138_s23 }
0x27e1   :  { %4473 = vrot.lane.b32.xlu1 %v6086_v25, %s6136_s0  ;;  %v6088_v29 = vpop.eup %6087 }
0x27e2   :  { %v6090_v45 = vpop.eup %6089  ;;  %v4364_v46 = vadd.f32 1.0, %v6088_v29 }
0x27e3   :  { %v4467_v47 = vadd.f32 1.0, %v6090_v45 }
0x27e4   :  { %6091 = vrcp.f32 %v4364_v46 }
0x27e5   :  { %6093 = vrcp.f32 %v4467_v47 }
0x27ee   :  { %v6092_v48 = vpop.eup %6091 }
0x27ef   :  { %v6094_v50 = vpop.eup %6093  ;;  %v4368_v54 = vmul.f32 %v6092_v48, %v7167_v19 }
0x27f0   :  { %v4471_v55 = vmul.f32 %v6094_v50, %v7171_v23 }
0x2852   :  { %v4371_v49 = vpop.permute.xlu0 %4370 }
0x2853   :  { %v4474_v51 = vpop.permute.xlu1 %4473  ;;  %v4373_v52 = vmul.f32 %v6092_v48, %v4371_v49 }
0x2854   :  { %v4476_v53 = vmul.f32 %v6094_v50, %v4474_v51 }
0x2855   :  { %4375 = vrot.lane.b32.xlu0 %v4373_v52, %s6139_s24 }
0x2856   :  { %4478 = vrot.lane.b32.xlu1 %v4476_v53, %s6137_s3 }
0x28c7   :  { %v4376_v56 = vpop.permute.xlu0 %4375 }
0x28c8   :  { %v4479_v57 = vpop.permute.xlu1 %4478  ;;  %v4378_v58 = vadd.f32 %v4376_v56, %v4368_v54 }
0x28c9   :  { %v4481_v59 = vadd.f32 %v4479_v57, %v4471_v55 }
0x28ca   :  { %6095 = vtanh.f32 %v4378_v58 }
0x28cb   :  { %6097 = vtanh.f32 %v4481_v59 }
0x28d4   :  { %v6096_v60 = vpop.eup %6095 }
0x28d5   :  { %v6098_v36 = vpop.eup %6097  ;;  %4381 = vrot.lane.b32.xlu0 %v6096_v60, %s6140_s25 }
0x28d6   :  { %4484 = vrot.lane.b32.xlu1 %v6098_v36, %s6136_s0 }
0x2947   :  { %v4382_v61 = vpop.permute.xlu0 %4381 }
0x2948   :  { %v4485_v62 = vpop.permute.xlu1 %4484  ;;  %v4384_v1 = vmul.f32 %v6092_v48, %v4382_v61 }
0x2949   :  { %v4487_v2 = vmul.f32 %v6094_v50, %v4485_v62 }
0x294a   :  { %4386 = vrot.lane.b32.xlu0 %v4384_v1, %s6141_s26 }
0x294b   :  { %4561 = vrot.lane.b32.xlu1 %v4487_v2, %s6137_s3 }
0x29bc   :  { %v4387_v3 = vpop.permute.xlu0 %4386 }
0x29bd   :  { %v4562_v4 = vpop.permute.xlu1 %4561  ;;  %v4389_v5 = vsel %vm634_vm3, %v4387_v3, 0.0  ;;  %5535 = vmatmul.mubr.msk.f32.vlgmr.msra.gmra.mrb[58].mxu0 %vm634_vm3, %v4387_v3 }
0x29be   :  { %4391 = vst [vmem:[#allocation3 + $0x1a] sm:$0x3] %v4389_v5  ;;  %5546 = vmatmul.mubr.msk.f32.vlgmr.msra.gmra.mrb[56].mxu1 %vm535_vm2, %v4562_v4 }
0x2a90   :  { %v4556_v6 = vpop.f32.mrb[58].mxu0 }
0x2a91   :  { %v4631_v8 = vpop.f32.mrb[56].mxu1  ;;  %v5536_v9 = vpop.f32.mrb[59].mxu0 }
0x2a92   :  { %v4632_v11 = vadd.f32 %v4631_v8, %v4556_v6  ;;  %v5547_v12 = vpop.f32.mrb[57].mxu1 }
0x2a94   :  { %v4635_v13 = vadd.f32 %v6969_v31, %v4632_v11 }
0x2a96   :  { %6099 = vtanh.f32 %v4635_v13  ;;  %v4772_v15 = vmul.f32 -1.442695, %v4635_v13 }
0x2a98   :  { %6101 = vpow2.f32 %v4772_v15 }
0x2aa0   :  { %v6100_v14 = vpop.eup %6099 }
0x2aa1   :  { %4645 = vrot.lane.b32.xlu0 %v6100_v14, %s6138_s23 }
0x2aa2   :  { %v6102_v16 = vpop.eup %6101 }
0x2aa3   :  { %v4639_v17 = vadd.f32 1.0, %v6102_v16 }
0x2aa5   :  { %6103 = vrcp.f32 %v4639_v17 }
0x2aaf   :  { %v6104_v18 = vpop.eup %6103 }
0x2ab0   :  { %v4643_v21 = vmul.f32 %v6104_v18, %v4378_v58 }
0x2b13   :  { %v4646_v19 = vpop.permute.xlu0 %4645 }
0x2b14   :  { %v4648_v20 = vmul.f32 %v6104_v18, %v4646_v19 }
0x2b16   :  { %4650 = vrot.lane.b32.xlu1 %v4648_v20, %s6139_s24 }
0x2b88   :  { %v4651_v23 = vpop.permute.xlu1 %4650 }
0x2b89   :  { %v4653_v24 = vadd.f32 %v4651_v23, %v4643_v21 }
0x2b8b   :  { %6105 = vtanh.f32 %v4653_v24 }
0x2b95   :  { %v6106_v27 = vpop.eup %6105 }
0x2b96   :  { %4656 = vrot.lane.b32.xlu0 %v6106_v27, %s6140_s25 }
0x2c08   :  { %v4657_v31 = vpop.permute.xlu0 %4656 }
0x2c09   :  { %v4659_v28 = vmul.f32 %v6104_v18, %v4657_v31 }
0x2c0b   :  { %4661 = vrot.lane.b32.xlu1 %v4659_v28, %s6141_s26 }
0x2c7d   :  { %v4662_v30 = vpop.permute.xlu1 %4661 }
0x2c7e   :  { %v4664_v32 = vsel %vm634_vm3, %v4662_v30, 0.0 }
0x2c7f   :  { %4666 = vst [vmem:[#allocation3 + $0x1c] sm:$0x3] %v4664_v32 }
0x2c80   :  { %6120 = shalt.err (!%p6117_p4)
}
0x2c81   :  { %s6121_s10 = scalar_lea.hbm %s7238_s7, 480 }
0x2c82   :  { %p6122_p5 = scmp.ne.s32.totalorder %s7238_s7, %s6121_s10  ;;  %p6125_p6 = scmp.lt.u32.totalorder %s6121_s10, %s7238_s7 }
0x2c84   :  { %p6127_p7 = pnand %p6125_p6, %p6122_p5 }
0x2c86   :  { %6130 = shalt.err (!%p6127_p7)
}
0x2c87   :  { %s6143_s1 = smov 2  }
0x2c88   :  { %4678 = dma.vmem_to_hbm [thread:$0]  %s4673_s29, 480, %s7238_s7, [#allocation4], %s6137_s3, %s6137_s3, %s6143_s1  }
0x2c89   :  { %6131 = dma.done.wait [#allocation4], 480  }
0x2c8a   :  { %6132 = vsyncadd [#allocation4], 4294966816 }
0x2c8b   :  { %4682 = vsyncpa [#allocation4], 1 }

</bundles_post_ra>
